<compile_context>
chip_gen: v7x
topology: tpu7x:2x2x1
jax: 0.10.0
libtpu: 0.0.40
codegen_flags: <defaults>
</compile_context>

<pallas_src>
import functools
import math

import jax
import jax.numpy as jnp
from jax.experimental import pallas as pl
from jax.experimental.pallas import tpu as pltpu

# ----------------------- small synthetic BERT config -----------------------
VOCAB = 100
VOCAB_PAD = 128          # word table padded to one lane tile; pad rows are zeroed
HIDDEN = 32
LAYERS = 2
HEADS = 4
HEAD_DIM = HIDDEN // HEADS
INTERMEDIATE = 64
MAX_POS = 16
TYPE_VOCAB = 2
NUM_LABELS = 5           # CORAL head outputs NUM_LABELS - 1 logits
LN_EPS = 1e-12           # BertConfig.layer_norm_eps default


# ------------------------------ in-kernel math ------------------------------

def _layernorm(x, g, b):
    mean = jnp.mean(x, axis=-1, keepdims=True)
    xc = x - mean
    var = jnp.mean(xc * xc, axis=-1, keepdims=True)
    return xc * jax.lax.rsqrt(var + LN_EPS) * g + b


def _erf(x):
    # Abramowitz & Stegun 7.1.26 (max abs err ~1.5e-7): exact-enough erf for
    # BERT GELU without relying on a lax.erf Mosaic lowering.
    p = 0.3275911
    a1, a2, a3, a4, a5 = (0.254829592, -0.284496736, 1.421413741,
                          -1.453152027, 1.061405429)
    s = jnp.where(x >= 0.0, 1.0, -1.0)
    ax = jnp.abs(x)
    t = 1.0 / (1.0 + p * ax)
    poly = ((((a5 * t + a4) * t + a3) * t + a2) * t + a1) * t
    return s * (1.0 - poly * jnp.exp(-ax * ax))


def _gelu(x):
    # exact erf-GELU (BERT "gelu"): 0.5 * x * (1 + erf(x / sqrt(2)))
    return 0.5 * x * (1.0 + _erf(x * 0.7071067811865476))


# ------------------------------ fused kernel --------------------------------

def _coral_bert_kernel(
        ids_ref, tids_ref, amask_ref,
        wemb_ref, pemb_ref, temb_ref, eln_g_ref, eln_b_ref,
        wq_ref, bq_ref, wk_ref, bk_ref, wv_ref, bv_ref,
        wo_ref, bo_ref, ln1_g_ref, ln1_b_ref,
        wi_ref, bi_ref, wo2_ref, bo2_ref, ln2_g_ref, ln2_b_ref,
        pool_w_ref, pool_b_ref, cls_w_ref, coral_b_ref,
        logits_ref,
        *, batch, seq):
    f32 = jnp.float32
    m = batch * seq

    # -------- embeddings --------
    # word: gather == one-hot matmul on the MXU (table is exactly 1 lane tile)
    ids = ids_ref[...]                                              # (M, 1) int32
    word_oh = jnp.where(
        ids == jax.lax.broadcasted_iota(jnp.int32, (m, VOCAB_PAD), 1), 1.0, 0.0)
    x = jnp.dot(word_oh, wemb_ref[...], preferred_element_type=f32)  # (M, H)

    # position: row i of x has position i % seq -> tile the first `seq` rows.
    pos_rows = pemb_ref[0:seq, :]                                   # (S, H)
    x = x + jnp.concatenate([pos_rows] * batch, axis=0)             # (M, H)

    # token type: TYPE_VOCAB == 2 -> single 2-way select, no matmul.
    tids = tids_ref[...]                                            # (M, 1) int32
    te = temb_ref[...]                                              # (2, H)
    x = x + jnp.where(tids == 0, te[0:1, :], te[1:2, :])

    x = _layernorm(x, eln_g_ref[...], eln_b_ref[...])
    # dropout: identity (eval mode)

    # HF extended additive attention mask, broadcast over query rows: (B,1,S)
    add_mask = ((1.0 - amask_ref[...]) * -10000.0)[:, None, :]

    # Static unroll: LAYERS=2, HEADS=4 (tiny).  Convert to
    # lax.fori_loop(..., unroll=True) if these ever grow.
    for l in range(LAYERS):
        attn = None
        for h in range(HEADS):
            # Per-head projections via (layer, head)-stacked weights: pure
            # leading-axis indexing, no sub-lane-tile column slices.
            # 1/sqrt(HEAD_DIM) is pre-folded into wq/bq at init.
            qh = jnp.dot(x, wq_ref[l, h], preferred_element_type=f32) + bq_ref[l, h]
            kh = jnp.dot(x, wk_ref[l, h], preferred_element_type=f32) + bk_ref[l, h]
            vh = jnp.dot(x, wv_ref[l, h], preferred_element_type=f32) + bv_ref[l, h]
            qb = qh.reshape(batch, seq, HEAD_DIM)
            kb = kh.reshape(batch, seq, HEAD_DIM)
            vb = vh.reshape(batch, seq, HEAD_DIM)

            # Batched over the batch dim (rank-3 dot_general); the tiny 8x8 K
            # transpose inside the contraction lands on the XLU slot.
            s = jnp.einsum("bqd,bkd->bqk", qb, kb,
                           preferred_element_type=f32) + add_mask    # (B,S,S)
            s = s - jnp.max(s, axis=-1, keepdims=True)
            p = jnp.exp(s)
            p = p * pl.reciprocal(jnp.sum(p, axis=-1, keepdims=True), approx=True)
            ctx = jnp.einsum("bqk,bkd->bqd", p, vb,
                             preferred_element_type=f32).reshape(m, HEAD_DIM)

            # Fold the head-concat into the output projection: accumulate
            # ctx_h @ Wo[h] instead of concatenating heads along lanes.
            part = jnp.dot(ctx, wo_ref[l, h], preferred_element_type=f32)
            attn = part if attn is None else attn + part

        attn = attn + bo_ref[l]
        x = _layernorm(x + attn, ln1_g_ref[l], ln1_b_ref[l])

        # ---- FFN with exact-erf GELU + residual + LayerNorm ----
        inter = _gelu(jnp.dot(x, wi_ref[l], preferred_element_type=f32) + bi_ref[l])
        ffn = jnp.dot(inter, wo2_ref[l], preferred_element_type=f32) + bo2_ref[l]
        x = _layernorm(x + ffn, ln2_g_ref[l], ln2_b_ref[l])

    # -------- pooler (tanh on CLS rows) + CORAL classifier + shared bias -----
    cls = x.reshape(batch, seq, HIDDEN)[:, 0, :]                    # (B, H)
    pooled = jnp.tanh(jnp.dot(cls, pool_w_ref[...], preferred_element_type=f32)
                      + pool_b_ref[...])
    logits = (jnp.dot(pooled, cls_w_ref[...], preferred_element_type=f32)
              + coral_b_ref[...])
    logits_ref[...] = logits.astype(logits_ref.dtype)


# --------------------------- parameter construction --------------------------

def init_params(key):
    keys = iter(jax.random.split(key, 64))

    def normal(shape):
        return 0.02 * jax.random.normal(next(keys), shape, dtype=jnp.float32)

    def ones(shape):
        return jnp.ones(shape, jnp.float32)

    def zeros(shape):
        return jnp.zeros(shape, jnp.float32)

    # Zero the word-table padding rows so out-of-range ids can never select
    # garbage (rows >= VOCAB contribute 0 even if ever hit).
    word = normal((VOCAB_PAD, HIDDEN))
    word = jnp.where(jnp.arange(VOCAB_PAD)[:, None] < VOCAB, word, 0.0)

    # Attention score scale 1/sqrt(HEAD_DIM) is folded into wq (and bq; bq is
    # zero here, but it must be scaled too if ever nonzero).
    scale = 1.0 / math.sqrt(HEAD_DIM)

    return {
        "word_emb": word,
        "pos_emb": normal((MAX_POS, HIDDEN)),
        "type_emb": normal((TYPE_VOCAB, HIDDEN)),
        "emb_ln_g": ones((1, HIDDEN)), "emb_ln_b": zeros((1, HIDDEN)),
        # per-(layer, head) attention weights
        "wq": normal((LAYERS, HEADS, HIDDEN, HEAD_DIM)) * scale,
        "bq": zeros((LAYERS, HEADS, 1, HEAD_DIM)) * scale,
        "wk": normal((LAYERS, HEADS, HIDDEN, HEAD_DIM)),
        "bk": zeros((LAYERS, HEADS, 1, HEAD_DIM)),
        "wv": normal((LAYERS, HEADS, HIDDEN, HEAD_DIM)),
        "bv": zeros((LAYERS, HEADS, 1, HEAD_DIM)),
        "wo": normal((LAYERS, HEADS, HEAD_DIM, HIDDEN)),
        "bo": zeros((LAYERS, 1, HIDDEN)),
        "ln1_g": ones((LAYERS, 1, HIDDEN)), "ln1_b": zeros((LAYERS, 1, HIDDEN)),
        # FFN
        "wi": normal((LAYERS, HIDDEN, INTERMEDIATE)),
        "bi": zeros((LAYERS, 1, INTERMEDIATE)),
        "wo2": normal((LAYERS, INTERMEDIATE, HIDDEN)),
        "bo2": zeros((LAYERS, 1, HIDDEN)),
        "ln2_g": ones((LAYERS, 1, HIDDEN)), "ln2_b": zeros((LAYERS, 1, HIDDEN)),
        # pooler + CORAL head (classifier has no bias; shared coral bias added)
        "pool_w": normal((HIDDEN, HIDDEN)), "pool_b": zeros((1, HIDDEN)),
        "cls_w": normal((HIDDEN, NUM_LABELS - 1)),
        "coral_bias": zeros((1, NUM_LABELS - 1)),
    }


# ------------------------------ model forward -------------------------------

def coral_bert_forward(params, input_ids, token_type_ids=None, attention_mask=None):
    if token_type_ids is None:
        token_type_ids = jnp.zeros_like(input_ids)
    if attention_mask is None:
        attention_mask = jnp.ones_like(input_ids)
    B, S = input_ids.shape

    ids = input_ids.reshape(B * S, 1).astype(jnp.int32)
    tids = token_type_ids.reshape(B * S, 1).astype(jnp.int32)
    amask = attention_mask.astype(jnp.float32)

    inputs = (ids, tids, amask,
              params["word_emb"], params["pos_emb"], params["type_emb"],
              params["emb_ln_g"], params["emb_ln_b"],
              params["wq"], params["bq"], params["wk"], params["bk"],
              params["wv"], params["bv"], params["wo"], params["bo"],
              params["ln1_g"], params["ln1_b"],
              params["wi"], params["bi"], params["wo2"], params["bo2"],
              params["ln2_g"], params["ln2_b"],
              params["pool_w"], params["pool_b"],
              params["cls_w"], params["coral_bias"])

    return pl.pallas_call(
        functools.partial(_coral_bert_kernel, batch=B, seq=S),
        out_shape=jax.ShapeDtypeStruct((B, NUM_LABELS - 1), jnp.float32),
        in_specs=[pl.BlockSpec(memory_space=pltpu.MemorySpace.VMEM)
                  for _ in inputs],
        out_specs=pl.BlockSpec(memory_space=pltpu.MemorySpace.VMEM),
    )(*inputs)


# ----------------------------------- main ------------------------------------

if __name__ == "__main__":
    key = jax.random.PRNGKey(0)
    pkey, dkey = jax.random.split(key)
    params = init_params(pkey)

    B, S = 2, 8
    input_ids = jax.random.randint(dkey, (B, S), 0, VOCAB, dtype=jnp.int32)
    token_type_ids = jnp.zeros((B, S), dtype=jnp.int32)
    attention_mask = jnp.array([[1] * S, [1] * 6 + [0] * 2], dtype=jnp.int32)

    fwd = jax.jit(coral_bert_forward)
    logits = fwd(params, input_ids, token_type_ids, attention_mask)
    jax.block_until_ready(logits)
    assert logits.shape == (B, NUM_LABELS - 1) and logits.dtype == jnp.float32
    print("KERNEL_OK")
</pallas_src>

<mosaic_0001>
module attributes {stable_mosaic.version = 11 : i64} {
  func.func @_coral_bert_kernel(%arg0: memref<16x1xi32, #tpu.memory_space<vmem>>, %arg1: memref<16x1xi32, #tpu.memory_space<vmem>>, %arg2: memref<2x8xf32, #tpu.memory_space<vmem>>, %arg3: memref<128x32xf32, #tpu.memory_space<vmem>>, %arg4: memref<16x32xf32, #tpu.memory_space<vmem>>, %arg5: memref<2x32xf32, #tpu.memory_space<vmem>>, %arg6: memref<1x32xf32, #tpu.memory_space<vmem>>, %arg7: memref<1x32xf32, #tpu.memory_space<vmem>>, %arg8: memref<2x4x32x8xf32, #tpu.memory_space<vmem>>, %arg9: memref<2x4x1x8xf32, #tpu.memory_space<vmem>>, %arg10: memref<2x4x32x8xf32, #tpu.memory_space<vmem>>, %arg11: memref<2x4x1x8xf32, #tpu.memory_space<vmem>>, %arg12: memref<2x4x32x8xf32, #tpu.memory_space<vmem>>, %arg13: memref<2x4x1x8xf32, #tpu.memory_space<vmem>>, %arg14: memref<2x4x8x32xf32, #tpu.memory_space<vmem>>, %arg15: memref<2x1x32xf32, #tpu.memory_space<vmem>>, %arg16: memref<2x1x32xf32, #tpu.memory_space<vmem>>, %arg17: memref<2x1x32xf32, #tpu.memory_space<vmem>>, %arg18: memref<2x32x64xf32, #tpu.memory_space<vmem>>, %arg19: memref<2x1x64xf32, #tpu.memory_space<vmem>>, %arg20: memref<2x64x32xf32, #tpu.memory_space<vmem>>, %arg21: memref<2x1x32xf32, #tpu.memory_space<vmem>>, %arg22: memref<2x1x32xf32, #tpu.memory_space<vmem>>, %arg23: memref<2x1x32xf32, #tpu.memory_space<vmem>>, %arg24: memref<32x32xf32, #tpu.memory_space<vmem>>, %arg25: memref<1x32xf32, #tpu.memory_space<vmem>>, %arg26: memref<32x4xf32, #tpu.memory_space<vmem>>, %arg27: memref<1x4xf32, #tpu.memory_space<vmem>>, %arg28: memref<2x4xf32, #tpu.memory_space<vmem>>) attributes {dimension_semantics = [], scalar_prefetch = 0 : i64, scratch_operands = 0 : i64, tpu.core_type = #tpu.core_type<tc>} {
    %c0 = arith.constant 0 : index
    %c0_0 = arith.constant 0 : index
    %0 = vector.load %arg0[%c0, %c0_0] : memref<16x1xi32, #tpu.memory_space<vmem>>, vector<16x1xi32>
    %1 = tpu.iota {dimensions = array<i32: 1>} : vector<16x128xi32>
    %2 = vector.broadcast %0 : vector<16x1xi32> to vector<16x128xi32>
    %3 = arith.cmpi eq, %2, %1 : vector<16x128xi32>
    %cst = arith.constant 1.000000e+00 : f32
    %cst_1 = arith.constant 0.000000e+00 : f32
    %4 = vector.broadcast %cst : f32 to vector<16x128xf32>
    %5 = vector.broadcast %cst_1 : f32 to vector<16x128xf32>
    %6 = arith.select %3, %4, %5 : vector<16x128xi1>, vector<16x128xf32>
    %c0_2 = arith.constant 0 : index
    %c0_3 = arith.constant 0 : index
    %7 = vector.load %arg3[%c0_2, %c0_3] : memref<128x32xf32, #tpu.memory_space<vmem>>, vector<128x32xf32>
    %cst_4 = arith.constant dense<0.000000e+00> : vector<16x32xf32>
    %8 = tpu.matmul %6, %7, %cst_4 {dimension_numbers = #tpu.dot_dimension_numbers<[1], [0], [0], [1], [0, 0, 1, 1], [], []>} : vector<16x128xf32>, vector<128x32xf32>, vector<16x32xf32> -> vector<16x32xf32>
    %c0_5 = arith.constant 0 : index
    %c0_6 = arith.constant 0 : index
    %9 = vector.load %arg4[%c0_5, %c0_6] : memref<16x32xf32, #tpu.memory_space<vmem>>, vector<8x32xf32>
    %10 = tpu.concatenate %9, %9 in 0 : vector<8x32xf32>, vector<8x32xf32> -> vector<16x32xf32>
    %11 = arith.addf %8, %10 : vector<16x32xf32>
    %c0_7 = arith.constant 0 : index
    %c0_8 = arith.constant 0 : index
    %12 = vector.load %arg1[%c0_7, %c0_8] : memref<16x1xi32, #tpu.memory_space<vmem>>, vector<16x1xi32>
    %c0_9 = arith.constant 0 : index
    %c0_10 = arith.constant 0 : index
    %13 = vector.load %arg5[%c0_9, %c0_10] : memref<2x32xf32, #tpu.memory_space<vmem>>, vector<2x32xf32>
    %c0_i32 = arith.constant 0 : i32
    %14 = vector.broadcast %c0_i32 : i32 to vector<16x1xi32>
    %15 = arith.cmpi eq, %12, %14 : vector<16x1xi32>
    %16 = vector.extract_strided_slice %13 {offsets = [0, 0], sizes = [1, 32], strides = [1, 1]} : vector<2x32xf32> to vector<1x32xf32>
    %17 = vector.extract_strided_slice %13 {offsets = [1, 0], sizes = [1, 32], strides = [1, 1]} : vector<2x32xf32> to vector<1x32xf32>
    %18 = vector.shape_cast %15 : vector<16x1xi1> to vector<16x1xi1>
    %19 = vector.broadcast %18 : vector<16x1xi1> to vector<16x32xi1>
    %20 = vector.shape_cast %16 : vector<1x32xf32> to vector<1x32xf32>
    %21 = vector.broadcast %20 : vector<1x32xf32> to vector<16x32xf32>
    %22 = vector.shape_cast %17 : vector<1x32xf32> to vector<1x32xf32>
    %23 = vector.broadcast %22 : vector<1x32xf32> to vector<16x32xf32>
    %24 = arith.select %19, %21, %23 : vector<16x32xi1>, vector<16x32xf32>
    %25 = arith.addf %11, %24 : vector<16x32xf32>
    %c0_11 = arith.constant 0 : index
    %c0_12 = arith.constant 0 : index
    %26 = vector.load %arg6[%c0_11, %c0_12] : memref<1x32xf32, #tpu.memory_space<vmem>>, vector<1x32xf32>
    %c0_13 = arith.constant 0 : index
    %c0_14 = arith.constant 0 : index
    %27 = vector.load %arg7[%c0_13, %c0_14] : memref<1x32xf32, #tpu.memory_space<vmem>>, vector<1x32xf32>
    %cst_15 = arith.constant dense<0.000000e+00> : vector<16xf32>
    %28 = vector.multi_reduction <add>, %25, %cst_15 [1] : vector<16x32xf32> to vector<16xf32>
    %29 = vector.shape_cast %28 : vector<16xf32> to vector<16x1xf32>
    %cst_16 = arith.constant 3.200000e+01 : f32
    %30 = vector.broadcast %cst_16 : f32 to vector<16x1xf32>
    %31 = arith.divf %29, %30 : vector<16x1xf32>
    %32 = vector.broadcast %31 : vector<16x1xf32> to vector<16x32xf32>
    %33 = arith.subf %25, %32 : vector<16x32xf32>
    %34 = arith.mulf %33, %33 : vector<16x32xf32>
    %cst_17 = arith.constant dense<0.000000e+00> : vector<16xf32>
    %35 = vector.multi_reduction <add>, %34, %cst_17 [1] : vector<16x32xf32> to vector<16xf32>
    %36 = vector.shape_cast %35 : vector<16xf32> to vector<16x1xf32>
    %cst_18 = arith.constant 3.200000e+01 : f32
    %37 = vector.broadcast %cst_18 : f32 to vector<16x1xf32>
    %38 = arith.divf %36, %37 : vector<16x1xf32>
    %cst_19 = arith.constant 9.99999996E-13 : f32
    %39 = vector.broadcast %cst_19 : f32 to vector<16x1xf32>
    %40 = arith.addf %38, %39 : vector<16x1xf32>
    %41 = math.rsqrt %40 : vector<16x1xf32>
    %42 = vector.broadcast %41 : vector<16x1xf32> to vector<16x32xf32>
    %43 = arith.mulf %33, %42 : vector<16x32xf32>
    %44 = vector.broadcast %26 : vector<1x32xf32> to vector<16x32xf32>
    %45 = arith.mulf %43, %44 : vector<16x32xf32>
    %46 = vector.broadcast %27 : vector<1x32xf32> to vector<16x32xf32>
    %47 = arith.addf %45, %46 : vector<16x32xf32>
    %c0_20 = arith.constant 0 : index
    %c0_21 = arith.constant 0 : index
    %48 = vector.load %arg2[%c0_20, %c0_21] : memref<2x8xf32, #tpu.memory_space<vmem>>, vector<2x8xf32>
    %cst_22 = arith.constant 1.000000e+00 : f32
    %49 = vector.broadcast %cst_22 : f32 to vector<2x8xf32>
    %50 = arith.subf %49, %48 : vector<2x8xf32>
    %cst_23 = arith.constant -1.000000e+04 : f32
    %51 = vector.broadcast %cst_23 : f32 to vector<2x8xf32>
    %52 = arith.mulf %50, %51 : vector<2x8xf32>
    %53 = vector.shape_cast %52 : vector<2x8xf32> to vector<2x1x8xf32>
    %c0_24 = arith.constant 0 : index
    %c0_25 = arith.constant 0 : index
    %c0_26 = arith.constant 0 : index
    %c0_27 = arith.constant 0 : index
    %54 = vector.load %arg8[%c0_24, %c0_25, %c0_26, %c0_27] : memref<2x4x32x8xf32, #tpu.memory_space<vmem>>, vector<1x1x32x8xf32>
    %55 = vector.shape_cast %54 : vector<1x1x32x8xf32> to vector<32x8xf32>
    %cst_28 = arith.constant dense<0.000000e+00> : vector<16x8xf32>
    %56 = tpu.matmul %47, %55, %cst_28 {dimension_numbers = #tpu.dot_dimension_numbers<[1], [0], [0], [1], [0, 0, 1, 1], [], []>} : vector<16x32xf32>, vector<32x8xf32>, vector<16x8xf32> -> vector<16x8xf32>
    %c0_29 = arith.constant 0 : index
    %c0_30 = arith.constant 0 : index
    %c0_31 = arith.constant 0 : index
    %c0_32 = arith.constant 0 : index
    %57 = vector.load %arg9[%c0_29, %c0_30, %c0_31, %c0_32] : memref<2x4x1x8xf32, #tpu.memory_space<vmem>>, vector<1x1x1x8xf32>
    %58 = vector.shape_cast %57 : vector<1x1x1x8xf32> to vector<1x8xf32>
    %59 = vector.broadcast %58 : vector<1x8xf32> to vector<16x8xf32>
    %60 = arith.addf %56, %59 : vector<16x8xf32>
    %c0_33 = arith.constant 0 : index
    %c0_34 = arith.constant 0 : index
    %c0_35 = arith.constant 0 : index
    %c0_36 = arith.constant 0 : index
    %61 = vector.load %arg10[%c0_33, %c0_34, %c0_35, %c0_36] : memref<2x4x32x8xf32, #tpu.memory_space<vmem>>, vector<1x1x32x8xf32>
    %62 = vector.shape_cast %61 : vector<1x1x32x8xf32> to vector<32x8xf32>
    %cst_37 = arith.constant dense<0.000000e+00> : vector<16x8xf32>
    %63 = tpu.matmul %47, %62, %cst_37 {dimension_numbers = #tpu.dot_dimension_numbers<[1], [0], [0], [1], [0, 0, 1, 1], [], []>} : vector<16x32xf32>, vector<32x8xf32>, vector<16x8xf32> -> vector<16x8xf32>
    %c0_38 = arith.constant 0 : index
    %c0_39 = arith.constant 0 : index
    %c0_40 = arith.constant 0 : index
    %c0_41 = arith.constant 0 : index
    %64 = vector.load %arg11[%c0_38, %c0_39, %c0_40, %c0_41] : memref<2x4x1x8xf32, #tpu.memory_space<vmem>>, vector<1x1x1x8xf32>
    %65 = vector.shape_cast %64 : vector<1x1x1x8xf32> to vector<1x8xf32>
    %66 = vector.broadcast %65 : vector<1x8xf32> to vector<16x8xf32>
    %67 = arith.addf %63, %66 : vector<16x8xf32>
    %c0_42 = arith.constant 0 : index
    %c0_43 = arith.constant 0 : index
    %c0_44 = arith.constant 0 : index
    %c0_45 = arith.constant 0 : index
    %68 = vector.load %arg12[%c0_42, %c0_43, %c0_44, %c0_45] : memref<2x4x32x8xf32, #tpu.memory_space<vmem>>, vector<1x1x32x8xf32>
    %69 = vector.shape_cast %68 : vector<1x1x32x8xf32> to vector<32x8xf32>
    %cst_46 = arith.constant dense<0.000000e+00> : vector<16x8xf32>
    %70 = tpu.matmul %47, %69, %cst_46 {dimension_numbers = #tpu.dot_dimension_numbers<[1], [0], [0], [1], [0, 0, 1, 1], [], []>} : vector<16x32xf32>, vector<32x8xf32>, vector<16x8xf32> -> vector<16x8xf32>
    %c0_47 = arith.constant 0 : index
    %c0_48 = arith.constant 0 : index
    %c0_49 = arith.constant 0 : index
    %c0_50 = arith.constant 0 : index
    %71 = vector.load %arg13[%c0_47, %c0_48, %c0_49, %c0_50] : memref<2x4x1x8xf32, #tpu.memory_space<vmem>>, vector<1x1x1x8xf32>
    %72 = vector.shape_cast %71 : vector<1x1x1x8xf32> to vector<1x8xf32>
    %73 = vector.broadcast %72 : vector<1x8xf32> to vector<16x8xf32>
    %74 = arith.addf %70, %73 : vector<16x8xf32>
    %75 = vector.shape_cast %60 : vector<16x8xf32> to vector<2x8x8xf32>
    %76 = vector.shape_cast %67 : vector<16x8xf32> to vector<2x8x8xf32>
    %77 = vector.shape_cast %74 : vector<16x8xf32> to vector<2x8x8xf32>
    "tpu.trace_start"() <{level = 10 : i32, message = "bqd,bkd->bqk"}> : () -> ()
    %cst_51 = arith.constant dense<0.000000e+00> : vector<2x8x8xf32>
    %78 = tpu.matmul %75, %76, %cst_51 {dimension_numbers = #tpu.dot_dimension_numbers<[2], [2], [1], [1], [0, 0, 0, 1, 1, 1], [0], [0]>} : vector<2x8x8xf32>, vector<2x8x8xf32>, vector<2x8x8xf32> -> vector<2x8x8xf32>
    "tpu.trace_stop"() : () -> ()
    %79 = vector.broadcast %53 : vector<2x1x8xf32> to vector<2x8x8xf32>
    %80 = arith.addf %78, %79 : vector<2x8x8xf32>
    %cst_52 = arith.constant dense<0xFF800000> : vector<2x8xf32>
    %81 = vector.multi_reduction <maximumf>, %80, %cst_52 [2] : vector<2x8x8xf32> to vector<2x8xf32>
    %82 = vector.shape_cast %81 : vector<2x8xf32> to vector<2x8x1xf32>
    %83 = vector.broadcast %82 : vector<2x8x1xf32> to vector<2x8x8xf32>
    %84 = arith.subf %80, %83 : vector<2x8x8xf32>
    %85 = math.exp %84 : vector<2x8x8xf32>
    %cst_53 = arith.constant dense<0.000000e+00> : vector<2x8xf32>
    %86 = vector.multi_reduction <add>, %85, %cst_53 [2] : vector<2x8x8xf32> to vector<2x8xf32>
    %87 = vector.shape_cast %86 : vector<2x8xf32> to vector<2x8x1xf32>
    %88 = tpu.reciprocal %87 {approx = true} : vector<2x8x1xf32> -> vector<2x8x1xf32>
    %89 = vector.broadcast %88 : vector<2x8x1xf32> to vector<2x8x8xf32>
    %90 = arith.mulf %85, %89 : vector<2x8x8xf32>
    "tpu.trace_start"() <{level = 10 : i32, message = "bqk,bkd->bqd"}> : () -> ()
    %cst_54 = arith.constant dense<0.000000e+00> : vector<2x8x8xf32>
    %91 = tpu.matmul %90, %77, %cst_54 {dimension_numbers = #tpu.dot_dimension_numbers<[2], [1], [1], [2], [0, 0, 0, 1, 1, 2], [0], [0]>} : vector<2x8x8xf32>, vector<2x8x8xf32>, vector<2x8x8xf32> -> vector<2x8x8xf32>
    "tpu.trace_stop"() : () -> ()
    %92 = vector.shape_cast %91 : vector<2x8x8xf32> to vector<16x8xf32>
    %c0_55 = arith.constant 0 : index
    %c0_56 = arith.constant 0 : index
    %c0_57 = arith.constant 0 : index
    %c0_58 = arith.constant 0 : index
    %93 = vector.load %arg14[%c0_55, %c0_56, %c0_57, %c0_58] : memref<2x4x8x32xf32, #tpu.memory_space<vmem>>, vector<1x1x8x32xf32>
    %94 = vector.shape_cast %93 : vector<1x1x8x32xf32> to vector<8x32xf32>
    %cst_59 = arith.constant dense<0.000000e+00> : vector<16x32xf32>
    %95 = tpu.matmul %92, %94, %cst_59 {dimension_numbers = #tpu.dot_dimension_numbers<[1], [0], [0], [1], [0, 0, 1, 1], [], []>} : vector<16x8xf32>, vector<8x32xf32>, vector<16x32xf32> -> vector<16x32xf32>
    %c0_60 = arith.constant 0 : index
    %c1 = arith.constant 1 : index
    %c0_61 = arith.constant 0 : index
    %c0_62 = arith.constant 0 : index
    %96 = vector.load %arg8[%c0_60, %c1, %c0_61, %c0_62] : memref<2x4x32x8xf32, #tpu.memory_space<vmem>>, vector<1x1x32x8xf32>
    %97 = vector.shape_cast %96 : vector<1x1x32x8xf32> to vector<32x8xf32>
    %cst_63 = arith.constant dense<0.000000e+00> : vector<16x8xf32>
    %98 = tpu.matmul %47, %97, %cst_63 {dimension_numbers = #tpu.dot_dimension_numbers<[1], [0], [0], [1], [0, 0, 1, 1], [], []>} : vector<16x32xf32>, vector<32x8xf32>, vector<16x8xf32> -> vector<16x8xf32>
    %c0_64 = arith.constant 0 : index
    %c1_65 = arith.constant 1 : index
    %c0_66 = arith.constant 0 : index
    %c0_67 = arith.constant 0 : index
    %99 = vector.load %arg9[%c0_64, %c1_65, %c0_66, %c0_67] : memref<2x4x1x8xf32, #tpu.memory_space<vmem>>, vector<1x1x1x8xf32>
    %100 = vector.shape_cast %99 : vector<1x1x1x8xf32> to vector<1x8xf32>
    %101 = vector.broadcast %100 : vector<1x8xf32> to vector<16x8xf32>
    %102 = arith.addf %98, %101 : vector<16x8xf32>
    %c0_68 = arith.constant 0 : index
    %c1_69 = arith.constant 1 : index
    %c0_70 = arith.constant 0 : index
    %c0_71 = arith.constant 0 : index
    %103 = vector.load %arg10[%c0_68, %c1_69, %c0_70, %c0_71] : memref<2x4x32x8xf32, #tpu.memory_space<vmem>>, vector<1x1x32x8xf32>
    %104 = vector.shape_cast %103 : vector<1x1x32x8xf32> to vector<32x8xf32>
    %cst_72 = arith.constant dense<0.000000e+00> : vector<16x8xf32>
    %105 = tpu.matmul %47, %104, %cst_72 {dimension_numbers = #tpu.dot_dimension_numbers<[1], [0], [0], [1], [0, 0, 1, 1], [], []>} : vector<16x32xf32>, vector<32x8xf32>, vector<16x8xf32> -> vector<16x8xf32>
    %c0_73 = arith.constant 0 : index
    %c1_74 = arith.constant 1 : index
    %c0_75 = arith.constant 0 : index
    %c0_76 = arith.constant 0 : index
    %106 = vector.load %arg11[%c0_73, %c1_74, %c0_75, %c0_76] : memref<2x4x1x8xf32, #tpu.memory_space<vmem>>, vector<1x1x1x8xf32>
    %107 = vector.shape_cast %106 : vector<1x1x1x8xf32> to vector<1x8xf32>
    %108 = vector.broadcast %107 : vector<1x8xf32> to vector<16x8xf32>
    %109 = arith.addf %105, %108 : vector<16x8xf32>
    %c0_77 = arith.constant 0 : index
    %c1_78 = arith.constant 1 : index
    %c0_79 = arith.constant 0 : index
    %c0_80 = arith.constant 0 : index
    %110 = vector.load %arg12[%c0_77, %c1_78, %c0_79, %c0_80] : memref<2x4x32x8xf32, #tpu.memory_space<vmem>>, vector<1x1x32x8xf32>
    %111 = vector.shape_cast %110 : vector<1x1x32x8xf32> to vector<32x8xf32>
    %cst_81 = arith.constant dense<0.000000e+00> : vector<16x8xf32>
    %112 = tpu.matmul %47, %111, %cst_81 {dimension_numbers = #tpu.dot_dimension_numbers<[1], [0], [0], [1], [0, 0, 1, 1], [], []>} : vector<16x32xf32>, vector<32x8xf32>, vector<16x8xf32> -> vector<16x8xf32>
    %c0_82 = arith.constant 0 : index
    %c1_83 = arith.constant 1 : index
    %c0_84 = arith.constant 0 : index
    %c0_85 = arith.constant 0 : index
    %113 = vector.load %arg13[%c0_82, %c1_83, %c0_84, %c0_85] : memref<2x4x1x8xf32, #tpu.memory_space<vmem>>, vector<1x1x1x8xf32>
    %114 = vector.shape_cast %113 : vector<1x1x1x8xf32> to vector<1x8xf32>
    %115 = vector.broadcast %114 : vector<1x8xf32> to vector<16x8xf32>
    %116 = arith.addf %112, %115 : vector<16x8xf32>
    %117 = vector.shape_cast %102 : vector<16x8xf32> to vector<2x8x8xf32>
    %118 = vector.shape_cast %109 : vector<16x8xf32> to vector<2x8x8xf32>
    %119 = vector.shape_cast %116 : vector<16x8xf32> to vector<2x8x8xf32>
    "tpu.trace_start"() <{level = 10 : i32, message = "bqd,bkd->bqk"}> : () -> ()
    %cst_86 = arith.constant dense<0.000000e+00> : vector<2x8x8xf32>
    %120 = tpu.matmul %117, %118, %cst_86 {dimension_numbers = #tpu.dot_dimension_numbers<[2], [2], [1], [1], [0, 0, 0, 1, 1, 1], [0], [0]>} : vector<2x8x8xf32>, vector<2x8x8xf32>, vector<2x8x8xf32> -> vector<2x8x8xf32>
    "tpu.trace_stop"() : () -> ()
    %121 = vector.broadcast %53 : vector<2x1x8xf32> to vector<2x8x8xf32>
    %122 = arith.addf %120, %121 : vector<2x8x8xf32>
    %cst_87 = arith.constant dense<0xFF800000> : vector<2x8xf32>
    %123 = vector.multi_reduction <maximumf>, %122, %cst_87 [2] : vector<2x8x8xf32> to vector<2x8xf32>
    %124 = vector.shape_cast %123 : vector<2x8xf32> to vector<2x8x1xf32>
    %125 = vector.broadcast %124 : vector<2x8x1xf32> to vector<2x8x8xf32>
    %126 = arith.subf %122, %125 : vector<2x8x8xf32>
    %127 = math.exp %126 : vector<2x8x8xf32>
    %cst_88 = arith.constant dense<0.000000e+00> : vector<2x8xf32>
    %128 = vector.multi_reduction <add>, %127, %cst_88 [2] : vector<2x8x8xf32> to vector<2x8xf32>
    %129 = vector.shape_cast %128 : vector<2x8xf32> to vector<2x8x1xf32>
    %130 = tpu.reciprocal %129 {approx = true} : vector<2x8x1xf32> -> vector<2x8x1xf32>
    %131 = vector.broadcast %130 : vector<2x8x1xf32> to vector<2x8x8xf32>
    %132 = arith.mulf %127, %131 : vector<2x8x8xf32>
    "tpu.trace_start"() <{level = 10 : i32, message = "bqk,bkd->bqd"}> : () -> ()
    %cst_89 = arith.constant dense<0.000000e+00> : vector<2x8x8xf32>
    %133 = tpu.matmul %132, %119, %cst_89 {dimension_numbers = #tpu.dot_dimension_numbers<[2], [1], [1], [2], [0, 0, 0, 1, 1, 2], [0], [0]>} : vector<2x8x8xf32>, vector<2x8x8xf32>, vector<2x8x8xf32> -> vector<2x8x8xf32>
    "tpu.trace_stop"() : () -> ()
    %134 = vector.shape_cast %133 : vector<2x8x8xf32> to vector<16x8xf32>
    %c0_90 = arith.constant 0 : index
    %c1_91 = arith.constant 1 : index
    %c0_92 = arith.constant 0 : index
    %c0_93 = arith.constant 0 : index
    %135 = vector.load %arg14[%c0_90, %c1_91, %c0_92, %c0_93] : memref<2x4x8x32xf32, #tpu.memory_space<vmem>>, vector<1x1x8x32xf32>
    %136 = vector.shape_cast %135 : vector<1x1x8x32xf32> to vector<8x32xf32>
    %cst_94 = arith.constant dense<0.000000e+00> : vector<16x32xf32>
    %137 = tpu.matmul %134, %136, %cst_94 {dimension_numbers = #tpu.dot_dimension_numbers<[1], [0], [0], [1], [0, 0, 1, 1], [], []>} : vector<16x8xf32>, vector<8x32xf32>, vector<16x32xf32> -> vector<16x32xf32>
    %138 = arith.addf %95, %137 : vector<16x32xf32>
    %c0_95 = arith.constant 0 : index
    %c2 = arith.constant 2 : index
    %c0_96 = arith.constant 0 : index
    %c0_97 = arith.constant 0 : index
    %139 = vector.load %arg8[%c0_95, %c2, %c0_96, %c0_97] : memref<2x4x32x8xf32, #tpu.memory_space<vmem>>, vector<1x1x32x8xf32>
    %140 = vector.shape_cast %139 : vector<1x1x32x8xf32> to vector<32x8xf32>
    %cst_98 = arith.constant dense<0.000000e+00> : vector<16x8xf32>
    %141 = tpu.matmul %47, %140, %cst_98 {dimension_numbers = #tpu.dot_dimension_numbers<[1], [0], [0], [1], [0, 0, 1, 1], [], []>} : vector<16x32xf32>, vector<32x8xf32>, vector<16x8xf32> -> vector<16x8xf32>
    %c0_99 = arith.constant 0 : index
    %c2_100 = arith.constant 2 : index
    %c0_101 = arith.constant 0 : index
    %c0_102 = arith.constant 0 : index
    %142 = vector.load %arg9[%c0_99, %c2_100, %c0_101, %c0_102] : memref<2x4x1x8xf32, #tpu.memory_space<vmem>>, vector<1x1x1x8xf32>
    %143 = vector.shape_cast %142 : vector<1x1x1x8xf32> to vector<1x8xf32>
    %144 = vector.broadcast %143 : vector<1x8xf32> to vector<16x8xf32>
    %145 = arith.addf %141, %144 : vector<16x8xf32>
    %c0_103 = arith.constant 0 : index
    %c2_104 = arith.constant 2 : index
    %c0_105 = arith.constant 0 : index
    %c0_106 = arith.constant 0 : index
    %146 = vector.load %arg10[%c0_103, %c2_104, %c0_105, %c0_106] : memref<2x4x32x8xf32, #tpu.memory_space<vmem>>, vector<1x1x32x8xf32>
    %147 = vector.shape_cast %146 : vector<1x1x32x8xf32> to vector<32x8xf32>
    %cst_107 = arith.constant dense<0.000000e+00> : vector<16x8xf32>
    %148 = tpu.matmul %47, %147, %cst_107 {dimension_numbers = #tpu.dot_dimension_numbers<[1], [0], [0], [1], [0, 0, 1, 1], [], []>} : vector<16x32xf32>, vector<32x8xf32>, vector<16x8xf32> -> vector<16x8xf32>
    %c0_108 = arith.constant 0 : index
    %c2_109 = arith.constant 2 : index
    %c0_110 = arith.constant 0 : index
    %c0_111 = arith.constant 0 : index
    %149 = vector.load %arg11[%c0_108, %c2_109, %c0_110, %c0_111] : memref<2x4x1x8xf32, #tpu.memory_space<vmem>>, vector<1x1x1x8xf32>
    %150 = vector.shape_cast %149 : vector<1x1x1x8xf32> to vector<1x8xf32>
    %151 = vector.broadcast %150 : vector<1x8xf32> to vector<16x8xf32>
    %152 = arith.addf %148, %151 : vector<16x8xf32>
    %c0_112 = arith.constant 0 : index
    %c2_113 = arith.constant 2 : index
    %c0_114 = arith.constant 0 : index
    %c0_115 = arith.constant 0 : index
    %153 = vector.load %arg12[%c0_112, %c2_113, %c0_114, %c0_115] : memref<2x4x32x8xf32, #tpu.memory_space<vmem>>, vector<1x1x32x8xf32>
    %154 = vector.shape_cast %153 : vector<1x1x32x8xf32> to vector<32x8xf32>
    %cst_116 = arith.constant dense<0.000000e+00> : vector<16x8xf32>
    %155 = tpu.matmul %47, %154, %cst_116 {dimension_numbers = #tpu.dot_dimension_numbers<[1], [0], [0], [1], [0, 0, 1, 1], [], []>} : vector<16x32xf32>, vector<32x8xf32>, vector<16x8xf32> -> vector<16x8xf32>
    %c0_117 = arith.constant 0 : index
    %c2_118 = arith.constant 2 : index
    %c0_119 = arith.constant 0 : index
    %c0_120 = arith.constant 0 : index
    %156 = vector.load %arg13[%c0_117, %c2_118, %c0_119, %c0_120] : memref<2x4x1x8xf32, #tpu.memory_space<vmem>>, vector<1x1x1x8xf32>
    %157 = vector.shape_cast %156 : vector<1x1x1x8xf32> to vector<1x8xf32>
    %158 = vector.broadcast %157 : vector<1x8xf32> to vector<16x8xf32>
    %159 = arith.addf %155, %158 : vector<16x8xf32>
    %160 = vector.shape_cast %145 : vector<16x8xf32> to vector<2x8x8xf32>
    %161 = vector.shape_cast %152 : vector<16x8xf32> to vector<2x8x8xf32>
    %162 = vector.shape_cast %159 : vector<16x8xf32> to vector<2x8x8xf32>
    "tpu.trace_start"() <{level = 10 : i32, message = "bqd,bkd->bqk"}> : () -> ()
    %cst_121 = arith.constant dense<0.000000e+00> : vector<2x8x8xf32>
    %163 = tpu.matmul %160, %161, %cst_121 {dimension_numbers = #tpu.dot_dimension_numbers<[2], [2], [1], [1], [0, 0, 0, 1, 1, 1], [0], [0]>} : vector<2x8x8xf32>, vector<2x8x8xf32>, vector<2x8x8xf32> -> vector<2x8x8xf32>
    "tpu.trace_stop"() : () -> ()
    %164 = vector.broadcast %53 : vector<2x1x8xf32> to vector<2x8x8xf32>
    %165 = arith.addf %163, %164 : vector<2x8x8xf32>
    %cst_122 = arith.constant dense<0xFF800000> : vector<2x8xf32>
    %166 = vector.multi_reduction <maximumf>, %165, %cst_122 [2] : vector<2x8x8xf32> to vector<2x8xf32>
    %167 = vector.shape_cast %166 : vector<2x8xf32> to vector<2x8x1xf32>
    %168 = vector.broadcast %167 : vector<2x8x1xf32> to vector<2x8x8xf32>
    %169 = arith.subf %165, %168 : vector<2x8x8xf32>
    %170 = math.exp %169 : vector<2x8x8xf32>
    %cst_123 = arith.constant dense<0.000000e+00> : vector<2x8xf32>
    %171 = vector.multi_reduction <add>, %170, %cst_123 [2] : vector<2x8x8xf32> to vector<2x8xf32>
    %172 = vector.shape_cast %171 : vector<2x8xf32> to vector<2x8x1xf32>
    %173 = tpu.reciprocal %172 {approx = true} : vector<2x8x1xf32> -> vector<2x8x1xf32>
    %174 = vector.broadcast %173 : vector<2x8x1xf32> to vector<2x8x8xf32>
    %175 = arith.mulf %170, %174 : vector<2x8x8xf32>
    "tpu.trace_start"() <{level = 10 : i32, message = "bqk,bkd->bqd"}> : () -> ()
    %cst_124 = arith.constant dense<0.000000e+00> : vector<2x8x8xf32>
    %176 = tpu.matmul %175, %162, %cst_124 {dimension_numbers = #tpu.dot_dimension_numbers<[2], [1], [1], [2], [0, 0, 0, 1, 1, 2], [0], [0]>} : vector<2x8x8xf32>, vector<2x8x8xf32>, vector<2x8x8xf32> -> vector<2x8x8xf32>
    "tpu.trace_stop"() : () -> ()
    %177 = vector.shape_cast %176 : vector<2x8x8xf32> to vector<16x8xf32>
    %c0_125 = arith.constant 0 : index
    %c2_126 = arith.constant 2 : index
    %c0_127 = arith.constant 0 : index
    %c0_128 = arith.constant 0 : index
    %178 = vector.load %arg14[%c0_125, %c2_126, %c0_127, %c0_128] : memref<2x4x8x32xf32, #tpu.memory_space<vmem>>, vector<1x1x8x32xf32>
    %179 = vector.shape_cast %178 : vector<1x1x8x32xf32> to vector<8x32xf32>
    %cst_129 = arith.constant dense<0.000000e+00> : vector<16x32xf32>
    %180 = tpu.matmul %177, %179, %cst_129 {dimension_numbers = #tpu.dot_dimension_numbers<[1], [0], [0], [1], [0, 0, 1, 1], [], []>} : vector<16x8xf32>, vector<8x32xf32>, vector<16x32xf32> -> vector<16x32xf32>
    %181 = arith.addf %138, %180 : vector<16x32xf32>
    %c0_130 = arith.constant 0 : index
    %c3 = arith.constant 3 : index
    %c0_131 = arith.constant 0 : index
    %c0_132 = arith.constant 0 : index
    %182 = vector.load %arg8[%c0_130, %c3, %c0_131, %c0_132] : memref<2x4x32x8xf32, #tpu.memory_space<vmem>>, vector<1x1x32x8xf32>
    %183 = vector.shape_cast %182 : vector<1x1x32x8xf32> to vector<32x8xf32>
    %cst_133 = arith.constant dense<0.000000e+00> : vector<16x8xf32>
    %184 = tpu.matmul %47, %183, %cst_133 {dimension_numbers = #tpu.dot_dimension_numbers<[1], [0], [0], [1], [0, 0, 1, 1], [], []>} : vector<16x32xf32>, vector<32x8xf32>, vector<16x8xf32> -> vector<16x8xf32>
    %c0_134 = arith.constant 0 : index
    %c3_135 = arith.constant 3 : index
    %c0_136 = arith.constant 0 : index
    %c0_137 = arith.constant 0 : index
    %185 = vector.load %arg9[%c0_134, %c3_135, %c0_136, %c0_137] : memref<2x4x1x8xf32, #tpu.memory_space<vmem>>, vector<1x1x1x8xf32>
    %186 = vector.shape_cast %185 : vector<1x1x1x8xf32> to vector<1x8xf32>
    %187 = vector.broadcast %186 : vector<1x8xf32> to vector<16x8xf32>
    %188 = arith.addf %184, %187 : vector<16x8xf32>
    %c0_138 = arith.constant 0 : index
    %c3_139 = arith.constant 3 : index
    %c0_140 = arith.constant 0 : index
    %c0_141 = arith.constant 0 : index
    %189 = vector.load %arg10[%c0_138, %c3_139, %c0_140, %c0_141] : memref<2x4x32x8xf32, #tpu.memory_space<vmem>>, vector<1x1x32x8xf32>
    %190 = vector.shape_cast %189 : vector<1x1x32x8xf32> to vector<32x8xf32>
    %cst_142 = arith.constant dense<0.000000e+00> : vector<16x8xf32>
    %191 = tpu.matmul %47, %190, %cst_142 {dimension_numbers = #tpu.dot_dimension_numbers<[1], [0], [0], [1], [0, 0, 1, 1], [], []>} : vector<16x32xf32>, vector<32x8xf32>, vector<16x8xf32> -> vector<16x8xf32>
    %c0_143 = arith.constant 0 : index
    %c3_144 = arith.constant 3 : index
    %c0_145 = arith.constant 0 : index
    %c0_146 = arith.constant 0 : index
    %192 = vector.load %arg11[%c0_143, %c3_144, %c0_145, %c0_146] : memref<2x4x1x8xf32, #tpu.memory_space<vmem>>, vector<1x1x1x8xf32>
    %193 = vector.shape_cast %192 : vector<1x1x1x8xf32> to vector<1x8xf32>
    %194 = vector.broadcast %193 : vector<1x8xf32> to vector<16x8xf32>
    %195 = arith.addf %191, %194 : vector<16x8xf32>
    %c0_147 = arith.constant 0 : index
    %c3_148 = arith.constant 3 : index
    %c0_149 = arith.constant 0 : index
    %c0_150 = arith.constant 0 : index
    %196 = vector.load %arg12[%c0_147, %c3_148, %c0_149, %c0_150] : memref<2x4x32x8xf32, #tpu.memory_space<vmem>>, vector<1x1x32x8xf32>
    %197 = vector.shape_cast %196 : vector<1x1x32x8xf32> to vector<32x8xf32>
    %cst_151 = arith.constant dense<0.000000e+00> : vector<16x8xf32>
    %198 = tpu.matmul %47, %197, %cst_151 {dimension_numbers = #tpu.dot_dimension_numbers<[1], [0], [0], [1], [0, 0, 1, 1], [], []>} : vector<16x32xf32>, vector<32x8xf32>, vector<16x8xf32> -> vector<16x8xf32>
    %c0_152 = arith.constant 0 : index
    %c3_153 = arith.constant 3 : index
    %c0_154 = arith.constant 0 : index
    %c0_155 = arith.constant 0 : index
    %199 = vector.load %arg13[%c0_152, %c3_153, %c0_154, %c0_155] : memref<2x4x1x8xf32, #tpu.memory_space<vmem>>, vector<1x1x1x8xf32>
    %200 = vector.shape_cast %199 : vector<1x1x1x8xf32> to vector<1x8xf32>
    %201 = vector.broadcast %200 : vector<1x8xf32> to vector<16x8xf32>
    %202 = arith.addf %198, %201 : vector<16x8xf32>
    %203 = vector.shape_cast %188 : vector<16x8xf32> to vector<2x8x8xf32>
    %204 = vector.shape_cast %195 : vector<16x8xf32> to vector<2x8x8xf32>
    %205 = vector.shape_cast %202 : vector<16x8xf32> to vector<2x8x8xf32>
    "tpu.trace_start"() <{level = 10 : i32, message = "bqd,bkd->bqk"}> : () -> ()
    %cst_156 = arith.constant dense<0.000000e+00> : vector<2x8x8xf32>
    %206 = tpu.matmul %203, %204, %cst_156 {dimension_numbers = #tpu.dot_dimension_numbers<[2], [2], [1], [1], [0, 0, 0, 1, 1, 1], [0], [0]>} : vector<2x8x8xf32>, vector<2x8x8xf32>, vector<2x8x8xf32> -> vector<2x8x8xf32>
    "tpu.trace_stop"() : () -> ()
    %207 = vector.broadcast %53 : vector<2x1x8xf32> to vector<2x8x8xf32>
    %208 = arith.addf %206, %207 : vector<2x8x8xf32>
    %cst_157 = arith.constant dense<0xFF800000> : vector<2x8xf32>
    %209 = vector.multi_reduction <maximumf>, %208, %cst_157 [2] : vector<2x8x8xf32> to vector<2x8xf32>
    %210 = vector.shape_cast %209 : vector<2x8xf32> to vector<2x8x1xf32>
    %211 = vector.broadcast %210 : vector<2x8x1xf32> to vector<2x8x8xf32>
    %212 = arith.subf %208, %211 : vector<2x8x8xf32>
    %213 = math.exp %212 : vector<2x8x8xf32>
    %cst_158 = arith.constant dense<0.000000e+00> : vector<2x8xf32>
    %214 = vector.multi_reduction <add>, %213, %cst_158 [2] : vector<2x8x8xf32> to vector<2x8xf32>
    %215 = vector.shape_cast %214 : vector<2x8xf32> to vector<2x8x1xf32>
    %216 = tpu.reciprocal %215 {approx = true} : vector<2x8x1xf32> -> vector<2x8x1xf32>
    %217 = vector.broadcast %216 : vector<2x8x1xf32> to vector<2x8x8xf32>
    %218 = arith.mulf %213, %217 : vector<2x8x8xf32>
    "tpu.trace_start"() <{level = 10 : i32, message = "bqk,bkd->bqd"}> : () -> ()
    %cst_159 = arith.constant dense<0.000000e+00> : vector<2x8x8xf32>
    %219 = tpu.matmul %218, %205, %cst_159 {dimension_numbers = #tpu.dot_dimension_numbers<[2], [1], [1], [2], [0, 0, 0, 1, 1, 2], [0], [0]>} : vector<2x8x8xf32>, vector<2x8x8xf32>, vector<2x8x8xf32> -> vector<2x8x8xf32>
    "tpu.trace_stop"() : () -> ()
    %220 = vector.shape_cast %219 : vector<2x8x8xf32> to vector<16x8xf32>
    %c0_160 = arith.constant 0 : index
    %c3_161 = arith.constant 3 : index
    %c0_162 = arith.constant 0 : index
    %c0_163 = arith.constant 0 : index
    %221 = vector.load %arg14[%c0_160, %c3_161, %c0_162, %c0_163] : memref<2x4x8x32xf32, #tpu.memory_space<vmem>>, vector<1x1x8x32xf32>
    %222 = vector.shape_cast %221 : vector<1x1x8x32xf32> to vector<8x32xf32>
    %cst_164 = arith.constant dense<0.000000e+00> : vector<16x32xf32>
    %223 = tpu.matmul %220, %222, %cst_164 {dimension_numbers = #tpu.dot_dimension_numbers<[1], [0], [0], [1], [0, 0, 1, 1], [], []>} : vector<16x8xf32>, vector<8x32xf32>, vector<16x32xf32> -> vector<16x32xf32>
    %224 = arith.addf %181, %223 : vector<16x32xf32>
    %c0_165 = arith.constant 0 : index
    %c0_166 = arith.constant 0 : index
    %c0_167 = arith.constant 0 : index
    %225 = vector.load %arg15[%c0_165, %c0_166, %c0_167] : memref<2x1x32xf32, #tpu.memory_space<vmem>>, vector<1x1x32xf32>
    %226 = vector.shape_cast %225 : vector<1x1x32xf32> to vector<1x32xf32>
    %227 = vector.broadcast %226 : vector<1x32xf32> to vector<16x32xf32>
    %228 = arith.addf %224, %227 : vector<16x32xf32>
    %229 = arith.addf %47, %228 : vector<16x32xf32>
    %c0_168 = arith.constant 0 : index
    %c0_169 = arith.constant 0 : index
    %c0_170 = arith.constant 0 : index
    %230 = vector.load %arg16[%c0_168, %c0_169, %c0_170] : memref<2x1x32xf32, #tpu.memory_space<vmem>>, vector<1x1x32xf32>
    %231 = vector.shape_cast %230 : vector<1x1x32xf32> to vector<1x32xf32>
    %c0_171 = arith.constant 0 : index
    %c0_172 = arith.constant 0 : index
    %c0_173 = arith.constant 0 : index
    %232 = vector.load %arg17[%c0_171, %c0_172, %c0_173] : memref<2x1x32xf32, #tpu.memory_space<vmem>>, vector<1x1x32xf32>
    %233 = vector.shape_cast %232 : vector<1x1x32xf32> to vector<1x32xf32>
    %cst_174 = arith.constant dense<0.000000e+00> : vector<16xf32>
    %234 = vector.multi_reduction <add>, %229, %cst_174 [1] : vector<16x32xf32> to vector<16xf32>
    %235 = vector.shape_cast %234 : vector<16xf32> to vector<16x1xf32>
    %cst_175 = arith.constant 3.200000e+01 : f32
    %236 = vector.broadcast %cst_175 : f32 to vector<16x1xf32>
    %237 = arith.divf %235, %236 : vector<16x1xf32>
    %238 = vector.broadcast %237 : vector<16x1xf32> to vector<16x32xf32>
    %239 = arith.subf %229, %238 : vector<16x32xf32>
    %240 = arith.mulf %239, %239 : vector<16x32xf32>
    %cst_176 = arith.constant dense<0.000000e+00> : vector<16xf32>
    %241 = vector.multi_reduction <add>, %240, %cst_176 [1] : vector<16x32xf32> to vector<16xf32>
    %242 = vector.shape_cast %241 : vector<16xf32> to vector<16x1xf32>
    %cst_177 = arith.constant 3.200000e+01 : f32
    %243 = vector.broadcast %cst_177 : f32 to vector<16x1xf32>
    %244 = arith.divf %242, %243 : vector<16x1xf32>
    %cst_178 = arith.constant 9.99999996E-13 : f32
    %245 = vector.broadcast %cst_178 : f32 to vector<16x1xf32>
    %246 = arith.addf %244, %245 : vector<16x1xf32>
    %247 = math.rsqrt %246 : vector<16x1xf32>
    %248 = vector.broadcast %247 : vector<16x1xf32> to vector<16x32xf32>
    %249 = arith.mulf %239, %248 : vector<16x32xf32>
    %250 = vector.broadcast %231 : vector<1x32xf32> to vector<16x32xf32>
    %251 = arith.mulf %249, %250 : vector<16x32xf32>
    %252 = vector.broadcast %233 : vector<1x32xf32> to vector<16x32xf32>
    %253 = arith.addf %251, %252 : vector<16x32xf32>
    %c0_179 = arith.constant 0 : index
    %c0_180 = arith.constant 0 : index
    %c0_181 = arith.constant 0 : index
    %254 = vector.load %arg18[%c0_179, %c0_180, %c0_181] : memref<2x32x64xf32, #tpu.memory_space<vmem>>, vector<1x32x64xf32>
    %255 = vector.shape_cast %254 : vector<1x32x64xf32> to vector<32x64xf32>
    %cst_182 = arith.constant dense<0.000000e+00> : vector<16x64xf32>
    %256 = tpu.matmul %253, %255, %cst_182 {dimension_numbers = #tpu.dot_dimension_numbers<[1], [0], [0], [1], [0, 0, 1, 1], [], []>} : vector<16x32xf32>, vector<32x64xf32>, vector<16x64xf32> -> vector<16x64xf32>
    %c0_183 = arith.constant 0 : index
    %c0_184 = arith.constant 0 : index
    %c0_185 = arith.constant 0 : index
    %257 = vector.load %arg19[%c0_183, %c0_184, %c0_185] : memref<2x1x64xf32, #tpu.memory_space<vmem>>, vector<1x1x64xf32>
    %258 = vector.shape_cast %257 : vector<1x1x64xf32> to vector<1x64xf32>
    %259 = vector.broadcast %258 : vector<1x64xf32> to vector<16x64xf32>
    %260 = arith.addf %256, %259 : vector<16x64xf32>
    %cst_186 = arith.constant 5.000000e-01 : f32
    %261 = vector.broadcast %cst_186 : f32 to vector<16x64xf32>
    %262 = arith.mulf %261, %260 : vector<16x64xf32>
    %cst_187 = arith.constant 0.707106769 : f32
    %263 = vector.broadcast %cst_187 : f32 to vector<16x64xf32>
    %264 = arith.mulf %260, %263 : vector<16x64xf32>
    %cst_188 = arith.constant 0.000000e+00 : f32
    %265 = vector.broadcast %cst_188 : f32 to vector<16x64xf32>
    %266 = arith.cmpf oge, %264, %265 : vector<16x64xf32>
    %cst_189 = arith.constant 1.000000e+00 : f32
    %cst_190 = arith.constant -1.000000e+00 : f32
    %267 = vector.broadcast %cst_189 : f32 to vector<16x64xf32>
    %268 = vector.broadcast %cst_190 : f32 to vector<16x64xf32>
    %269 = arith.select %266, %267, %268 : vector<16x64xi1>, vector<16x64xf32>
    %270 = math.absf %264 : vector<16x64xf32>
    %cst_191 = arith.constant 0.327591091 : f32
    %271 = vector.broadcast %cst_191 : f32 to vector<16x64xf32>
    %272 = arith.mulf %271, %270 : vector<16x64xf32>
    %cst_192 = arith.constant 1.000000e+00 : f32
    %273 = vector.broadcast %cst_192 : f32 to vector<16x64xf32>
    %274 = arith.addf %273, %272 : vector<16x64xf32>
    %cst_193 = arith.constant 1.000000e+00 : f32
    %275 = vector.broadcast %cst_193 : f32 to vector<16x64xf32>
    %276 = arith.divf %275, %274 : vector<16x64xf32>
    %cst_194 = arith.constant 1.06140542 : f32
    %277 = vector.broadcast %cst_194 : f32 to vector<16x64xf32>
    %278 = arith.mulf %277, %276 : vector<16x64xf32>
    %cst_195 = arith.constant -1.45315206 : f32
    %279 = vector.broadcast %cst_195 : f32 to vector<16x64xf32>
    %280 = arith.addf %278, %279 : vector<16x64xf32>
    %281 = arith.mulf %280, %276 : vector<16x64xf32>
    %cst_196 = arith.constant 1.42141378 : f32
    %282 = vector.broadcast %cst_196 : f32 to vector<16x64xf32>
    %283 = arith.addf %281, %282 : vector<16x64xf32>
    %284 = arith.mulf %283, %276 : vector<16x64xf32>
    %cst_197 = arith.constant -0.284496725 : f32
    %285 = vector.broadcast %cst_197 : f32 to vector<16x64xf32>
    %286 = arith.addf %284, %285 : vector<16x64xf32>
    %287 = arith.mulf %286, %276 : vector<16x64xf32>
    %cst_198 = arith.constant 0.254829586 : f32
    %288 = vector.broadcast %cst_198 : f32 to vector<16x64xf32>
    %289 = arith.addf %287, %288 : vector<16x64xf32>
    %290 = arith.mulf %289, %276 : vector<16x64xf32>
    %cst_199 = arith.constant 0.000000e+00 : f32
    %291 = vector.broadcast %cst_199 : f32 to vector<16x64xf32>
    %292 = arith.subf %291, %270 : vector<16x64xf32>
    %293 = arith.mulf %292, %270 : vector<16x64xf32>
    %294 = math.exp %293 : vector<16x64xf32>
    %295 = arith.mulf %290, %294 : vector<16x64xf32>
    %cst_200 = arith.constant 1.000000e+00 : f32
    %296 = vector.broadcast %cst_200 : f32 to vector<16x64xf32>
    %297 = arith.subf %296, %295 : vector<16x64xf32>
    %298 = arith.mulf %269, %297 : vector<16x64xf32>
    %cst_201 = arith.constant 1.000000e+00 : f32
    %299 = vector.broadcast %cst_201 : f32 to vector<16x64xf32>
    %300 = arith.addf %299, %298 : vector<16x64xf32>
    %301 = arith.mulf %262, %300 : vector<16x64xf32>
    %c0_202 = arith.constant 0 : index
    %c0_203 = arith.constant 0 : index
    %c0_204 = arith.constant 0 : index
    %302 = vector.load %arg20[%c0_202, %c0_203, %c0_204] : memref<2x64x32xf32, #tpu.memory_space<vmem>>, vector<1x64x32xf32>
    %303 = vector.shape_cast %302 : vector<1x64x32xf32> to vector<64x32xf32>
    %cst_205 = arith.constant dense<0.000000e+00> : vector<16x32xf32>
    %304 = tpu.matmul %301, %303, %cst_205 {dimension_numbers = #tpu.dot_dimension_numbers<[1], [0], [0], [1], [0, 0, 1, 1], [], []>} : vector<16x64xf32>, vector<64x32xf32>, vector<16x32xf32> -> vector<16x32xf32>
    %c0_206 = arith.constant 0 : index
    %c0_207 = arith.constant 0 : index
    %c0_208 = arith.constant 0 : index
    %305 = vector.load %arg21[%c0_206, %c0_207, %c0_208] : memref<2x1x32xf32, #tpu.memory_space<vmem>>, vector<1x1x32xf32>
    %306 = vector.shape_cast %305 : vector<1x1x32xf32> to vector<1x32xf32>
    %307 = vector.broadcast %306 : vector<1x32xf32> to vector<16x32xf32>
    %308 = arith.addf %304, %307 : vector<16x32xf32>
    %309 = arith.addf %253, %308 : vector<16x32xf32>
    %c0_209 = arith.constant 0 : index
    %c0_210 = arith.constant 0 : index
    %c0_211 = arith.constant 0 : index
    %310 = vector.load %arg22[%c0_209, %c0_210, %c0_211] : memref<2x1x32xf32, #tpu.memory_space<vmem>>, vector<1x1x32xf32>
    %311 = vector.shape_cast %310 : vector<1x1x32xf32> to vector<1x32xf32>
    %c0_212 = arith.constant 0 : index
    %c0_213 = arith.constant 0 : index
    %c0_214 = arith.constant 0 : index
    %312 = vector.load %arg23[%c0_212, %c0_213, %c0_214] : memref<2x1x32xf32, #tpu.memory_space<vmem>>, vector<1x1x32xf32>
    %313 = vector.shape_cast %312 : vector<1x1x32xf32> to vector<1x32xf32>
    %cst_215 = arith.constant dense<0.000000e+00> : vector<16xf32>
    %314 = vector.multi_reduction <add>, %309, %cst_215 [1] : vector<16x32xf32> to vector<16xf32>
    %315 = vector.shape_cast %314 : vector<16xf32> to vector<16x1xf32>
    %cst_216 = arith.constant 3.200000e+01 : f32
    %316 = vector.broadcast %cst_216 : f32 to vector<16x1xf32>
    %317 = arith.divf %315, %316 : vector<16x1xf32>
    %318 = vector.broadcast %317 : vector<16x1xf32> to vector<16x32xf32>
    %319 = arith.subf %309, %318 : vector<16x32xf32>
    %320 = arith.mulf %319, %319 : vector<16x32xf32>
    %cst_217 = arith.constant dense<0.000000e+00> : vector<16xf32>
    %321 = vector.multi_reduction <add>, %320, %cst_217 [1] : vector<16x32xf32> to vector<16xf32>
    %322 = vector.shape_cast %321 : vector<16xf32> to vector<16x1xf32>
    %cst_218 = arith.constant 3.200000e+01 : f32
    %323 = vector.broadcast %cst_218 : f32 to vector<16x1xf32>
    %324 = arith.divf %322, %323 : vector<16x1xf32>
    %cst_219 = arith.constant 9.99999996E-13 : f32
    %325 = vector.broadcast %cst_219 : f32 to vector<16x1xf32>
    %326 = arith.addf %324, %325 : vector<16x1xf32>
    %327 = math.rsqrt %326 : vector<16x1xf32>
    %328 = vector.broadcast %327 : vector<16x1xf32> to vector<16x32xf32>
    %329 = arith.mulf %319, %328 : vector<16x32xf32>
    %330 = vector.broadcast %311 : vector<1x32xf32> to vector<16x32xf32>
    %331 = arith.mulf %329, %330 : vector<16x32xf32>
    %332 = vector.broadcast %313 : vector<1x32xf32> to vector<16x32xf32>
    %333 = arith.addf %331, %332 : vector<16x32xf32>
    %c1_220 = arith.constant 1 : index
    %c0_221 = arith.constant 0 : index
    %c0_222 = arith.constant 0 : index
    %c0_223 = arith.constant 0 : index
    %334 = vector.load %arg8[%c1_220, %c0_221, %c0_222, %c0_223] : memref<2x4x32x8xf32, #tpu.memory_space<vmem>>, vector<1x1x32x8xf32>
    %335 = vector.shape_cast %334 : vector<1x1x32x8xf32> to vector<32x8xf32>
    %cst_224 = arith.constant dense<0.000000e+00> : vector<16x8xf32>
    %336 = tpu.matmul %333, %335, %cst_224 {dimension_numbers = #tpu.dot_dimension_numbers<[1], [0], [0], [1], [0, 0, 1, 1], [], []>} : vector<16x32xf32>, vector<32x8xf32>, vector<16x8xf32> -> vector<16x8xf32>
    %c1_225 = arith.constant 1 : index
    %c0_226 = arith.constant 0 : index
    %c0_227 = arith.constant 0 : index
    %c0_228 = arith.constant 0 : index
    %337 = vector.load %arg9[%c1_225, %c0_226, %c0_227, %c0_228] : memref<2x4x1x8xf32, #tpu.memory_space<vmem>>, vector<1x1x1x8xf32>
    %338 = vector.shape_cast %337 : vector<1x1x1x8xf32> to vector<1x8xf32>
    %339 = vector.broadcast %338 : vector<1x8xf32> to vector<16x8xf32>
    %340 = arith.addf %336, %339 : vector<16x8xf32>
    %c1_229 = arith.constant 1 : index
    %c0_230 = arith.constant 0 : index
    %c0_231 = arith.constant 0 : index
    %c0_232 = arith.constant 0 : index
    %341 = vector.load %arg10[%c1_229, %c0_230, %c0_231, %c0_232] : memref<2x4x32x8xf32, #tpu.memory_space<vmem>>, vector<1x1x32x8xf32>
    %342 = vector.shape_cast %341 : vector<1x1x32x8xf32> to vector<32x8xf32>
    %cst_233 = arith.constant dense<0.000000e+00> : vector<16x8xf32>
    %343 = tpu.matmul %333, %342, %cst_233 {dimension_numbers = #tpu.dot_dimension_numbers<[1], [0], [0], [1], [0, 0, 1, 1], [], []>} : vector<16x32xf32>, vector<32x8xf32>, vector<16x8xf32> -> vector<16x8xf32>
    %c1_234 = arith.constant 1 : index
    %c0_235 = arith.constant 0 : index
    %c0_236 = arith.constant 0 : index
    %c0_237 = arith.constant 0 : index
    %344 = vector.load %arg11[%c1_234, %c0_235, %c0_236, %c0_237] : memref<2x4x1x8xf32, #tpu.memory_space<vmem>>, vector<1x1x1x8xf32>
    %345 = vector.shape_cast %344 : vector<1x1x1x8xf32> to vector<1x8xf32>
    %346 = vector.broadcast %345 : vector<1x8xf32> to vector<16x8xf32>
    %347 = arith.addf %343, %346 : vector<16x8xf32>
    %c1_238 = arith.constant 1 : index
    %c0_239 = arith.constant 0 : index
    %c0_240 = arith.constant 0 : index
    %c0_241 = arith.constant 0 : index
    %348 = vector.load %arg12[%c1_238, %c0_239, %c0_240, %c0_241] : memref<2x4x32x8xf32, #tpu.memory_space<vmem>>, vector<1x1x32x8xf32>
    %349 = vector.shape_cast %348 : vector<1x1x32x8xf32> to vector<32x8xf32>
    %cst_242 = arith.constant dense<0.000000e+00> : vector<16x8xf32>
    %350 = tpu.matmul %333, %349, %cst_242 {dimension_numbers = #tpu.dot_dimension_numbers<[1], [0], [0], [1], [0, 0, 1, 1], [], []>} : vector<16x32xf32>, vector<32x8xf32>, vector<16x8xf32> -> vector<16x8xf32>
    %c1_243 = arith.constant 1 : index
    %c0_244 = arith.constant 0 : index
    %c0_245 = arith.constant 0 : index
    %c0_246 = arith.constant 0 : index
    %351 = vector.load %arg13[%c1_243, %c0_244, %c0_245, %c0_246] : memref<2x4x1x8xf32, #tpu.memory_space<vmem>>, vector<1x1x1x8xf32>
    %352 = vector.shape_cast %351 : vector<1x1x1x8xf32> to vector<1x8xf32>
    %353 = vector.broadcast %352 : vector<1x8xf32> to vector<16x8xf32>
    %354 = arith.addf %350, %353 : vector<16x8xf32>
    %355 = vector.shape_cast %340 : vector<16x8xf32> to vector<2x8x8xf32>
    %356 = vector.shape_cast %347 : vector<16x8xf32> to vector<2x8x8xf32>
    %357 = vector.shape_cast %354 : vector<16x8xf32> to vector<2x8x8xf32>
    "tpu.trace_start"() <{level = 10 : i32, message = "bqd,bkd->bqk"}> : () -> ()
    %cst_247 = arith.constant dense<0.000000e+00> : vector<2x8x8xf32>
    %358 = tpu.matmul %355, %356, %cst_247 {dimension_numbers = #tpu.dot_dimension_numbers<[2], [2], [1], [1], [0, 0, 0, 1, 1, 1], [0], [0]>} : vector<2x8x8xf32>, vector<2x8x8xf32>, vector<2x8x8xf32> -> vector<2x8x8xf32>
    "tpu.trace_stop"() : () -> ()
    %359 = vector.broadcast %53 : vector<2x1x8xf32> to vector<2x8x8xf32>
    %360 = arith.addf %358, %359 : vector<2x8x8xf32>
    %cst_248 = arith.constant dense<0xFF800000> : vector<2x8xf32>
    %361 = vector.multi_reduction <maximumf>, %360, %cst_248 [2] : vector<2x8x8xf32> to vector<2x8xf32>
    %362 = vector.shape_cast %361 : vector<2x8xf32> to vector<2x8x1xf32>
    %363 = vector.broadcast %362 : vector<2x8x1xf32> to vector<2x8x8xf32>
    %364 = arith.subf %360, %363 : vector<2x8x8xf32>
    %365 = math.exp %364 : vector<2x8x8xf32>
    %cst_249 = arith.constant dense<0.000000e+00> : vector<2x8xf32>
    %366 = vector.multi_reduction <add>, %365, %cst_249 [2] : vector<2x8x8xf32> to vector<2x8xf32>
    %367 = vector.shape_cast %366 : vector<2x8xf32> to vector<2x8x1xf32>
    %368 = tpu.reciprocal %367 {approx = true} : vector<2x8x1xf32> -> vector<2x8x1xf32>
    %369 = vector.broadcast %368 : vector<2x8x1xf32> to vector<2x8x8xf32>
    %370 = arith.mulf %365, %369 : vector<2x8x8xf32>
    "tpu.trace_start"() <{level = 10 : i32, message = "bqk,bkd->bqd"}> : () -> ()
    %cst_250 = arith.constant dense<0.000000e+00> : vector<2x8x8xf32>
    %371 = tpu.matmul %370, %357, %cst_250 {dimension_numbers = #tpu.dot_dimension_numbers<[2], [1], [1], [2], [0, 0, 0, 1, 1, 2], [0], [0]>} : vector<2x8x8xf32>, vector<2x8x8xf32>, vector<2x8x8xf32> -> vector<2x8x8xf32>
    "tpu.trace_stop"() : () -> ()
    %372 = vector.shape_cast %371 : vector<2x8x8xf32> to vector<16x8xf32>
    %c1_251 = arith.constant 1 : index
    %c0_252 = arith.constant 0 : index
    %c0_253 = arith.constant 0 : index
    %c0_254 = arith.constant 0 : index
    %373 = vector.load %arg14[%c1_251, %c0_252, %c0_253, %c0_254] : memref<2x4x8x32xf32, #tpu.memory_space<vmem>>, vector<1x1x8x32xf32>
    %374 = vector.shape_cast %373 : vector<1x1x8x32xf32> to vector<8x32xf32>
    %cst_255 = arith.constant dense<0.000000e+00> : vector<16x32xf32>
    %375 = tpu.matmul %372, %374, %cst_255 {dimension_numbers = #tpu.dot_dimension_numbers<[1], [0], [0], [1], [0, 0, 1, 1], [], []>} : vector<16x8xf32>, vector<8x32xf32>, vector<16x32xf32> -> vector<16x32xf32>
    %c1_256 = arith.constant 1 : index
    %c1_257 = arith.constant 1 : index
    %c0_258 = arith.constant 0 : index
    %c0_259 = arith.constant 0 : index
    %376 = vector.load %arg8[%c1_256, %c1_257, %c0_258, %c0_259] : memref<2x4x32x8xf32, #tpu.memory_space<vmem>>, vector<1x1x32x8xf32>
    %377 = vector.shape_cast %376 : vector<1x1x32x8xf32> to vector<32x8xf32>
    %cst_260 = arith.constant dense<0.000000e+00> : vector<16x8xf32>
    %378 = tpu.matmul %333, %377, %cst_260 {dimension_numbers = #tpu.dot_dimension_numbers<[1], [0], [0], [1], [0, 0, 1, 1], [], []>} : vector<16x32xf32>, vector<32x8xf32>, vector<16x8xf32> -> vector<16x8xf32>
    %c1_261 = arith.constant 1 : index
    %c1_262 = arith.constant 1 : index
    %c0_263 = arith.constant 0 : index
    %c0_264 = arith.constant 0 : index
    %379 = vector.load %arg9[%c1_261, %c1_262, %c0_263, %c0_264] : memref<2x4x1x8xf32, #tpu.memory_space<vmem>>, vector<1x1x1x8xf32>
    %380 = vector.shape_cast %379 : vector<1x1x1x8xf32> to vector<1x8xf32>
    %381 = vector.broadcast %380 : vector<1x8xf32> to vector<16x8xf32>
    %382 = arith.addf %378, %381 : vector<16x8xf32>
    %c1_265 = arith.constant 1 : index
    %c1_266 = arith.constant 1 : index
    %c0_267 = arith.constant 0 : index
    %c0_268 = arith.constant 0 : index
    %383 = vector.load %arg10[%c1_265, %c1_266, %c0_267, %c0_268] : memref<2x4x32x8xf32, #tpu.memory_space<vmem>>, vector<1x1x32x8xf32>
    %384 = vector.shape_cast %383 : vector<1x1x32x8xf32> to vector<32x8xf32>
    %cst_269 = arith.constant dense<0.000000e+00> : vector<16x8xf32>
    %385 = tpu.matmul %333, %384, %cst_269 {dimension_numbers = #tpu.dot_dimension_numbers<[1], [0], [0], [1], [0, 0, 1, 1], [], []>} : vector<16x32xf32>, vector<32x8xf32>, vector<16x8xf32> -> vector<16x8xf32>
    %c1_270 = arith.constant 1 : index
    %c1_271 = arith.constant 1 : index
    %c0_272 = arith.constant 0 : index
    %c0_273 = arith.constant 0 : index
    %386 = vector.load %arg11[%c1_270, %c1_271, %c0_272, %c0_273] : memref<2x4x1x8xf32, #tpu.memory_space<vmem>>, vector<1x1x1x8xf32>
    %387 = vector.shape_cast %386 : vector<1x1x1x8xf32> to vector<1x8xf32>
    %388 = vector.broadcast %387 : vector<1x8xf32> to vector<16x8xf32>
    %389 = arith.addf %385, %388 : vector<16x8xf32>
    %c1_274 = arith.constant 1 : index
    %c1_275 = arith.constant 1 : index
    %c0_276 = arith.constant 0 : index
    %c0_277 = arith.constant 0 : index
    %390 = vector.load %arg12[%c1_274, %c1_275, %c0_276, %c0_277] : memref<2x4x32x8xf32, #tpu.memory_space<vmem>>, vector<1x1x32x8xf32>
    %391 = vector.shape_cast %390 : vector<1x1x32x8xf32> to vector<32x8xf32>
    %cst_278 = arith.constant dense<0.000000e+00> : vector<16x8xf32>
    %392 = tpu.matmul %333, %391, %cst_278 {dimension_numbers = #tpu.dot_dimension_numbers<[1], [0], [0], [1], [0, 0, 1, 1], [], []>} : vector<16x32xf32>, vector<32x8xf32>, vector<16x8xf32> -> vector<16x8xf32>
    %c1_279 = arith.constant 1 : index
    %c1_280 = arith.constant 1 : index
    %c0_281 = arith.constant 0 : index
    %c0_282 = arith.constant 0 : index
    %393 = vector.load %arg13[%c1_279, %c1_280, %c0_281, %c0_282] : memref<2x4x1x8xf32, #tpu.memory_space<vmem>>, vector<1x1x1x8xf32>
    %394 = vector.shape_cast %393 : vector<1x1x1x8xf32> to vector<1x8xf32>
    %395 = vector.broadcast %394 : vector<1x8xf32> to vector<16x8xf32>
    %396 = arith.addf %392, %395 : vector<16x8xf32>
    %397 = vector.shape_cast %382 : vector<16x8xf32> to vector<2x8x8xf32>
    %398 = vector.shape_cast %389 : vector<16x8xf32> to vector<2x8x8xf32>
    %399 = vector.shape_cast %396 : vector<16x8xf32> to vector<2x8x8xf32>
    "tpu.trace_start"() <{level = 10 : i32, message = "bqd,bkd->bqk"}> : () -> ()
    %cst_283 = arith.constant dense<0.000000e+00> : vector<2x8x8xf32>
    %400 = tpu.matmul %397, %398, %cst_283 {dimension_numbers = #tpu.dot_dimension_numbers<[2], [2], [1], [1], [0, 0, 0, 1, 1, 1], [0], [0]>} : vector<2x8x8xf32>, vector<2x8x8xf32>, vector<2x8x8xf32> -> vector<2x8x8xf32>
    "tpu.trace_stop"() : () -> ()
    %401 = vector.broadcast %53 : vector<2x1x8xf32> to vector<2x8x8xf32>
    %402 = arith.addf %400, %401 : vector<2x8x8xf32>
    %cst_284 = arith.constant dense<0xFF800000> : vector<2x8xf32>
    %403 = vector.multi_reduction <maximumf>, %402, %cst_284 [2] : vector<2x8x8xf32> to vector<2x8xf32>
    %404 = vector.shape_cast %403 : vector<2x8xf32> to vector<2x8x1xf32>
    %405 = vector.broadcast %404 : vector<2x8x1xf32> to vector<2x8x8xf32>
    %406 = arith.subf %402, %405 : vector<2x8x8xf32>
    %407 = math.exp %406 : vector<2x8x8xf32>
    %cst_285 = arith.constant dense<0.000000e+00> : vector<2x8xf32>
    %408 = vector.multi_reduction <add>, %407, %cst_285 [2] : vector<2x8x8xf32> to vector<2x8xf32>
    %409 = vector.shape_cast %408 : vector<2x8xf32> to vector<2x8x1xf32>
    %410 = tpu.reciprocal %409 {approx = true} : vector<2x8x1xf32> -> vector<2x8x1xf32>
    %411 = vector.broadcast %410 : vector<2x8x1xf32> to vector<2x8x8xf32>
    %412 = arith.mulf %407, %411 : vector<2x8x8xf32>
    "tpu.trace_start"() <{level = 10 : i32, message = "bqk,bkd->bqd"}> : () -> ()
    %cst_286 = arith.constant dense<0.000000e+00> : vector<2x8x8xf32>
    %413 = tpu.matmul %412, %399, %cst_286 {dimension_numbers = #tpu.dot_dimension_numbers<[2], [1], [1], [2], [0, 0, 0, 1, 1, 2], [0], [0]>} : vector<2x8x8xf32>, vector<2x8x8xf32>, vector<2x8x8xf32> -> vector<2x8x8xf32>
    "tpu.trace_stop"() : () -> ()
    %414 = vector.shape_cast %413 : vector<2x8x8xf32> to vector<16x8xf32>
    %c1_287 = arith.constant 1 : index
    %c1_288 = arith.constant 1 : index
    %c0_289 = arith.constant 0 : index
    %c0_290 = arith.constant 0 : index
    %415 = vector.load %arg14[%c1_287, %c1_288, %c0_289, %c0_290] : memref<2x4x8x32xf32, #tpu.memory_space<vmem>>, vector<1x1x8x32xf32>
    %416 = vector.shape_cast %415 : vector<1x1x8x32xf32> to vector<8x32xf32>
    %cst_291 = arith.constant dense<0.000000e+00> : vector<16x32xf32>
    %417 = tpu.matmul %414, %416, %cst_291 {dimension_numbers = #tpu.dot_dimension_numbers<[1], [0], [0], [1], [0, 0, 1, 1], [], []>} : vector<16x8xf32>, vector<8x32xf32>, vector<16x32xf32> -> vector<16x32xf32>
    %418 = arith.addf %375, %417 : vector<16x32xf32>
    %c1_292 = arith.constant 1 : index
    %c2_293 = arith.constant 2 : index
    %c0_294 = arith.constant 0 : index
    %c0_295 = arith.constant 0 : index
    %419 = vector.load %arg8[%c1_292, %c2_293, %c0_294, %c0_295] : memref<2x4x32x8xf32, #tpu.memory_space<vmem>>, vector<1x1x32x8xf32>
    %420 = vector.shape_cast %419 : vector<1x1x32x8xf32> to vector<32x8xf32>
    %cst_296 = arith.constant dense<0.000000e+00> : vector<16x8xf32>
    %421 = tpu.matmul %333, %420, %cst_296 {dimension_numbers = #tpu.dot_dimension_numbers<[1], [0], [0], [1], [0, 0, 1, 1], [], []>} : vector<16x32xf32>, vector<32x8xf32>, vector<16x8xf32> -> vector<16x8xf32>
    %c1_297 = arith.constant 1 : index
    %c2_298 = arith.constant 2 : index
    %c0_299 = arith.constant 0 : index
    %c0_300 = arith.constant 0 : index
    %422 = vector.load %arg9[%c1_297, %c2_298, %c0_299, %c0_300] : memref<2x4x1x8xf32, #tpu.memory_space<vmem>>, vector<1x1x1x8xf32>
    %423 = vector.shape_cast %422 : vector<1x1x1x8xf32> to vector<1x8xf32>
    %424 = vector.broadcast %423 : vector<1x8xf32> to vector<16x8xf32>
    %425 = arith.addf %421, %424 : vector<16x8xf32>
    %c1_301 = arith.constant 1 : index
    %c2_302 = arith.constant 2 : index
    %c0_303 = arith.constant 0 : index
    %c0_304 = arith.constant 0 : index
    %426 = vector.load %arg10[%c1_301, %c2_302, %c0_303, %c0_304] : memref<2x4x32x8xf32, #tpu.memory_space<vmem>>, vector<1x1x32x8xf32>
    %427 = vector.shape_cast %426 : vector<1x1x32x8xf32> to vector<32x8xf32>
    %cst_305 = arith.constant dense<0.000000e+00> : vector<16x8xf32>
    %428 = tpu.matmul %333, %427, %cst_305 {dimension_numbers = #tpu.dot_dimension_numbers<[1], [0], [0], [1], [0, 0, 1, 1], [], []>} : vector<16x32xf32>, vector<32x8xf32>, vector<16x8xf32> -> vector<16x8xf32>
    %c1_306 = arith.constant 1 : index
    %c2_307 = arith.constant 2 : index
    %c0_308 = arith.constant 0 : index
    %c0_309 = arith.constant 0 : index
    %429 = vector.load %arg11[%c1_306, %c2_307, %c0_308, %c0_309] : memref<2x4x1x8xf32, #tpu.memory_space<vmem>>, vector<1x1x1x8xf32>
    %430 = vector.shape_cast %429 : vector<1x1x1x8xf32> to vector<1x8xf32>
    %431 = vector.broadcast %430 : vector<1x8xf32> to vector<16x8xf32>
    %432 = arith.addf %428, %431 : vector<16x8xf32>
    %c1_310 = arith.constant 1 : index
    %c2_311 = arith.constant 2 : index
    %c0_312 = arith.constant 0 : index
    %c0_313 = arith.constant 0 : index
    %433 = vector.load %arg12[%c1_310, %c2_311, %c0_312, %c0_313] : memref<2x4x32x8xf32, #tpu.memory_space<vmem>>, vector<1x1x32x8xf32>
    %434 = vector.shape_cast %433 : vector<1x1x32x8xf32> to vector<32x8xf32>
    %cst_314 = arith.constant dense<0.000000e+00> : vector<16x8xf32>
    %435 = tpu.matmul %333, %434, %cst_314 {dimension_numbers = #tpu.dot_dimension_numbers<[1], [0], [0], [1], [0, 0, 1, 1], [], []>} : vector<16x32xf32>, vector<32x8xf32>, vector<16x8xf32> -> vector<16x8xf32>
    %c1_315 = arith.constant 1 : index
    %c2_316 = arith.constant 2 : index
    %c0_317 = arith.constant 0 : index
    %c0_318 = arith.constant 0 : index
    %436 = vector.load %arg13[%c1_315, %c2_316, %c0_317, %c0_318] : memref<2x4x1x8xf32, #tpu.memory_space<vmem>>, vector<1x1x1x8xf32>
    %437 = vector.shape_cast %436 : vector<1x1x1x8xf32> to vector<1x8xf32>
    %438 = vector.broadcast %437 : vector<1x8xf32> to vector<16x8xf32>
    %439 = arith.addf %435, %438 : vector<16x8xf32>
    %440 = vector.shape_cast %425 : vector<16x8xf32> to vector<2x8x8xf32>
    %441 = vector.shape_cast %432 : vector<16x8xf32> to vector<2x8x8xf32>
    %442 = vector.shape_cast %439 : vector<16x8xf32> to vector<2x8x8xf32>
    "tpu.trace_start"() <{level = 10 : i32, message = "bqd,bkd->bqk"}> : () -> ()
    %cst_319 = arith.constant dense<0.000000e+00> : vector<2x8x8xf32>
    %443 = tpu.matmul %440, %441, %cst_319 {dimension_numbers = #tpu.dot_dimension_numbers<[2], [2], [1], [1], [0, 0, 0, 1, 1, 1], [0], [0]>} : vector<2x8x8xf32>, vector<2x8x8xf32>, vector<2x8x8xf32> -> vector<2x8x8xf32>
    "tpu.trace_stop"() : () -> ()
    %444 = vector.broadcast %53 : vector<2x1x8xf32> to vector<2x8x8xf32>
    %445 = arith.addf %443, %444 : vector<2x8x8xf32>
    %cst_320 = arith.constant dense<0xFF800000> : vector<2x8xf32>
    %446 = vector.multi_reduction <maximumf>, %445, %cst_320 [2] : vector<2x8x8xf32> to vector<2x8xf32>
    %447 = vector.shape_cast %446 : vector<2x8xf32> to vector<2x8x1xf32>
    %448 = vector.broadcast %447 : vector<2x8x1xf32> to vector<2x8x8xf32>
    %449 = arith.subf %445, %448 : vector<2x8x8xf32>
    %450 = math.exp %449 : vector<2x8x8xf32>
    %cst_321 = arith.constant dense<0.000000e+00> : vector<2x8xf32>
    %451 = vector.multi_reduction <add>, %450, %cst_321 [2] : vector<2x8x8xf32> to vector<2x8xf32>
    %452 = vector.shape_cast %451 : vector<2x8xf32> to vector<2x8x1xf32>
    %453 = tpu.reciprocal %452 {approx = true} : vector<2x8x1xf32> -> vector<2x8x1xf32>
    %454 = vector.broadcast %453 : vector<2x8x1xf32> to vector<2x8x8xf32>
    %455 = arith.mulf %450, %454 : vector<2x8x8xf32>
    "tpu.trace_start"() <{level = 10 : i32, message = "bqk,bkd->bqd"}> : () -> ()
    %cst_322 = arith.constant dense<0.000000e+00> : vector<2x8x8xf32>
    %456 = tpu.matmul %455, %442, %cst_322 {dimension_numbers = #tpu.dot_dimension_numbers<[2], [1], [1], [2], [0, 0, 0, 1, 1, 2], [0], [0]>} : vector<2x8x8xf32>, vector<2x8x8xf32>, vector<2x8x8xf32> -> vector<2x8x8xf32>
    "tpu.trace_stop"() : () -> ()
    %457 = vector.shape_cast %456 : vector<2x8x8xf32> to vector<16x8xf32>
    %c1_323 = arith.constant 1 : index
    %c2_324 = arith.constant 2 : index
    %c0_325 = arith.constant 0 : index
    %c0_326 = arith.constant 0 : index
    %458 = vector.load %arg14[%c1_323, %c2_324, %c0_325, %c0_326] : memref<2x4x8x32xf32, #tpu.memory_space<vmem>>, vector<1x1x8x32xf32>
    %459 = vector.shape_cast %458 : vector<1x1x8x32xf32> to vector<8x32xf32>
    %cst_327 = arith.constant dense<0.000000e+00> : vector<16x32xf32>
    %460 = tpu.matmul %457, %459, %cst_327 {dimension_numbers = #tpu.dot_dimension_numbers<[1], [0], [0], [1], [0, 0, 1, 1], [], []>} : vector<16x8xf32>, vector<8x32xf32>, vector<16x32xf32> -> vector<16x32xf32>
    %461 = arith.addf %418, %460 : vector<16x32xf32>
    %c1_328 = arith.constant 1 : index
    %c3_329 = arith.constant 3 : index
    %c0_330 = arith.constant 0 : index
    %c0_331 = arith.constant 0 : index
    %462 = vector.load %arg8[%c1_328, %c3_329, %c0_330, %c0_331] : memref<2x4x32x8xf32, #tpu.memory_space<vmem>>, vector<1x1x32x8xf32>
    %463 = vector.shape_cast %462 : vector<1x1x32x8xf32> to vector<32x8xf32>
    %cst_332 = arith.constant dense<0.000000e+00> : vector<16x8xf32>
    %464 = tpu.matmul %333, %463, %cst_332 {dimension_numbers = #tpu.dot_dimension_numbers<[1], [0], [0], [1], [0, 0, 1, 1], [], []>} : vector<16x32xf32>, vector<32x8xf32>, vector<16x8xf32> -> vector<16x8xf32>
    %c1_333 = arith.constant 1 : index
    %c3_334 = arith.constant 3 : index
    %c0_335 = arith.constant 0 : index
    %c0_336 = arith.constant 0 : index
    %465 = vector.load %arg9[%c1_333, %c3_334, %c0_335, %c0_336] : memref<2x4x1x8xf32, #tpu.memory_space<vmem>>, vector<1x1x1x8xf32>
    %466 = vector.shape_cast %465 : vector<1x1x1x8xf32> to vector<1x8xf32>
    %467 = vector.broadcast %466 : vector<1x8xf32> to vector<16x8xf32>
    %468 = arith.addf %464, %467 : vector<16x8xf32>
    %c1_337 = arith.constant 1 : index
    %c3_338 = arith.constant 3 : index
    %c0_339 = arith.constant 0 : index
    %c0_340 = arith.constant 0 : index
    %469 = vector.load %arg10[%c1_337, %c3_338, %c0_339, %c0_340] : memref<2x4x32x8xf32, #tpu.memory_space<vmem>>, vector<1x1x32x8xf32>
    %470 = vector.shape_cast %469 : vector<1x1x32x8xf32> to vector<32x8xf32>
    %cst_341 = arith.constant dense<0.000000e+00> : vector<16x8xf32>
    %471 = tpu.matmul %333, %470, %cst_341 {dimension_numbers = #tpu.dot_dimension_numbers<[1], [0], [0], [1], [0, 0, 1, 1], [], []>} : vector<16x32xf32>, vector<32x8xf32>, vector<16x8xf32> -> vector<16x8xf32>
    %c1_342 = arith.constant 1 : index
    %c3_343 = arith.constant 3 : index
    %c0_344 = arith.constant 0 : index
    %c0_345 = arith.constant 0 : index
    %472 = vector.load %arg11[%c1_342, %c3_343, %c0_344, %c0_345] : memref<2x4x1x8xf32, #tpu.memory_space<vmem>>, vector<1x1x1x8xf32>
    %473 = vector.shape_cast %472 : vector<1x1x1x8xf32> to vector<1x8xf32>
    %474 = vector.broadcast %473 : vector<1x8xf32> to vector<16x8xf32>
    %475 = arith.addf %471, %474 : vector<16x8xf32>
    %c1_346 = arith.constant 1 : index
    %c3_347 = arith.constant 3 : index
    %c0_348 = arith.constant 0 : index
    %c0_349 = arith.constant 0 : index
    %476 = vector.load %arg12[%c1_346, %c3_347, %c0_348, %c0_349] : memref<2x4x32x8xf32, #tpu.memory_space<vmem>>, vector<1x1x32x8xf32>
    %477 = vector.shape_cast %476 : vector<1x1x32x8xf32> to vector<32x8xf32>
    %cst_350 = arith.constant dense<0.000000e+00> : vector<16x8xf32>
    %478 = tpu.matmul %333, %477, %cst_350 {dimension_numbers = #tpu.dot_dimension_numbers<[1], [0], [0], [1], [0, 0, 1, 1], [], []>} : vector<16x32xf32>, vector<32x8xf32>, vector<16x8xf32> -> vector<16x8xf32>
    %c1_351 = arith.constant 1 : index
    %c3_352 = arith.constant 3 : index
    %c0_353 = arith.constant 0 : index
    %c0_354 = arith.constant 0 : index
    %479 = vector.load %arg13[%c1_351, %c3_352, %c0_353, %c0_354] : memref<2x4x1x8xf32, #tpu.memory_space<vmem>>, vector<1x1x1x8xf32>
    %480 = vector.shape_cast %479 : vector<1x1x1x8xf32> to vector<1x8xf32>
    %481 = vector.broadcast %480 : vector<1x8xf32> to vector<16x8xf32>
    %482 = arith.addf %478, %481 : vector<16x8xf32>
    %483 = vector.shape_cast %468 : vector<16x8xf32> to vector<2x8x8xf32>
    %484 = vector.shape_cast %475 : vector<16x8xf32> to vector<2x8x8xf32>
    %485 = vector.shape_cast %482 : vector<16x8xf32> to vector<2x8x8xf32>
    "tpu.trace_start"() <{level = 10 : i32, message = "bqd,bkd->bqk"}> : () -> ()
    %cst_355 = arith.constant dense<0.000000e+00> : vector<2x8x8xf32>
    %486 = tpu.matmul %483, %484, %cst_355 {dimension_numbers = #tpu.dot_dimension_numbers<[2], [2], [1], [1], [0, 0, 0, 1, 1, 1], [0], [0]>} : vector<2x8x8xf32>, vector<2x8x8xf32>, vector<2x8x8xf32> -> vector<2x8x8xf32>
    "tpu.trace_stop"() : () -> ()
    %487 = vector.broadcast %53 : vector<2x1x8xf32> to vector<2x8x8xf32>
    %488 = arith.addf %486, %487 : vector<2x8x8xf32>
    %cst_356 = arith.constant dense<0xFF800000> : vector<2x8xf32>
    %489 = vector.multi_reduction <maximumf>, %488, %cst_356 [2] : vector<2x8x8xf32> to vector<2x8xf32>
    %490 = vector.shape_cast %489 : vector<2x8xf32> to vector<2x8x1xf32>
    %491 = vector.broadcast %490 : vector<2x8x1xf32> to vector<2x8x8xf32>
    %492 = arith.subf %488, %491 : vector<2x8x8xf32>
    %493 = math.exp %492 : vector<2x8x8xf32>
    %cst_357 = arith.constant dense<0.000000e+00> : vector<2x8xf32>
    %494 = vector.multi_reduction <add>, %493, %cst_357 [2] : vector<2x8x8xf32> to vector<2x8xf32>
    %495 = vector.shape_cast %494 : vector<2x8xf32> to vector<2x8x1xf32>
    %496 = tpu.reciprocal %495 {approx = true} : vector<2x8x1xf32> -> vector<2x8x1xf32>
    %497 = vector.broadcast %496 : vector<2x8x1xf32> to vector<2x8x8xf32>
    %498 = arith.mulf %493, %497 : vector<2x8x8xf32>
    "tpu.trace_start"() <{level = 10 : i32, message = "bqk,bkd->bqd"}> : () -> ()
    %cst_358 = arith.constant dense<0.000000e+00> : vector<2x8x8xf32>
    %499 = tpu.matmul %498, %485, %cst_358 {dimension_numbers = #tpu.dot_dimension_numbers<[2], [1], [1], [2], [0, 0, 0, 1, 1, 2], [0], [0]>} : vector<2x8x8xf32>, vector<2x8x8xf32>, vector<2x8x8xf32> -> vector<2x8x8xf32>
    "tpu.trace_stop"() : () -> ()
    %500 = vector.shape_cast %499 : vector<2x8x8xf32> to vector<16x8xf32>
    %c1_359 = arith.constant 1 : index
    %c3_360 = arith.constant 3 : index
    %c0_361 = arith.constant 0 : index
    %c0_362 = arith.constant 0 : index
    %501 = vector.load %arg14[%c1_359, %c3_360, %c0_361, %c0_362] : memref<2x4x8x32xf32, #tpu.memory_space<vmem>>, vector<1x1x8x32xf32>
    %502 = vector.shape_cast %501 : vector<1x1x8x32xf32> to vector<8x32xf32>
    %cst_363 = arith.constant dense<0.000000e+00> : vector<16x32xf32>
    %503 = tpu.matmul %500, %502, %cst_363 {dimension_numbers = #tpu.dot_dimension_numbers<[1], [0], [0], [1], [0, 0, 1, 1], [], []>} : vector<16x8xf32>, vector<8x32xf32>, vector<16x32xf32> -> vector<16x32xf32>
    %504 = arith.addf %461, %503 : vector<16x32xf32>
    %c1_364 = arith.constant 1 : index
    %c0_365 = arith.constant 0 : index
    %c0_366 = arith.constant 0 : index
    %505 = vector.load %arg15[%c1_364, %c0_365, %c0_366] : memref<2x1x32xf32, #tpu.memory_space<vmem>>, vector<1x1x32xf32>
    %506 = vector.shape_cast %505 : vector<1x1x32xf32> to vector<1x32xf32>
    %507 = vector.broadcast %506 : vector<1x32xf32> to vector<16x32xf32>
    %508 = arith.addf %504, %507 : vector<16x32xf32>
    %509 = arith.addf %333, %508 : vector<16x32xf32>
    %c1_367 = arith.constant 1 : index
    %c0_368 = arith.constant 0 : index
    %c0_369 = arith.constant 0 : index
    %510 = vector.load %arg16[%c1_367, %c0_368, %c0_369] : memref<2x1x32xf32, #tpu.memory_space<vmem>>, vector<1x1x32xf32>
    %511 = vector.shape_cast %510 : vector<1x1x32xf32> to vector<1x32xf32>
    %c1_370 = arith.constant 1 : index
    %c0_371 = arith.constant 0 : index
    %c0_372 = arith.constant 0 : index
    %512 = vector.load %arg17[%c1_370, %c0_371, %c0_372] : memref<2x1x32xf32, #tpu.memory_space<vmem>>, vector<1x1x32xf32>
    %513 = vector.shape_cast %512 : vector<1x1x32xf32> to vector<1x32xf32>
    %cst_373 = arith.constant dense<0.000000e+00> : vector<16xf32>
    %514 = vector.multi_reduction <add>, %509, %cst_373 [1] : vector<16x32xf32> to vector<16xf32>
    %515 = vector.shape_cast %514 : vector<16xf32> to vector<16x1xf32>
    %cst_374 = arith.constant 3.200000e+01 : f32
    %516 = vector.broadcast %cst_374 : f32 to vector<16x1xf32>
    %517 = arith.divf %515, %516 : vector<16x1xf32>
    %518 = vector.broadcast %517 : vector<16x1xf32> to vector<16x32xf32>
    %519 = arith.subf %509, %518 : vector<16x32xf32>
    %520 = arith.mulf %519, %519 : vector<16x32xf32>
    %cst_375 = arith.constant dense<0.000000e+00> : vector<16xf32>
    %521 = vector.multi_reduction <add>, %520, %cst_375 [1] : vector<16x32xf32> to vector<16xf32>
    %522 = vector.shape_cast %521 : vector<16xf32> to vector<16x1xf32>
    %cst_376 = arith.constant 3.200000e+01 : f32
    %523 = vector.broadcast %cst_376 : f32 to vector<16x1xf32>
    %524 = arith.divf %522, %523 : vector<16x1xf32>
    %cst_377 = arith.constant 9.99999996E-13 : f32
    %525 = vector.broadcast %cst_377 : f32 to vector<16x1xf32>
    %526 = arith.addf %524, %525 : vector<16x1xf32>
    %527 = math.rsqrt %526 : vector<16x1xf32>
    %528 = vector.broadcast %527 : vector<16x1xf32> to vector<16x32xf32>
    %529 = arith.mulf %519, %528 : vector<16x32xf32>
    %530 = vector.broadcast %511 : vector<1x32xf32> to vector<16x32xf32>
    %531 = arith.mulf %529, %530 : vector<16x32xf32>
    %532 = vector.broadcast %513 : vector<1x32xf32> to vector<16x32xf32>
    %533 = arith.addf %531, %532 : vector<16x32xf32>
    %c1_378 = arith.constant 1 : index
    %c0_379 = arith.constant 0 : index
    %c0_380 = arith.constant 0 : index
    %534 = vector.load %arg18[%c1_378, %c0_379, %c0_380] : memref<2x32x64xf32, #tpu.memory_space<vmem>>, vector<1x32x64xf32>
    %535 = vector.shape_cast %534 : vector<1x32x64xf32> to vector<32x64xf32>
    %cst_381 = arith.constant dense<0.000000e+00> : vector<16x64xf32>
    %536 = tpu.matmul %533, %535, %cst_381 {dimension_numbers = #tpu.dot_dimension_numbers<[1], [0], [0], [1], [0, 0, 1, 1], [], []>} : vector<16x32xf32>, vector<32x64xf32>, vector<16x64xf32> -> vector<16x64xf32>
    %c1_382 = arith.constant 1 : index
    %c0_383 = arith.constant 0 : index
    %c0_384 = arith.constant 0 : index
    %537 = vector.load %arg19[%c1_382, %c0_383, %c0_384] : memref<2x1x64xf32, #tpu.memory_space<vmem>>, vector<1x1x64xf32>
    %538 = vector.shape_cast %537 : vector<1x1x64xf32> to vector<1x64xf32>
    %539 = vector.broadcast %538 : vector<1x64xf32> to vector<16x64xf32>
    %540 = arith.addf %536, %539 : vector<16x64xf32>
    %cst_385 = arith.constant 5.000000e-01 : f32
    %541 = vector.broadcast %cst_385 : f32 to vector<16x64xf32>
    %542 = arith.mulf %541, %540 : vector<16x64xf32>
    %cst_386 = arith.constant 0.707106769 : f32
    %543 = vector.broadcast %cst_386 : f32 to vector<16x64xf32>
    %544 = arith.mulf %540, %543 : vector<16x64xf32>
    %cst_387 = arith.constant 0.000000e+00 : f32
    %545 = vector.broadcast %cst_387 : f32 to vector<16x64xf32>
    %546 = arith.cmpf oge, %544, %545 : vector<16x64xf32>
    %cst_388 = arith.constant 1.000000e+00 : f32
    %cst_389 = arith.constant -1.000000e+00 : f32
    %547 = vector.broadcast %cst_388 : f32 to vector<16x64xf32>
    %548 = vector.broadcast %cst_389 : f32 to vector<16x64xf32>
    %549 = arith.select %546, %547, %548 : vector<16x64xi1>, vector<16x64xf32>
    %550 = math.absf %544 : vector<16x64xf32>
    %cst_390 = arith.constant 0.327591091 : f32
    %551 = vector.broadcast %cst_390 : f32 to vector<16x64xf32>
    %552 = arith.mulf %551, %550 : vector<16x64xf32>
    %cst_391 = arith.constant 1.000000e+00 : f32
    %553 = vector.broadcast %cst_391 : f32 to vector<16x64xf32>
    %554 = arith.addf %553, %552 : vector<16x64xf32>
    %cst_392 = arith.constant 1.000000e+00 : f32
    %555 = vector.broadcast %cst_392 : f32 to vector<16x64xf32>
    %556 = arith.divf %555, %554 : vector<16x64xf32>
    %cst_393 = arith.constant 1.06140542 : f32
    %557 = vector.broadcast %cst_393 : f32 to vector<16x64xf32>
    %558 = arith.mulf %557, %556 : vector<16x64xf32>
    %cst_394 = arith.constant -1.45315206 : f32
    %559 = vector.broadcast %cst_394 : f32 to vector<16x64xf32>
    %560 = arith.addf %558, %559 : vector<16x64xf32>
    %561 = arith.mulf %560, %556 : vector<16x64xf32>
    %cst_395 = arith.constant 1.42141378 : f32
    %562 = vector.broadcast %cst_395 : f32 to vector<16x64xf32>
    %563 = arith.addf %561, %562 : vector<16x64xf32>
    %564 = arith.mulf %563, %556 : vector<16x64xf32>
    %cst_396 = arith.constant -0.284496725 : f32
    %565 = vector.broadcast %cst_396 : f32 to vector<16x64xf32>
    %566 = arith.addf %564, %565 : vector<16x64xf32>
    %567 = arith.mulf %566, %556 : vector<16x64xf32>
    %cst_397 = arith.constant 0.254829586 : f32
    %568 = vector.broadcast %cst_397 : f32 to vector<16x64xf32>
    %569 = arith.addf %567, %568 : vector<16x64xf32>
    %570 = arith.mulf %569, %556 : vector<16x64xf32>
    %cst_398 = arith.constant 0.000000e+00 : f32
    %571 = vector.broadcast %cst_398 : f32 to vector<16x64xf32>
    %572 = arith.subf %571, %550 : vector<16x64xf32>
    %573 = arith.mulf %572, %550 : vector<16x64xf32>
    %574 = math.exp %573 : vector<16x64xf32>
    %575 = arith.mulf %570, %574 : vector<16x64xf32>
    %cst_399 = arith.constant 1.000000e+00 : f32
    %576 = vector.broadcast %cst_399 : f32 to vector<16x64xf32>
    %577 = arith.subf %576, %575 : vector<16x64xf32>
    %578 = arith.mulf %549, %577 : vector<16x64xf32>
    %cst_400 = arith.constant 1.000000e+00 : f32
    %579 = vector.broadcast %cst_400 : f32 to vector<16x64xf32>
    %580 = arith.addf %579, %578 : vector<16x64xf32>
    %581 = arith.mulf %542, %580 : vector<16x64xf32>
    %c1_401 = arith.constant 1 : index
    %c0_402 = arith.constant 0 : index
    %c0_403 = arith.constant 0 : index
    %582 = vector.load %arg20[%c1_401, %c0_402, %c0_403] : memref<2x64x32xf32, #tpu.memory_space<vmem>>, vector<1x64x32xf32>
    %583 = vector.shape_cast %582 : vector<1x64x32xf32> to vector<64x32xf32>
    %cst_404 = arith.constant dense<0.000000e+00> : vector<16x32xf32>
    %584 = tpu.matmul %581, %583, %cst_404 {dimension_numbers = #tpu.dot_dimension_numbers<[1], [0], [0], [1], [0, 0, 1, 1], [], []>} : vector<16x64xf32>, vector<64x32xf32>, vector<16x32xf32> -> vector<16x32xf32>
    %c1_405 = arith.constant 1 : index
    %c0_406 = arith.constant 0 : index
    %c0_407 = arith.constant 0 : index
    %585 = vector.load %arg21[%c1_405, %c0_406, %c0_407] : memref<2x1x32xf32, #tpu.memory_space<vmem>>, vector<1x1x32xf32>
    %586 = vector.shape_cast %585 : vector<1x1x32xf32> to vector<1x32xf32>
    %587 = vector.broadcast %586 : vector<1x32xf32> to vector<16x32xf32>
    %588 = arith.addf %584, %587 : vector<16x32xf32>
    %589 = arith.addf %533, %588 : vector<16x32xf32>
    %c1_408 = arith.constant 1 : index
    %c0_409 = arith.constant 0 : index
    %c0_410 = arith.constant 0 : index
    %590 = vector.load %arg22[%c1_408, %c0_409, %c0_410] : memref<2x1x32xf32, #tpu.memory_space<vmem>>, vector<1x1x32xf32>
    %591 = vector.shape_cast %590 : vector<1x1x32xf32> to vector<1x32xf32>
    %c1_411 = arith.constant 1 : index
    %c0_412 = arith.constant 0 : index
    %c0_413 = arith.constant 0 : index
    %592 = vector.load %arg23[%c1_411, %c0_412, %c0_413] : memref<2x1x32xf32, #tpu.memory_space<vmem>>, vector<1x1x32xf32>
    %593 = vector.shape_cast %592 : vector<1x1x32xf32> to vector<1x32xf32>
    %cst_414 = arith.constant dense<0.000000e+00> : vector<16xf32>
    %594 = vector.multi_reduction <add>, %589, %cst_414 [1] : vector<16x32xf32> to vector<16xf32>
    %595 = vector.shape_cast %594 : vector<16xf32> to vector<16x1xf32>
    %cst_415 = arith.constant 3.200000e+01 : f32
    %596 = vector.broadcast %cst_415 : f32 to vector<16x1xf32>
    %597 = arith.divf %595, %596 : vector<16x1xf32>
    %598 = vector.broadcast %597 : vector<16x1xf32> to vector<16x32xf32>
    %599 = arith.subf %589, %598 : vector<16x32xf32>
    %600 = arith.mulf %599, %599 : vector<16x32xf32>
    %cst_416 = arith.constant dense<0.000000e+00> : vector<16xf32>
    %601 = vector.multi_reduction <add>, %600, %cst_416 [1] : vector<16x32xf32> to vector<16xf32>
    %602 = vector.shape_cast %601 : vector<16xf32> to vector<16x1xf32>
    %cst_417 = arith.constant 3.200000e+01 : f32
    %603 = vector.broadcast %cst_417 : f32 to vector<16x1xf32>
    %604 = arith.divf %602, %603 : vector<16x1xf32>
    %cst_418 = arith.constant 9.99999996E-13 : f32
    %605 = vector.broadcast %cst_418 : f32 to vector<16x1xf32>
    %606 = arith.addf %604, %605 : vector<16x1xf32>
    %607 = math.rsqrt %606 : vector<16x1xf32>
    %608 = vector.broadcast %607 : vector<16x1xf32> to vector<16x32xf32>
    %609 = arith.mulf %599, %608 : vector<16x32xf32>
    %610 = vector.broadcast %591 : vector<1x32xf32> to vector<16x32xf32>
    %611 = arith.mulf %609, %610 : vector<16x32xf32>
    %612 = vector.broadcast %593 : vector<1x32xf32> to vector<16x32xf32>
    %613 = arith.addf %611, %612 : vector<16x32xf32>
    %614 = vector.shape_cast %613 : vector<16x32xf32> to vector<2x8x32xf32>
    %615 = vector.extract_strided_slice %614 {offsets = [0, 0, 0], sizes = [2, 1, 32], strides = [1, 1, 1]} : vector<2x8x32xf32> to vector<2x1x32xf32>
    %616 = vector.shape_cast %615 : vector<2x1x32xf32> to vector<2x32xf32>
    %c0_419 = arith.constant 0 : index
    %c0_420 = arith.constant 0 : index
    %617 = vector.load %arg24[%c0_419, %c0_420] : memref<32x32xf32, #tpu.memory_space<vmem>>, vector<32x32xf32>
    %cst_421 = arith.constant dense<0.000000e+00> : vector<2x32xf32>
    %618 = tpu.matmul %616, %617, %cst_421 {dimension_numbers = #tpu.dot_dimension_numbers<[1], [0], [0], [1], [0, 0, 1, 1], [], []>} : vector<2x32xf32>, vector<32x32xf32>, vector<2x32xf32> -> vector<2x32xf32>
    %c0_422 = arith.constant 0 : index
    %c0_423 = arith.constant 0 : index
    %619 = vector.load %arg25[%c0_422, %c0_423] : memref<1x32xf32, #tpu.memory_space<vmem>>, vector<1x32xf32>
    %620 = vector.broadcast %619 : vector<1x32xf32> to vector<2x32xf32>
    %621 = arith.addf %618, %620 : vector<2x32xf32>
    %622 = math.tanh %621 : vector<2x32xf32>
    %c0_424 = arith.constant 0 : index
    %c0_425 = arith.constant 0 : index
    %623 = vector.load %arg26[%c0_424, %c0_425] : memref<32x4xf32, #tpu.memory_space<vmem>>, vector<32x4xf32>
    %cst_426 = arith.constant dense<0.000000e+00> : vector<2x4xf32>
    %624 = tpu.matmul %622, %623, %cst_426 {dimension_numbers = #tpu.dot_dimension_numbers<[1], [0], [0], [1], [0, 0, 1, 1], [], []>} : vector<2x32xf32>, vector<32x4xf32>, vector<2x4xf32> -> vector<2x4xf32>
    %c0_427 = arith.constant 0 : index
    %c0_428 = arith.constant 0 : index
    %625 = vector.load %arg27[%c0_427, %c0_428] : memref<1x4xf32, #tpu.memory_space<vmem>>, vector<1x4xf32>
    %626 = vector.broadcast %625 : vector<1x4xf32> to vector<2x4xf32>
    %627 = arith.addf %624, %626 : vector<2x4xf32>
    %c0_429 = arith.constant 0 : index
    %c0_430 = arith.constant 0 : index
    %628 = vector.load %arg28[%c0_429, %c0_430] : memref<2x4xf32, #tpu.memory_space<vmem>>, vector<2x4xf32>
    tpu.vector_store %arg28[%c0_429, %c0_430], %627 {strides = array<i32>} : memref<2x4xf32, #tpu.memory_space<vmem>>, vector<2x4xf32>,
    return
  }
}

</mosaic_0001>

<bundles_post_ra>
// kernel: coral_bert_forward.1
= control target key start
LH: loop header
LB: loop body
LE: loop exit
PB: predicated region body
PF: predicated region fallthrough
CT: control target
= control target key end

     0   :  { %s9301_s0 = inlined_call_operand.vmem [shape: s32[16,1], index: 0, kind: input, shape index: {}]   ;;  %s9302_s1 = inlined_call_operand.vmem [shape: s32[16,1], index: 1, kind: input, shape index: {}]   ;;  %s9303_s2 = inlined_call_operand.vmem [shape: f32[2,8], index: 2, kind: input, shape index: {}]   ;;  %s9304_s3 = inlined_call_operand.vmem [shape: f32[128,32], index: 3, kind: input, shape index: {}]   ;;  %s9305_s4 = inlined_call_operand.vmem [shape: f32[16,32], index: 4, kind: input, shape index: {}]   ;;  %s9306_s5 = inlined_call_operand.vmem [shape: f32[2,32], index: 5, kind: input, shape index: {}]   ;;  %s9307_s6 = inlined_call_operand.vmem [shape: f32[1,32], index: 6, kind: input, shape index: {}]   ;;  %s9308_s7 = inlined_call_operand.vmem [shape: f32[1,32], index: 7, kind: input, shape index: {}]   ;;  %s9309_s8 = inlined_call_operand.vmem [shape: f32[2,4,32,8], index: 8, kind: input, shape index: {}]   ;;  %s9310_s9 = inlined_call_operand.vmem [shape: f32[2,4,1,8], index: 9, kind: input, shape index: {}]   ;;  %s9311_s10 = inlined_call_operand.vmem [shape: f32[2,4,32,8], index: 10, kind: input, shape index: {}]   ;;  %s9312_s11 = inlined_call_operand.vmem [shape: f32[2,4,1,8], index: 11, kind: input, shape index: {}]   ;;  %s9313_s12 = inlined_call_operand.vmem [shape: f32[2,4,32,8], index: 12, kind: input, shape index: {}]   ;;  %s9314_s13 = inlined_call_operand.vmem [shape: f32[2,4,1,8], index: 13, kind: input, shape index: {}]   ;;  %s9315_s14 = inlined_call_operand.vmem [shape: f32[2,4,8,32], index: 14, kind: input, shape index: {}]   ;;  %s9316_s15 = inlined_call_operand.vmem [shape: f32[2,1,32], index: 15, kind: input, shape index: {}]   ;;  %s9317_s16 = inlined_call_operand.vmem [shape: f32[2,1,32], index: 16, kind: input, shape index: {}]   ;;  %s9318_s17 = inlined_call_operand.vmem [shape: f32[2,1,32], index: 17, kind: input, shape index: {}]   ;;  %s9319_s18 = inlined_call_operand.vmem [shape: f32[2,32,64], index: 18, kind: input, shape index: {}]   ;;  %s9320_s19 = inlined_call_operand.vmem [shape: f32[2,1,64], index: 19, kind: input, shape index: {}]   ;;  %s9321_s20 = inlined_call_operand.vmem [shape: f32[2,64,32], index: 20, kind: input, shape index: {}]   ;;  %s9322_s21 = inlined_call_operand.vmem [shape: f32[2,1,32], index: 21, kind: input, shape index: {}]   ;;  %s9323_s22 = inlined_call_operand.vmem [shape: f32[2,1,32], index: 22, kind: input, shape index: {}]   ;;  %s9324_s23 = inlined_call_operand.vmem [shape: f32[2,1,32], index: 23, kind: input, shape index: {}]   ;;  %s9325_s24 = inlined_call_operand.vmem [shape: f32[32,32], index: 24, kind: input, shape index: {}]   ;;  %s9326_s25 = inlined_call_operand.vmem [shape: f32[1,32], index: 25, kind: input, shape index: {}]   ;;  %s9327_s26 = inlined_call_operand.vmem [shape: f32[32,4], index: 26, kind: input, shape index: {}]   ;;  %s9328_s27 = inlined_call_operand.vmem [shape: f32[1,4], index: 27, kind: input, shape index: {}]   ;;  %s9329_s28 = inlined_call_operand.hbm [shape: f32[2,4], index: 28, kind: output, shape index: {}]  }
   0x1   :  { %9339 = sst [smem:[#allocation5_spill]] %s9301_s0 }
   0x2   :  { %9340 = sst [smem:[#allocation6_spill]] %s9302_s1 }
   0x3   :  { %9341 = sst [smem:[#allocation7_spill]] %s9303_s2 }
   0x4   :  { %9342 = sst [smem:[#allocation8_spill]] %s9304_s3 }
   0x5   :  { %9343 = sst [smem:[#allocation9_spill]] %s9305_s4 }
   0x6   :  { %9344 = sst [smem:[#allocation10_spill]] %s9306_s5 }
   0x7   :  { %9345 = sst [smem:[#allocation11_spill]] %s9307_s6 }
   0x8   :  { %9346 = sst [smem:[#allocation12_spill]] %s9308_s7 }
   0x9   :  { %9347 = sst [smem:[#allocation13_spill]] %s9309_s8 }
   0xa   :  { %9348 = sst [smem:[#allocation14_spill]] %s9310_s9 }
   0xb   :  { %9349 = sst [smem:[#allocation15_spill]] %s9311_s10 }
   0xc   :  { %9350 = sst [smem:[#allocation16_spill]] %s9312_s11 }
   0xd   :  { %9351 = sst [smem:[#allocation17_spill]] %s9313_s12 }
   0xe   :  { %9352 = sst [smem:[#allocation18_spill]] %s9324_s23 }
   0xf   :  { %s9353_s9 = sld [smem:[#allocation5_spill]]  ;;  %s9354_s23 = sld [smem:[#allocation8_spill]]  ;;  %v8142_v2 = vmov 0   ;;  %v92_v11 = vlaneseq  ;;  %v8143_v12 = vmov 1966171168  }
  0x10   :  { %8014 = vset.pattern.permute.xlu0 %v8142_v2  ;;  %8015 = vset.pattern.permute.xlu1 %v8142_v2  ;;  %v274_v13 = vunpack.c.l.s4 %v8143_v12  ;;  %s9355_s10 = sld [smem:[#allocation7_spill]] }
  0x11   :  { %v8322_v16 = vshrl.u32 %v92_v11, 7 }
  0x12   :  { %v275_v18 = vunpack.c.0.s8 %v274_v13 }
  0x15   :  { %v90_v0 = vld [vmem:[%s9353_s9] sm:$0xff]  ;;  %v105_v3 = vld [vmem:[%s9354_s23 + $0x8] sm:$0xff]  ;;  %v106_v4 = vld [vmem:[%s9354_s23 + $0x10] sm:$0xff] }
  0x16   :  { %v104_v1 = vld [vmem:[%s9354_s23] sm:$0xff]  ;;  %v107_v5 = vld [vmem:[%s9354_s23 + $0x18] sm:$0xff]  ;;  %95 = vperm.xlu0 %8014, %v90_v0   ;;  %v91_v8 = vld [vmem:[%s9353_s9 + $0x8] sm:$0xff] }
  0x17   :  { %v7710_v6 = vpack.c.bf16 %v105_v3, %v104_v1  ;;  %v7714_v7 = vpack.c.bf16 %v107_v5, %v106_v4  ;;  %v108_v9 = vld [vmem:[%s9354_s23 + $0x20] sm:$0xff]  ;;  %v109_v10 = vld [vmem:[%s9354_s23 + $0x28] sm:$0xff]  ;;  %v110_v15 = vld [vmem:[%s9354_s23 + $0x30] sm:$0xff] }
  0x18   :  { %v7718_v14 = vpack.c.bf16 %v109_v10, %v108_v9  ;;  %v269_v17 = vld [vmem:[%s9355_s10] sm:$0x3] }
  0x19   :  { %7711 = vmatprep.subr.bf16.mxu0 %v7710_v6 }
  0x1a   :  { %7713 = vmatpush3.bf16.msra.mxu0 %v7710_v6  ;;  %98 = vperm.xlu0 %8014, %v91_v8  }
  0x1b   :  { %7715 = vmatprep.subr.bf16.mxu0 %v7714_v7 }
  0x1c   :  { %33 = vsyncpa [#allocation3], 0  ;;  %v111_v19 = vld [vmem:[%s9354_s23 + $0x38] sm:$0xff]  ;;  %v270_v20 = vsub.f32 1.0, %v269_v17  ;;  %s9356_s7 = sld [smem:[#allocation6_spill]]  ;;  %v278_v23 = vsub.s32 %v275_v18, %v8322_v16  ;;  %v112_v27 = vld [vmem:[%s9354_s23 + $0x40] sm:$0xff] }
  0x1d   :  { %v7722_v26 = vpack.c.bf16 %v111_v19, %v110_v15  ;;  %v113_v28 = vld [vmem:[%s9354_s23 + $0x48] sm:$0xff]  ;;  %v213_v31 = vsub.s32 0, %v8322_v16  ;;  %v114_v35 = vld [vmem:[%s9354_s23 + $0x50] sm:$0xff]  ;;  %v115_v36 = vld [vmem:[%s9354_s23 + $0x58] sm:$0xff]  ;;  %v93_v47 = vand.u32 127, %v92_v11  ;;  %v8144_v49 = vmov 1.0  }
  0x1e   :  { %7717 = vmatpush3.bf16.msra.mxu0 %v7714_v7  ;;  %v271_v24 = vmul.f32 -10000.0, %v270_v20  ;;  %v7726_v34 = vpack.c.bf16 %v113_v28, %v112_v27  ;;  %v7730_v40 = vpack.c.bf16 %v115_v36, %v114_v35  ;;  %v116_v41 = vld [vmem:[%s9354_s23 + $0x60] sm:$0xff]  ;;  %v117_v42 = vld [vmem:[%s9354_s23 + $0x68] sm:$0xff]  ;;  %v118_v44 = vld [vmem:[%s9354_s23 + $0x70] sm:$0xff]  ;;  %v217_v52 = vsub.s32 1, %v8322_v16  ;;  %s9358_s9 = sld [smem:[#allocation9_spill]] }
  0x1f   :  { %7719 = vmatprep.subr.bf16.mxu0 %v7718_v14  ;;  %v7734_v43 = vpack.c.bf16 %v117_v42, %v116_v41  ;;  %v119_v45 = vld [vmem:[%s9354_s23 + $0x78] sm:$0xff]  ;;  %s9357_s23 = sld [smem:[#allocation10_spill]]  ;;  %vm225_vm6 = vcmask 261120   ;;  %s9359_s0 = sld [smem:[#allocation13_spill]]  ;;  %vm8146_vm7 = vmmov 0   ;;  %vm569_vm8 = vcmask 64512  }
  0x20   :  { %v279_v29 = vrot.slane %v271_v24, %v278_v23  ;;  %v7738_v46 = vpack.c.bf16 %v119_v45, %v118_v44  ;;  %s9360_s5 = sld [smem:[#allocation15_spill]]  ;;  %s9361_s6 = sld [smem:[#allocation11_spill]]  ;;  %vm3193_vm11 = vcmask 523264   ;;  %vm6365_vm14 = vcmask 1041409  }
  0x21   :  { %s9362_s29 = sld [smem:[#allocation12_spill]]  ;;  %s9365_s4 = sld [smem:[#allocation14_spill]]  ;;  %vm6524_vm15 = vcmask 25600  }
  0x22   :  { %v196_v21 = vld [vmem:[%s9356_s7] sm:$0xff]  ;;  %v197_v22 = vld [vmem:[%s9356_s7 + $0x8] sm:$0xff]  ;;  %7721 = vmatpush3.bf16.msra.mxu0 %v7718_v14  ;;  %v280_v32 = vcombine.high %v279_v29, %v279_v29  ;;  %v287_v33 = vrot.slane %v279_v29, %v278_v23  ;;  %s9364_s7 = sld [smem:[#allocation16_spill]] }
  0x23   :  { %vm199_vm0 = vcmp.eq.s32.totalorder %v196_v21, 0  ;;  %vm200_vm1 = vcmp.eq.s32.totalorder %v197_v22, 0  ;;  %7723 = vmatprep.subr.bf16.mxu0 %v7722_v26 }
  0x24   :  { %v201_v25 = vsel %vm199_vm0, 1, %v8142_v2  ;;  %v202_v30 = vsel %vm200_vm1, 1, %v8142_v2  ;;  %v294_v37 = vrot.slane %v280_v32, %v278_v23  ;;  %v8350_v38 = vrot.slane %v287_v33, %v213_v31  ;;  %v120_v57 = vld [vmem:[%s9358_s9] sm:$0xff] }
  0x25   :  { %204 = vperm.xlu1 %8015, %v201_v25   ;;  %v198_v53 = vld [vmem:[%s9357_s23] sm:$0x3]  ;;  %v296_v15 = vld [vmem:[%s9359_s0 + $0x8] sm:$0xff]  ;;  %v297_v17 = vld [vmem:[%s9359_s0 + $0x10] sm:$0xff]  ;;  %s9363_s23 = sld [smem:[#allocation17_spill]] }
  0x26   :  { %7725 = vmatpush3.bf16.msra.mxu0 %v7722_v26  ;;  %v8352_v39 = vrot.slane %v294_v37, %v213_v31  ;;  %v214_v55 = vrot.slane %v198_v53, %v213_v31  ;;  %v218_v56 = vrot.slane %v198_v53, %v217_v52  ;;  %v295_v14 = vld [vmem:[%s9359_s0] sm:$0xff]  ;;  %v298_v18 = vld [vmem:[%s9359_s0 + $0x18] sm:$0xff]  ;;  %v388_v21 = vld [vmem:[%s9360_s5 + $0x8] sm:$0xff] }
  0x27   :  { %7727 = vmatprep.subr.bf16.mxu0 %v7726_v34  ;;  %v7742_v16 = vpack.c.bf16 %v296_v15, %v295_v14  ;;  %v7746_v19 = vpack.c.bf16 %v298_v18, %v297_v17  ;;  %v387_v20 = vld [vmem:[%s9360_s5] sm:$0xff]  ;;  %v389_v37 = vld [vmem:[%s9360_s5 + $0x10] sm:$0xff] }
  0x28   :  { %v7750_v22 = vpack.c.bf16 %v388_v21, %v387_v20  ;;  %v6543_v32 = vld [vmem:[%s9362_s29] ss:$0 sm:$0xff]  ;;  %v6560_v21 = vld [vmem:[%s9359_s0 + $0x28] sm:$0xff] }
  0x29   :  { %207 = vperm.xlu1 %8015, %v202_v30   ;;  %7743 = vmatprep.subr.bf16.mxu1 %v7742_v16  ;;  %v6542_v30 = vld [vmem:[%s9361_s6] ss:$0 sm:$0xff]  ;;  %s9366_s6 = sld [smem:[#allocation18_spill]] }
  0x2a   :  { %7729 = vmatpush3.bf16.msra.mxu0 %v7726_v34  ;;  %7745 = vmatpush3.bf16.msra.mxu1 %v7742_v16  ;;  %v6547_v53 = vld [vmem:[%s9364_s7] ss:$0 sm:$0xff] }
  0x2b   :  { %7731 = vmatprep.subr.bf16.mxu0 %v7730_v40  ;;  %7747 = vmatprep.subr.bf16.mxu1 %v7746_v19  ;;  %v473_v44 = vld [vmem:[%s9363_s23] sm:$0xff]  ;;  %v474_v45 = vld [vmem:[%s9363_s23 + $0x8] sm:$0xff] }
  0x2c   :  { %v6559_v20 = vld [vmem:[%s9359_s0 + $0x20] sm:$0xff] }
  0x2e   :  { %7733 = vmatpush3.bf16.msra.mxu0 %v7730_v40  ;;  %7749 = vmatpush3.bf16.msra.mxu1 %v7746_v19  ;;  %v390_v40 = vld [vmem:[%s9360_s5 + $0x18] sm:$0xff] }
  0x2f   :  { %7735 = vmatprep.subr.bf16.mxu0 %v7734_v43  ;;  %7751 = vmatprep.subr.bf16.mxu1 %v7750_v22 }
  0x32   :  { %7737 = vmatpush3.bf16.msra.mxu0 %v7734_v43  ;;  %v7754_v43 = vpack.c.bf16 %v390_v40, %v389_v37  ;;  %v6576_v37 = vld [vmem:[%s9363_s23 + $0x28] sm:$0xff] }
  0x33   :  { %7739 = vmatprep.subr.bf16.mxu0 %v7738_v46 }
  0x36   :  { %7741 = vmatpush3.bf16.msra.mxu0 %v7738_v46  ;;  %v7758_v46 = vpack.c.bf16 %v474_v45, %v473_v44  ;;  %v6577_v45 = vld [vmem:[%s9363_s23 + $0x30] sm:$0xff] }
  0x95   :  { %v96_v48 = vpop.permute.xlu0 %95 }
  0x96   :  { %vm100_vm2 = vcmp.eq.s32.totalorder %v96_v48, %v93_v47  ;;  %v476_v48 = vld [vmem:[%s9363_s23 + $0x18] sm:$0xff] }
  0x97   :  { %7161 = vmatprep.mubr.msk.f32.mxu0 %vm100_vm2, %v8144_v49 }
  0x99   :  { %v99_v50 = vpop.permute.xlu0 %98 }
  0x9a   :  { %vm101_vm3 = vcmp.eq.s32.totalorder %v99_v50, %v93_v47  ;;  %v475_v47 = vld [vmem:[%s9363_s23 + $0x10] sm:$0xff]  ;;  %v8145_v50 = vmov 0.0  }
  0x9b   :  { %7162 = vmatmul.mubr.msk.f32.vlgmr.msra.gmra.mrb[0].mxu0 %vm101_vm3, %v8144_v49  ;;  %v7762_v49 = vpack.c.bf16 %v476_v48, %v475_v47  ;;  %7207 = vmatprep.subr.mxu0 %v8145_v50 }
  0x9c   :  { %7209 = vmatprep.mubr.msk.f32.mxu0 %vm8146_vm7, %v8145_v50 }
  0xa4   :  { %v205_v51 = vpop.permute.xlu1 %204 }
  0xa5   :  { %vm209_vm5 = vcmp.eq.s32.totalorder %v205_v51, 1 }
  0xa6   :  { %v219_v60 = vsel %vm209_vm5, %v214_v55, %v218_v56 }
  0xa8   :  { %v208_v54 = vpop.permute.xlu1 %207 }
  0xa9   :  { %vm210_vm4 = vcmp.eq.s32.totalorder %v208_v54, 1 }
  0xaa   :  { %v220_v58 = vsel %vm210_vm4, %v214_v55, %v218_v56  ;;  %v6544_v56 = vld [vmem:[%s9365_s4] ss:$0 sm:$0xff] }
 0x16e   :  { %v7163_v59 = vpop.f32.mrb[0].mxu0 }
 0x16f   :  { %v193_v61 = vadd.f32 %v7163_v59, %v120_v57  ;;  %v187_v62 = vpop.f32.mrb[1].mxu0 }
 0x170   :  { %v188_v63 = vadd.f32 %v187_v62, %v120_v57 }
 0x171   :  { %v222_v0 = vadd.f32 %v220_v58, %v193_v61 }
 0x172   :  { %v221_v1 = vadd.f32 %v219_v60, %v188_v63  ;;  %v6550_v60 = vld [vmem:[%s9314_s13] ss:$0 sm:$0xff] }
 0x173   :  { %v229_v2 = vsel %vm225_vm6, %v222_v0, 0.0 }
 0x174   :  { %230 = vadd.xlane.f32.xlu1 %v229_v2  ;;  %v226_v3 = vsel %vm225_vm6, %v221_v1, 0.0 }
 0x175   :  { %227 = vadd.xlane.f32.xlu0 %v226_v3 }
 0x201   :  { %v231_v4 = vpop.xlane.xlu1 %230 }
 0x202   :  { %v234_v5 = vmul.f32 0.03125, %v231_v4  ;;  %v228_v6 = vpop.xlane.xlu0 %227 }
 0x203   :  { %v233_v7 = vmul.f32 0.03125, %v228_v6 }
 0x204   :  { %v236_v8 = vsub.f32 %v222_v0, %v234_v5 }
 0x205   :  { %v235_v9 = vsub.f32 %v221_v1, %v233_v7 }
 0x206   :  { %v238_v12 = vmul.f32 %v236_v8, %v236_v8 }
 0x207   :  { %v237_v10 = vmul.f32 %v235_v9, %v235_v9 }
 0x208   :  { %v242_v13 = vsel %vm225_vm6, %v238_v12, 0.0 }
 0x209   :  { %v239_v11 = vsel %vm225_vm6, %v237_v10, 0.0 }
 0x20a   :  { %240 = vadd.xlane.f32.xlu0 %v239_v11 }
 0x20e   :  { %243 = vadd.xlane.f32.xlu0 %v242_v13 }
 0x297   :  { %v241_v23 = vpop.xlane.xlu0 %240 }
 0x298   :  { %v245_v24 = vmul.f32 0.03125, %v241_v23  ;;  %v6567_v23 = vld [vmem:[%s9360_s5 + $0x20] sm:$0xff] }
 0x29a   :  { %v247_v25 = vadd.f32 1e-12, %v245_v24  ;;  %v6568_v24 = vld [vmem:[%s9360_s5 + $0x28] sm:$0xff] }
 0x29b   :  { %v244_v26 = vpop.xlane.xlu0 %243 }
 0x29c   :  { %8016 = vrsqrt.f32 %v247_v25  ;;  %v246_v27 = vmul.f32 0.03125, %v244_v26  ;;  %v7774_v25 = vpack.c.bf16 %v6568_v24, %v6567_v23  ;;  %v6595_v23 = vld [vmem:[%s9359_s0 + $0x48] sm:$0xff] }
 0x29e   :  { %v248_v28 = vadd.f32 1e-12, %v246_v27 }
 0x2a0   :  { %8018 = vrsqrt.f32 %v248_v28  ;;  %v6561_v28 = vld [vmem:[%s9359_s0 + $0x30] sm:$0xff] }
 0x2a6   :  { %v8017_v29 = vpop.eup %8016 }
 0x2a7   :  { %v251_v31 = vmul.f32 %v8017_v29, %v235_v9  ;;  %v6562_v29 = vld [vmem:[%s9359_s0 + $0x38] sm:$0xff] }
 0x2a9   :  { %v259_v33 = vmul.f32 %v6542_v30, %v251_v31 }
 0x2aa   :  { %v8019_v34 = vpop.eup %8018 }
 0x2ab   :  { %v8401_v35 = vadd.f32 %v6543_v32, %v259_v33  ;;  %v252_v36 = vmul.f32 %v8019_v34, %v236_v8  ;;  %v6569_v33 = vld [vmem:[%s9360_s5 + $0x30] sm:$0xff]  ;;  %v6570_v34 = vld [vmem:[%s9360_s5 + $0x38] sm:$0xff] }
 0x2ad   :  { %v260_v41 = vmul.f32 %v6542_v30, %v252_v36  ;;  %7172 = vmatprep.mubr.msk.f32.mxu1 %vm225_vm6, %v8401_v35  ;;  %v6575_v36 = vld [vmem:[%s9363_s23 + $0x20] sm:$0xff] }
 0x2ae   :  { %v7782_v44 = vpack.c.bf16 %v6576_v37, %v6575_v36  ;;  %v6611_v36 = vld [vmem:[%s9363_s23 + $0x48] sm:$0xff] }
 0x2af   :  { %v8411_v42 = vadd.f32 %v6543_v32, %v260_v41  ;;  %v7770_v32 = vpack.c.bf16 %v6562_v29, %v6561_v28  ;;  %v6596_v29 = vld [vmem:[%s9359_s0 + $0x50] sm:$0xff] }
 0x2b1   :  { %7173 = vmatmul.mubr.msk.f32.vlgmr.msra.gmra.mrb[0].mxu1 %vm225_vm6, %v8411_v42 }
 0x2b2   :  { %7753 = vmatpush3.bf16.msra.mxu1 %v7750_v22  ;;  %7183 = vmatprep.mubr.msk.f32.mxu1 %vm225_vm6, %v8401_v35  ;;  %v7766_v22 = vpack.c.bf16 %v6560_v21, %v6559_v20 }
 0x2b3   :  { %7755 = vmatprep.subr.bf16.mxu1 %v7754_v43 }
 0x2b6   :  { %7757 = vmatpush3.bf16.msra.mxu1 %v7754_v43  ;;  %v7778_v43 = vpack.c.bf16 %v6570_v34, %v6569_v33  ;;  %v6610_v34 = vld [vmem:[%s9363_s23 + $0x40] sm:$0xff] }
 0x2b7   :  { %7759 = vmatprep.subr.bf16.mxu1 %v7758_v46  ;;  %v7806_v37 = vpack.c.bf16 %v6611_v36, %v6610_v34 }
 0x2b9   :  { %7184 = vmatmul.mubr.msk.f32.vlgmr.msra.gmra.mrb[2].mxu1 %vm225_vm6, %v8411_v42 }
 0x2ba   :  { %7761 = vmatpush3.bf16.msra.mxu1 %v7758_v46  ;;  %7194 = vmatprep.mubr.msk.f32.mxu1 %vm225_vm6, %v8401_v35  ;;  %v6578_v46 = vld [vmem:[%s9363_s23 + $0x38] sm:$0xff] }
 0x2bb   :  { %7763 = vmatprep.subr.bf16.mxu1 %v7762_v49  ;;  %v7786_v47 = vpack.c.bf16 %v6578_v46, %v6577_v45  ;;  %v890_v45 = vld [vmem:[%s9315_s14] sm:$0xff] }
 0x2be   :  { %7765 = vmatpush3.bf16.msra.mxu1 %v7762_v49 }
 0x2bf   :  { %7197 = vmatprep.subr.mxu1 %v8145_v50 }
 0x2c1   :  { %7195 = vmatmul.mubr.msk.f32.vlgmr.msra.gmra.mrb[4].mxu1 %vm225_vm6, %v8411_v42 }
 0x2c2   :  { %7199 = vmatprep.mubr.msk.f32.mxu1 %vm8146_vm7, %v8145_v50 }
 0x384   :  { %v7174_v51 = vpop.f32.mrb[0].mxu1 }
 0x385   :  { %v378_v52 = vpop.f32.mrb[1].mxu1  ;;  %v384_v62 = vadd.f32 %v7174_v51, %v6544_v56 }
 0x386   :  { %v379_v58 = vadd.f32 %v6544_v56, %v378_v52 }
 0x38c   :  { %v7185_v54 = vpop.f32.mrb[2].mxu1 }
 0x38d   :  { %v464_v55 = vpop.f32.mrb[3].mxu1  ;;  %v470_v59 = vadd.f32 %v7185_v54, %v6547_v53 }
 0x38e   :  { %v465_v57 = vadd.f32 %v6547_v53, %v464_v55  ;;  %v6572_v55 = vld [vmem:[%s9364_s7 + $0x1] ss:$0 sm:$0xff] }
 0x390   :  { %7198 = vmatpush3.xpose.msk.msra.mxu1 %vm569_vm8, %v465_v57 }
 0x391   :  { %7202 = vmatprep.subr.mxu1 %v8145_v50 }
 0x393   :  { %7200 = vmatmul.mubr.msk.f32.vlgmr.msra.gmra.mrb[6].mxu1 %vm569_vm8, %v379_v58  ;;  %v6564_v58 = vld [vmem:[%s9365_s4 + $0x1] ss:$0 sm:$0xff] }
 0x394   :  { %v7196_v61 = vpop.f32.mrb[4].mxu1  ;;  %7203 = vmatpush3.xpose.msk.msra.mxu1 %vm569_vm8, %v470_v59  ;;  %7204 = vmatprep.mubr.msk.f32.mxu1 %vm8146_vm7, %v8145_v50 }
 0x395   :  { %v556_v63 = vadd.f32 %v7196_v61, %v6550_v60  ;;  %v550_v0 = vpop.f32.mrb[5].mxu1  ;;  %7212 = vmatprep.subr.mxu1 %v8145_v50 }
 0x396   :  { %v551_v1 = vadd.f32 %v6550_v60, %v550_v0  ;;  %v6580_v60 = vld [vmem:[%s9314_s13 + $0x1] ss:$0 sm:$0xff] }
 0x397   :  { %7205 = vmatmul.mubr.msk.f32.vlgmr.msra.gmra.mrb[8].mxu1 %vm569_vm8, %v384_v62 }
 0x398   :  { %7208 = vmatpush3.msra.mxu0 %v551_v1  ;;  %7213 = vmatpush3.msra.mxu1 %v556_v63 }
 0x399   :  { %7214 = vmatprep.mubr.msk.f32.mxu1 %vm8146_vm7, %v8145_v50  ;;  %7767 = vmatprep.subr.bf16.mxu0 %v7766_v22 }
 0x39a   :  { %7775 = vmatprep.subr.bf16.mxu1 %v7774_v25 }
 0x466   :  { %v642_v2 = vpop.f32.mrb[6].mxu1 }
 0x467   :  { %v643_v3 = vadd.f32 %v642_v2, %v8350_v38  ;;  %v7201_v4 = vpop.f32.mrb[7].mxu1 }
 0x469   :  { %v722_v5 = vsel %vm569_vm8, %v643_v3, -inf }
 0x46a   :  { %723 = vmax.xlane.f32.xlu0 %v722_v5  ;;  %v718_v6 = vpop.f32.mrb[8].mxu1 }
 0x46b   :  { %v719_v7 = vadd.f32 %v718_v6, %v8352_v39  ;;  %v7206_v8 = vpop.f32.mrb[9].mxu1 }
 0x46d   :  { %v725_v9 = vsel %vm569_vm8, %v719_v7, -inf }
 0x46e   :  { %726 = vmax.xlane.f32.xlu1 %v725_v9 }
 0x4f7   :  { %v724_v10 = vpop.xlane.xlu0 %723 }
 0x4f8   :  { %v728_v11 = vsub.f32 %v643_v3, %v724_v10 }
 0x4fa   :  { %v730_v12 = vmul.f32 1.442695, %v728_v11 }
 0x4fb   :  { %v727_v13 = vpop.xlane.xlu1 %726 }
 0x4fc   :  { %8020 = vpow2.f32 %v730_v12  ;;  %v729_v14 = vsub.f32 %v719_v7, %v727_v13 }
 0x4fe   :  { %v732_v15 = vmul.f32 1.442695, %v729_v14 }
 0x500   :  { %8022 = vpow2.f32 %v732_v15 }
 0x506   :  { %v8021_v16 = vpop.eup %8020 }
 0x507   :  { %v734_v17 = vsel %vm569_vm8, %v8021_v16, 0.0 }
 0x508   :  { %735 = vadd.xlane.f32.xlu0 %v734_v17 }
 0x50a   :  { %v8023_v18 = vpop.eup %8022 }
 0x50b   :  { %v737_v19 = vsel %vm569_vm8, %v8023_v18, 0.0 }
 0x50c   :  { %738 = vadd.xlane.f32.xlu1 %v737_v19 }
 0x595   :  { %v736_v26 = vpop.xlane.xlu0 %735 }
 0x596   :  { %8024 = vrcp.f32 %v736_v26 }
 0x599   :  { %v739_v27 = vpop.xlane.xlu1 %738 }
 0x59a   :  { %8026 = vrcp.f32 %v739_v27 }
 0x5a0   :  { %v8025_v30 = vpop.eup %8024 }
 0x5a1   :  { %v742_v31 = vmul.f32 %v8025_v30, %v8021_v16  ;;  %v6597_v30 = vld [vmem:[%s9359_s0 + $0x58] sm:$0xff] }
 0x5a2   :  { %v7794_v33 = vpack.c.bf16 %v6597_v30, %v6596_v29  ;;  %v6624_v29 = vld [vmem:[%s9315_s14 + $0x10] sm:$0xff] }
 0x5a3   :  { %7210 = vmatmul.mubr.msk.f32.vlgmr.msra.gmra.mrb[2].mxu0 %vm569_vm8, %v742_v31 }
 0x5a4   :  { %v8027_v40 = vpop.eup %8026  ;;  %7769 = vmatpush3.bf16.msra.mxu0 %v7766_v22  ;;  %7225 = vmatprep.mubr.msk.f32.mxu0 %vm225_vm6, %v8401_v35  ;;  %v6594_v22 = vld [vmem:[%s9359_s0 + $0x40] sm:$0xff] }
 0x5a5   :  { %v743_v41 = vmul.f32 %v8027_v40, %v8023_v18  ;;  %7771 = vmatprep.subr.bf16.mxu0 %v7770_v32  ;;  %v7790_v24 = vpack.c.bf16 %v6595_v23, %v6594_v22  ;;  %v6612_v40 = vld [vmem:[%s9363_s23 + $0x50] sm:$0xff] }
 0x5a7   :  { %7215 = vmatmul.mubr.msk.f32.vlgmr.msra.gmra.mrb[10].mxu1 %vm569_vm8, %v743_v41  ;;  %v6613_v41 = vld [vmem:[%s9363_s23 + $0x58] sm:$0xff] }
 0x5a8   :  { %7773 = vmatpush3.bf16.msra.mxu0 %v7770_v32  ;;  %7777 = vmatpush3.bf16.msra.mxu1 %v7774_v25 }
 0x5a9   :  { %7236 = vmatprep.mubr.msk.f32.mxu1 %vm225_vm6, %v8401_v35  ;;  %7779 = vmatprep.subr.bf16.mxu1 %v7778_v43 }
 0x5aa   :  { %7783 = vmatprep.subr.bf16.mxu0 %v7782_v44 }
 0x5ab   :  { %7226 = vmatmul.mubr.msk.f32.vlgmr.msra.gmra.mrb[4].mxu0 %vm225_vm6, %v8411_v42 }
 0x5ac   :  { %7781 = vmatpush3.bf16.msra.mxu1 %v7778_v43  ;;  %7785 = vmatpush3.bf16.msra.mxu0 %v7782_v44  ;;  %v7810_v43 = vpack.c.bf16 %v6613_v41, %v6612_v40  ;;  %v6589_v44 = vld [vmem:[%s9315_s14 + $0x8] sm:$0xff] }
 0x5ad   :  { %7247 = vmatprep.mubr.msk.f32.mxu0 %vm225_vm6, %v8401_v35  ;;  %7787 = vmatprep.subr.bf16.mxu0 %v7786_v47 }
 0x5ae   :  { %7250 = vmatprep.subr.mxu1 %v8145_v50 }
 0x5af   :  { %7237 = vmatmul.mubr.msk.f32.vlgmr.msra.gmra.mrb[12].mxu1 %vm225_vm6, %v8411_v42 }
 0x5b0   :  { %7789 = vmatpush3.bf16.msra.mxu0 %v7786_v47  ;;  %7252 = vmatprep.mubr.msk.f32.mxu1 %vm8146_vm7, %v8145_v50  ;;  %v6602_v47 = vld [vmem:[%s9360_s5 + $0x40] sm:$0xff] }
 0x5b1   :  { %7260 = vmatprep.subr.mxu0 %v8145_v50 }
 0x5b3   :  { %7248 = vmatmul.mubr.msk.f32.vlgmr.msra.gmra.mrb[6].mxu0 %vm225_vm6, %v8411_v42 }
 0x5b4   :  { %7262 = vmatprep.mubr.msk.f32.mxu0 %vm8146_vm7, %v8145_v50 }
 0x676   :  { %v8522_v48 = vpop.f32.mrb[2].mxu0 }
 0x677   :  { %v7211_v49 = vpop.f32.mrb[3].mxu0 }
 0x678   :  { %v6603_v49 = vld [vmem:[%s9360_s5 + $0x48] sm:$0xff] }
 0x67a   :  { %v8524_v51 = vpop.f32.mrb[10].mxu1 }
 0x67b   :  { %v7216_v52 = vpop.f32.mrb[11].mxu1 }
 0x67e   :  { %v7227_v53 = vpop.f32.mrb[4].mxu0 }
 0x67f   :  { %v970_v54 = vpop.f32.mrb[5].mxu0  ;;  %v976_v2 = vadd.f32 %v7227_v53, %v6564_v58  ;;  %v7798_v53 = vpack.c.bf16 %v6603_v49, %v6602_v47  ;;  %v6646_v47 = vld [vmem:[%s9363_s23 + $0x78] sm:$0xff] }
 0x680   :  { %v971_v62 = vadd.f32 %v6564_v58, %v970_v54 }
 0x682   :  { %v7238_v56 = vpop.f32.mrb[12].mxu1 }
 0x683   :  { %v1058_v57 = vpop.f32.mrb[13].mxu1  ;;  %v1064_v0 = vadd.f32 %v7238_v56, %v6572_v55  ;;  %v6604_v56 = vld [vmem:[%s9360_s5 + $0x50] sm:$0xff] }
 0x684   :  { %v1059_v59 = vadd.f32 %v6572_v55, %v1058_v57  ;;  %v6605_v57 = vld [vmem:[%s9360_s5 + $0x58] sm:$0xff] }
 0x685   :  { %v7802_v58 = vpack.c.bf16 %v6605_v57, %v6604_v56  ;;  %v6638_v56 = vld [vmem:[%s9360_s5 + $0x78] sm:$0xff] }
 0x686   :  { %v7249_v61 = vpop.f32.mrb[6].mxu0  ;;  %7251 = vmatpush3.xpose.msk.msra.mxu1 %vm569_vm8, %v1059_v59 }
 0x687   :  { %v1146_v63 = vpop.f32.mrb[7].mxu0  ;;  %7255 = vmatprep.subr.mxu1 %v8145_v50  ;;  %v1152_v3 = vadd.f32 %v7249_v61, %v6580_v60 }
 0x688   :  { %v1147_v1 = vadd.f32 %v6580_v60, %v1146_v63  ;;  %v6599_v63 = vld [vmem:[%s9365_s4 + $0x2] ss:$0 sm:$0xff] }
 0x689   :  { %7253 = vmatmul.mubr.msk.f32.vlgmr.msra.gmra.mrb[14].mxu1 %vm569_vm8, %v971_v62 }
 0x68a   :  { %7256 = vmatpush3.xpose.msk.msra.mxu1 %vm569_vm8, %v1064_v0  ;;  %7261 = vmatpush3.msra.mxu0 %v1147_v1 }
 0x68b   :  { %7257 = vmatprep.mubr.msk.f32.mxu1 %vm8146_vm7, %v8145_v50  ;;  %7265 = vmatprep.subr.mxu1 %v8145_v50 }
 0x68c   :  { %7270 = vmatprep.subr.mxu0 %v6589_v44 }
 0x68d   :  { %7258 = vmatmul.mubr.msk.f32.vlgmr.msra.gmra.mrb[16].mxu1 %vm569_vm8, %v976_v2  ;;  %v6615_v2 = vld [vmem:[%s9314_s13 + $0x2] ss:$0 sm:$0xff] }
 0x68e   :  { %7266 = vmatpush3.msra.mxu1 %v1152_v3  ;;  %7267 = vmatprep.mubr.msk.f32.mxu1 %vm8146_vm7, %v8145_v50 }
 0x68f   :  { %7791 = vmatprep.subr.bf16.mxu1 %v7790_v24 }
 0x75c   :  { %v1227_v4 = vpop.f32.mrb[14].mxu1 }
 0x75d   :  { %v1228_v5 = vadd.f32 %v1227_v4, %v8350_v38  ;;  %v7254_v6 = vpop.f32.mrb[15].mxu1 }
 0x75f   :  { %v1307_v7 = vsel %vm569_vm8, %v1228_v5, -inf }
 0x760   :  { %1308 = vmax.xlane.f32.xlu1 %v1307_v7  ;;  %v1303_v8 = vpop.f32.mrb[16].mxu1 }
 0x761   :  { %v1304_v9 = vadd.f32 %v1303_v8, %v8352_v39  ;;  %v7259_v10 = vpop.f32.mrb[17].mxu1 }
 0x763   :  { %v1310_v11 = vsel %vm569_vm8, %v1304_v9, -inf }
 0x764   :  { %1311 = vmax.xlane.f32.xlu0 %v1310_v11 }
 0x7ed   :  { %v1309_v12 = vpop.xlane.xlu1 %1308 }
 0x7ee   :  { %v1313_v13 = vsub.f32 %v1228_v5, %v1309_v12 }
 0x7f0   :  { %v1315_v14 = vmul.f32 1.442695, %v1313_v13 }
 0x7f1   :  { %v1312_v15 = vpop.xlane.xlu0 %1311 }
 0x7f2   :  { %8028 = vpow2.f32 %v1315_v14  ;;  %v1314_v16 = vsub.f32 %v1304_v9, %v1312_v15 }
 0x7f4   :  { %v1317_v17 = vmul.f32 1.442695, %v1314_v16 }
 0x7f6   :  { %8030 = vpow2.f32 %v1317_v17 }
 0x7fc   :  { %v8029_v18 = vpop.eup %8028 }
 0x7fd   :  { %v1319_v19 = vsel %vm569_vm8, %v8029_v18, 0.0 }
 0x7fe   :  { %1320 = vadd.xlane.f32.xlu1 %v1319_v19 }
 0x800   :  { %v8031_v20 = vpop.eup %8030 }
 0x801   :  { %v1322_v21 = vsel %vm569_vm8, %v8031_v20, 0.0 }
 0x802   :  { %1323 = vadd.xlane.f32.xlu0 %v1322_v21 }
 0x88b   :  { %v1321_v25 = vpop.xlane.xlu1 %1320 }
 0x88c   :  { %8032 = vrcp.f32 %v1321_v25 }
 0x88f   :  { %v1324_v26 = vpop.xlane.xlu0 %1323 }
 0x890   :  { %8034 = vrcp.f32 %v1324_v26  ;;  %v6627_v26 = vld [vmem:[%s9359_s0 + $0x60] sm:$0xff] }
 0x896   :  { %v8033_v27 = vpop.eup %8032 }
 0x897   :  { %v1327_v28 = vmul.f32 %v8033_v27, %v8029_v18  ;;  %v6628_v27 = vld [vmem:[%s9359_s0 + $0x68] sm:$0xff] }
 0x899   :  { %7263 = vmatmul.mubr.msk.f32.vlgmr.msra.gmra.mrb[8].mxu0 %vm569_vm8, %v1327_v28  ;;  %v7814_v28 = vpack.c.bf16 %v6628_v27, %v6627_v26 }
 0x89a   :  { %v8035_v31 = vpop.eup %8034  ;;  %7271 = vmatpush3.msra.mxu0 %v6589_v44  ;;  %v6644_v44 = vld [vmem:[%s9363_s23 + $0x68] sm:$0xff] }
 0x89b   :  { %v1328_v32 = vmul.f32 %v8035_v31, %v8031_v20  ;;  %7275 = vmatprep.subr.mxu0 %v890_v45 }
 0x89d   :  { %7268 = vmatmul.mubr.msk.f32.vlgmr.msra.gmra.mrb[18].mxu1 %vm569_vm8, %v1328_v32  ;;  %v6629_v32 = vld [vmem:[%s9359_s0 + $0x70] sm:$0xff] }
 0x89e   :  { %7793 = vmatpush3.bf16.msra.mxu1 %v7790_v24  ;;  %7288 = vmatprep.mubr.msk.f32.mxu1 %vm225_vm6, %v8401_v35 }
 0x89f   :  { %7795 = vmatprep.subr.bf16.mxu1 %v7794_v33 }
 0x8a2   :  { %7797 = vmatpush3.bf16.msra.mxu1 %v7794_v33  ;;  %v6630_v33 = vld [vmem:[%s9359_s0 + $0x78] sm:$0xff] }
 0x8a3   :  { %7807 = vmatprep.subr.bf16.mxu1 %v7806_v37  ;;  %v7818_v40 = vpack.c.bf16 %v6630_v33, %v6629_v32 }
 0x8a5   :  { %7289 = vmatmul.mubr.msk.f32.vlgmr.msra.gmra.mrb[20].mxu1 %vm225_vm6, %v8411_v42 }
 0x8a6   :  { %7809 = vmatpush3.bf16.msra.mxu1 %v7806_v37  ;;  %7310 = vmatprep.mubr.msk.f32.mxu1 %vm225_vm6, %v8401_v35 }
 0x8a7   :  { %7811 = vmatprep.subr.bf16.mxu1 %v7810_v43 }
 0x8aa   :  { %7813 = vmatpush3.bf16.msra.mxu1 %v7810_v43  ;;  %v6643_v43 = vld [vmem:[%s9363_s23 + $0x60] sm:$0xff] }
 0x8ab   :  { %7318 = vmatprep.subr.mxu1 %v8145_v50 }
 0x8ad   :  { %7311 = vmatmul.mubr.msk.f32.vlgmr.msra.gmra.mrb[22].mxu1 %vm225_vm6, %v8411_v42 }
 0x8ae   :  { %7320 = vmatprep.mubr.msk.f32.mxu1 %vm8146_vm7, %v8145_v50 }
 0x96c   :  { %v1398_v46 = vpop.f32.mrb[8].mxu0 }
 0x96d   :  { %v7264_v52 = vpop.f32.mrb[9].mxu0  ;;  %7272 = vmatprep.mubr.msk.f32.mxu0 %vm569_vm8, %v1398_v46  ;;  %v6645_v46 = vld [vmem:[%s9363_s23 + $0x70] sm:$0xff] }
 0x96e   :  { %v7834_v49 = vpack.c.bf16 %v6646_v47, %v6645_v46  ;;  %v6635_v52 = vld [vmem:[%s9360_s5 + $0x60] sm:$0xff] }
 0x970   :  { %v1471_v54 = vpop.f32.mrb[18].mxu1 }
 0x971   :  { %v7269_v55 = vpop.f32.mrb[19].mxu1  ;;  %7273 = vmatmul.mubr.msk.f32.vlgmr.msra.gmra.mrb[10].mxu0 %vm569_vm8, %v1471_v54 }
 0x972   :  { %7276 = vmatpush3.msra.mxu0 %v890_v45  ;;  %7277 = vmatprep.mubr.msk.f32.mxu0 %vm569_vm8, %v8522_v48  ;;  %v7830_v45 = vpack.c.bf16 %v6644_v44, %v6643_v43  ;;  %v6637_v55 = vld [vmem:[%s9360_s5 + $0x70] sm:$0xff]  ;;  %v6660_v44 = vld [vmem:[%s9316_s15] ss:$0 sm:$0xff] }
 0x973   :  { %7799 = vmatprep.subr.bf16.mxu0 %v7798_v53 }
 0x978   :  { %v7290_v59 = vpop.f32.mrb[20].mxu1 }
 0x979   :  { %v1718_v60 = vpop.f32.mrb[21].mxu1  ;;  %7278 = vmatmul.mubr.msk.f32.vlgmr.msra.gmra.mrb[10].mxu0 %vm569_vm8, %v8524_v51  ;;  %v6607_v51 = vld [vmem:[%s9364_s7 + $0x2] ss:$0 sm:$0xff]  ;;  %v1724_v4 = vadd.f32 %v7290_v59, %v6599_v63 }
 0x97a   :  { %7801 = vmatpush3.bf16.msra.mxu0 %v7798_v53  ;;  %7299 = vmatprep.mubr.msk.f32.mxu0 %vm225_vm6, %v8401_v35  ;;  %v1719_v5 = vadd.f32 %v6599_v63, %v1718_v60  ;;  %v6636_v53 = vld [vmem:[%s9360_s5 + $0x68] sm:$0xff]  ;;  %v7826_v60 = vpack.c.bf16 %v6638_v56, %v6637_v55 }
 0x97b   :  { %7803 = vmatprep.subr.bf16.mxu0 %v7802_v58  ;;  %v7822_v54 = vpack.c.bf16 %v6636_v53, %v6635_v52 }
 0x97e   :  { %7805 = vmatpush3.bf16.msra.mxu0 %v7802_v58 }
 0x97f   :  { %7313 = vmatprep.subr.mxu0 %v8145_v50 }
 0x980   :  { %v7312_v48 = vpop.f32.mrb[22].mxu1 }
 0x981   :  { %7300 = vmatmul.mubr.msk.f32.vlgmr.msra.gmra.mrb[12].mxu0 %vm225_vm6, %v8411_v42  ;;  %v1894_v61 = vpop.f32.mrb[23].mxu1  ;;  %v1900_v6 = vadd.f32 %v7312_v48, %v6615_v2 }
 0x982   :  { %7315 = vmatprep.mubr.msk.f32.mxu0 %vm8146_vm7, %v8145_v50  ;;  %v1895_v7 = vadd.f32 %v6615_v2, %v1894_v61 }
 0xa54   :  { %v7301_v62 = vpop.f32.mrb[12].mxu0 }
 0xa55   :  { %v1812_v0 = vadd.f32 %v7301_v62, %v6607_v51  ;;  %v1806_v1 = vpop.f32.mrb[13].mxu0  ;;  %v6648_v62 = vld [vmem:[%s9314_s13 + $0x3] ss:$0 sm:$0xff] }
 0xa56   :  { %v1807_v3 = vadd.f32 %v6607_v51, %v1806_v1 }
 0xa57   :  { %7319 = vmatpush3.xpose.msk.msra.mxu1 %vm569_vm8, %v1812_v0 }
 0xa58   :  { %7314 = vmatpush3.xpose.msk.msra.mxu0 %vm569_vm8, %v1807_v3  ;;  %7328 = vmatprep.subr.mxu1 %v8145_v50  ;;  %v6640_v3 = vld [vmem:[%s9364_s7 + $0x3] ss:$0 sm:$0xff] }
 0xa59   :  { %7323 = vmatprep.subr.mxu0 %v8145_v50 }
 0xa5a   :  { %7321 = vmatmul.mubr.msk.f32.vlgmr.msra.gmra.mrb[24].mxu1 %vm569_vm8, %v1724_v4 }
 0xa5b   :  { %7316 = vmatmul.mubr.msk.f32.vlgmr.msra.gmra.mrb[14].mxu0 %vm569_vm8, %v1719_v5  ;;  %7329 = vmatpush3.msra.mxu1 %v1900_v6  ;;  %v6632_v6 = vld [vmem:[%s9365_s4 + $0x3] ss:$0 sm:$0xff] }
 0xa5c   :  { %7324 = vmatpush3.msra.mxu0 %v1895_v7  ;;  %7330 = vmatprep.mubr.msk.f32.mxu1 %vm8146_vm7, %v8145_v50 }
 0xa5d   :  { %7325 = vmatprep.mubr.msk.f32.mxu0 %vm8146_vm7, %v8145_v50  ;;  %7815 = vmatprep.subr.bf16.mxu1 %v7814_v28 }
 0xa5e   :  { %7333 = vmatprep.subr.mxu0 %v6624_v29 }
 0xb2d   :  { %v2051_v8 = vpop.f32.mrb[24].mxu1 }
 0xb2e   :  { %v2052_v9 = vadd.f32 %v2051_v8, %v8352_v39  ;;  %v1975_v10 = vpop.f32.mrb[14].mxu0  ;;  %v7322_v11 = vpop.f32.mrb[25].mxu1 }
 0xb2f   :  { %v1976_v12 = vadd.f32 %v1975_v10, %v8350_v38  ;;  %v7317_v13 = vpop.f32.mrb[15].mxu0 }
 0xb30   :  { %v2058_v14 = vsel %vm569_vm8, %v2052_v9, -inf }
 0xb31   :  { %2059 = vmax.xlane.f32.xlu0 %v2058_v14  ;;  %v2055_v15 = vsel %vm569_vm8, %v1976_v12, -inf }
 0xb32   :  { %2056 = vmax.xlane.f32.xlu1 %v2055_v15 }
 0xbbe   :  { %v2060_v16 = vpop.xlane.xlu0 %2059 }
 0xbbf   :  { %v2062_v17 = vsub.f32 %v2052_v9, %v2060_v16  ;;  %v2057_v18 = vpop.xlane.xlu1 %2056 }
 0xbc0   :  { %v2061_v19 = vsub.f32 %v1976_v12, %v2057_v18 }
 0xbc1   :  { %v2065_v20 = vmul.f32 1.442695, %v2062_v17 }
 0xbc2   :  { %v2063_v21 = vmul.f32 1.442695, %v2061_v19 }
 0xbc3   :  { %8036 = vpow2.f32 %v2065_v20 }
 0xbc4   :  { %8038 = vpow2.f32 %v2063_v21 }
 0xbcd   :  { %v8037_v22 = vpop.eup %8036 }
 0xbce   :  { %v8039_v23 = vpop.eup %8038  ;;  %v2070_v24 = vsel %vm569_vm8, %v8037_v22, 0.0 }
 0xbcf   :  { %2071 = vadd.xlane.f32.xlu0 %v2070_v24  ;;  %v2067_v25 = vsel %vm569_vm8, %v8039_v23, 0.0 }
 0xbd0   :  { %2068 = vadd.xlane.f32.xlu1 %v2067_v25 }
 0xc5c   :  { %v2072_v30 = vpop.xlane.xlu0 %2071 }
 0xc5d   :  { %8040 = vrcp.f32 %v2072_v30  ;;  %v2069_v31 = vpop.xlane.xlu1 %2068 }
 0xc5e   :  { %8042 = vrcp.f32 %v2069_v31 }
 0xc67   :  { %v8041_v34 = vpop.eup %8040 }
 0xc68   :  { %v8043_v36 = vpop.eup %8042  ;;  %v2076_v37 = vmul.f32 %v8041_v34, %v8037_v22 }
 0xc69   :  { %v2075_v41 = vmul.f32 %v8043_v36, %v8039_v23  ;;  %v6657_v36 = vld [vmem:[%s9315_s14 + $0x18] sm:$0xff] }
 0xc6a   :  { %7331 = vmatmul.mubr.msk.f32.vlgmr.msra.gmra.mrb[26].mxu1 %vm569_vm8, %v2076_v37 }
 0xc6b   :  { %7817 = vmatpush3.bf16.msra.mxu1 %v7814_v28  ;;  %7326 = vmatmul.mubr.msk.f32.vlgmr.msra.gmra.mrb[16].mxu0 %vm569_vm8, %v2075_v41 }
 0xc6c   :  { %7346 = vmatprep.mubr.msk.f32.mxu1 %vm225_vm6, %v8401_v35  ;;  %7819 = vmatprep.subr.bf16.mxu1 %v7818_v40 }
 0xc6d   :  { %7334 = vmatpush3.msra.mxu0 %v6624_v29 }
 0xc6e   :  { %7823 = vmatprep.subr.bf16.mxu0 %v7822_v54 }
 0xc6f   :  { %7821 = vmatpush3.bf16.msra.mxu1 %v7818_v40 }
 0xc70   :  { %7831 = vmatprep.subr.bf16.mxu1 %v7830_v45 }
 0xc72   :  { %7347 = vmatmul.mubr.msk.f32.vlgmr.msra.gmra.mrb[28].mxu1 %vm225_vm6, %v8411_v42 }
 0xc73   :  { %7833 = vmatpush3.bf16.msra.mxu1 %v7830_v45  ;;  %7368 = vmatprep.mubr.msk.f32.mxu1 %vm225_vm6, %v8401_v35 }
 0xc74   :  { %7835 = vmatprep.subr.bf16.mxu1 %v7834_v49 }
 0xc77   :  { %7837 = vmatpush3.bf16.msra.mxu1 %v7834_v49 }
 0xc78   :  { %7381 = vmatprep.subr.mxu1 %v8145_v50 }
 0xc7a   :  { %7369 = vmatmul.mubr.msk.f32.vlgmr.msra.gmra.mrb[30].mxu1 %vm225_vm6, %v8411_v42 }
 0xc7b   :  { %7383 = vmatprep.mubr.msk.f32.mxu1 %vm8146_vm7, %v8145_v50 }
 0xd3d   :  { %v2219_v57 = vpop.f32.mrb[26].mxu1 }
 0xd3e   :  { %v2146_v58 = vpop.f32.mrb[16].mxu0  ;;  %v7332_v59 = vpop.f32.mrb[27].mxu1 }
 0xd3f   :  { %v7327_v48 = vpop.f32.mrb[17].mxu0  ;;  %7335 = vmatprep.mubr.msk.f32.mxu0 %vm569_vm8, %v2146_v58 }
 0xd40   :  { %7336 = vmatmul.mubr.msk.f32.vlgmr.msra.gmra.mrb[10].mxu0 %vm569_vm8, %v2219_v57 }
 0xd41   :  { %7825 = vmatpush3.bf16.msra.mxu0 %v7822_v54  ;;  %7357 = vmatprep.mubr.msk.f32.mxu0 %vm225_vm6, %v8401_v35 }
 0xd42   :  { %7827 = vmatprep.subr.bf16.mxu0 %v7826_v60 }
 0xd45   :  { %v7348_v61 = vpop.f32.mrb[28].mxu1  ;;  %7829 = vmatpush3.bf16.msra.mxu0 %v7826_v60 }
 0xd46   :  { %v2387_v51 = vpop.f32.mrb[29].mxu1  ;;  %7371 = vmatprep.subr.mxu0 %v8145_v50  ;;  %v2393_v10 = vadd.f32 %v7348_v61, %v6632_v6 }
 0xd47   :  { %v2388_v8 = vadd.f32 %v6632_v6, %v2387_v51 }
 0xd48   :  { %7358 = vmatmul.mubr.msk.f32.vlgmr.msra.gmra.mrb[18].mxu0 %vm225_vm6, %v8411_v42 }
 0xd49   :  { %7373 = vmatprep.mubr.msk.f32.mxu0 %vm8146_vm7, %v8145_v50 }
 0xd4d   :  { %v7370_v63 = vpop.f32.mrb[30].mxu1 }
 0xd4e   :  { %v2569_v0 = vadd.f32 %v7370_v63, %v6648_v62  ;;  %v2563_v1 = vpop.f32.mrb[31].mxu1  ;;  %v3033_v63 = vld [vmem:[%s9319_s18 + $0x8] sm:$0xff] }
 0xd4f   :  { %v2564_v2 = vadd.f32 %v6648_v62, %v2563_v1  ;;  %v3034_v1 = vld [vmem:[%s9319_s18 + $0x10] sm:$0xff] }
 0xd51   :  { %7382 = vmatpush3.msra.mxu1 %v2564_v2  ;;  %v3035_v2 = vld [vmem:[%s9319_s18 + $0x18] sm:$0xff] }
 0xe1b   :  { %v7359_v4 = vpop.f32.mrb[18].mxu0 }
 0xe1c   :  { %v2475_v5 = vpop.f32.mrb[19].mxu0  ;;  %v2481_v9 = vadd.f32 %v7359_v4, %v6640_v3 }
 0xe1d   :  { %v2476_v7 = vadd.f32 %v6640_v3, %v2475_v5  ;;  %v7842_v3 = vpack.c.bf16 %v3035_v2, %v3034_v1 }
 0xe1f   :  { %7372 = vmatpush3.xpose.msk.msra.mxu0 %vm569_vm8, %v2476_v7 }
 0xe20   :  { %7376 = vmatprep.subr.mxu0 %v8145_v50 }
 0xe22   :  { %7374 = vmatmul.mubr.msk.f32.vlgmr.msra.gmra.mrb[20].mxu0 %vm569_vm8, %v2388_v8 }
 0xe23   :  { %7377 = vmatpush3.xpose.msk.msra.mxu0 %vm569_vm8, %v2481_v9  ;;  %7378 = vmatprep.mubr.msk.f32.mxu0 %vm8146_vm7, %v8145_v50 }
 0xe24   :  { %7386 = vmatprep.subr.mxu0 %v8145_v50 }
 0xe26   :  { %7379 = vmatmul.mubr.msk.f32.vlgmr.msra.gmra.mrb[22].mxu0 %vm569_vm8, %v2393_v10 }
 0xe27   :  { %7387 = vmatpush3.msra.mxu0 %v2569_v0  ;;  %7388 = vmatprep.mubr.msk.f32.mxu0 %vm8146_vm7, %v8145_v50 }
 0xe28   :  { %7391 = vmatprep.subr.mxu0 %v6657_v36 }
 0xef5   :  { %v2644_v11 = vpop.f32.mrb[20].mxu0 }
 0xef6   :  { %v2645_v12 = vadd.f32 %v2644_v11, %v8350_v38  ;;  %v7375_v13 = vpop.f32.mrb[21].mxu0  ;;  %v6661_v11 = vld [vmem:[%s9317_s16] ss:$0 sm:$0xff] }
 0xef8   :  { %v2724_v14 = vsel %vm569_vm8, %v2645_v12, -inf }
 0xef9   :  { %2725 = vmax.xlane.f32.xlu1 %v2724_v14  ;;  %v2720_v15 = vpop.f32.mrb[22].mxu0 }
 0xefa   :  { %v2721_v16 = vadd.f32 %v2720_v15, %v8352_v39  ;;  %v7380_v17 = vpop.f32.mrb[23].mxu0  ;;  %v6662_v15 = vld [vmem:[%s9318_s17] ss:$0 sm:$0xff] }
 0xefc   :  { %v2727_v18 = vsel %vm569_vm8, %v2721_v16, -inf }
 0xefd   :  { %2728 = vmax.xlane.f32.xlu0 %v2727_v18 }
 0xf86   :  { %v2726_v19 = vpop.xlane.xlu1 %2725 }
 0xf87   :  { %v2730_v20 = vsub.f32 %v2645_v12, %v2726_v19 }
 0xf89   :  { %v2732_v21 = vmul.f32 1.442695, %v2730_v20  ;;  %v3178_v20 = vld [vmem:[%s9321_s20] sm:$0xff] }
 0xf8a   :  { %v2729_v22 = vpop.xlane.xlu0 %2728 }
 0xf8b   :  { %8044 = vpow2.f32 %v2732_v21  ;;  %v2731_v23 = vsub.f32 %v2721_v16, %v2729_v22  ;;  %v3179_v21 = vld [vmem:[%s9321_s20 + $0x8] sm:$0xff] }
 0xf8c   :  { %v7846_v22 = vpack.c.bf16 %v3179_v21, %v3178_v20 }
 0xf8d   :  { %v2734_v24 = vmul.f32 1.442695, %v2731_v23  ;;  %v3180_v23 = vld [vmem:[%s9321_s20 + $0x10] sm:$0xff] }
 0xf8f   :  { %8046 = vpow2.f32 %v2734_v24  ;;  %v3181_v24 = vld [vmem:[%s9321_s20 + $0x18] sm:$0xff] }
 0xf95   :  { %v8045_v25 = vpop.eup %8044 }
 0xf96   :  { %v2736_v26 = vsel %vm569_vm8, %v8045_v25, 0.0 }
 0xf97   :  { %2737 = vadd.xlane.f32.xlu1 %v2736_v26  ;;  %v3182_v26 = vld [vmem:[%s9321_s20 + $0x20] sm:$0xff] }
 0xf99   :  { %v8047_v27 = vpop.eup %8046 }
 0xf9a   :  { %v2739_v28 = vsel %vm569_vm8, %v8047_v27, 0.0 }
 0xf9b   :  { %2740 = vadd.xlane.f32.xlu0 %v2739_v28 }
0x1024   :  { %v2738_v29 = vpop.xlane.xlu1 %2737 }
0x1025   :  { %8048 = vrcp.f32 %v2738_v29  ;;  %v3184_v29 = vld [vmem:[%s9321_s20 + $0x30] sm:$0xff] }
0x1028   :  { %v2741_v30 = vpop.xlane.xlu0 %2740 }
0x1029   :  { %8050 = vrcp.f32 %v2741_v30  ;;  %v3185_v30 = vld [vmem:[%s9321_s20 + $0x38] sm:$0xff] }
0x102f   :  { %v8049_v31 = vpop.eup %8048 }
0x1030   :  { %v2744_v32 = vmul.f32 %v8049_v31, %v8045_v25  ;;  %v7850_v25 = vpack.c.bf16 %v3181_v24, %v3180_v23  ;;  %v7858_v31 = vpack.c.bf16 %v3185_v30, %v3184_v29  ;;  %v6666_v29 = vld [vmem:[%s9322_s21] ss:$0 sm:$0xff] }
0x1032   :  { %7384 = vmatmul.mubr.msk.f32.vlgmr.msra.gmra.mrb[32].mxu1 %vm569_vm8, %v2744_v32  ;;  %v6663_v32 = vld [vmem:[%s9320_s19] ss:$0 sm:$0xff] }
0x1033   :  { %v8051_v33 = vpop.eup %8050 }
0x1034   :  { %v2745_v34 = vmul.f32 %v8051_v33, %v8047_v27  ;;  %v3183_v27 = vld [vmem:[%s9321_s20 + $0x28] sm:$0xff] }
0x1035   :  { %v7854_v28 = vpack.c.bf16 %v3183_v27, %v3182_v26 }
0x1036   :  { %7389 = vmatmul.mubr.msk.f32.vlgmr.msra.gmra.mrb[24].mxu0 %vm569_vm8, %v2745_v34 }
0x1037   :  { %7392 = vmatpush3.msra.mxu0 %v6657_v36 }
0x1038   :  { %7847 = vmatprep.subr.bf16.mxu0 %v7846_v22 }
0x1105   :  { %v2815_v37 = vpop.f32.mrb[32].mxu1 }
0x1106   :  { %v7385_v40 = vpop.f32.mrb[33].mxu1  ;;  %7393 = vmatprep.mubr.msk.f32.mxu0 %vm569_vm8, %v2815_v37 }
0x1109   :  { %v2888_v41 = vpop.f32.mrb[24].mxu0 }
0x110a   :  { %v7390_v43 = vpop.f32.mrb[25].mxu0  ;;  %7394 = vmatmul.mubr.msk.f32.vlgmr.msra.gmra.mrb[10].mxu0 %vm569_vm8, %v2888_v41 }
0x110b   :  { %7849 = vmatpush3.bf16.msra.mxu0 %v7846_v22 }
0x110c   :  { %7851 = vmatprep.subr.bf16.mxu0 %v7850_v25 }
0x110f   :  { %7853 = vmatpush3.bf16.msra.mxu0 %v7850_v25 }
0x1110   :  { %7855 = vmatprep.subr.bf16.mxu0 %v7854_v28 }
0x1113   :  { %7857 = vmatpush3.bf16.msra.mxu0 %v7854_v28 }
0x1114   :  { %7859 = vmatprep.subr.bf16.mxu0 %v7858_v31 }
0x1117   :  { %7861 = vmatpush3.bf16.msra.mxu0 %v7858_v31 }
0x11dd   :  { %v7395_v45 = vpop.f32.mrb[10].mxu0 }
0x11de   :  { %v2985_v46 = vadd.f32 %v7395_v45, %v6660_v44  ;;  %v2966_v47 = vpop.f32.mrb[11].mxu0 }
0x11df   :  { %v2984_v49 = vadd.f32 %v6660_v44, %v2966_v47 }
0x11e0   :  { %v2987_v52 = vadd.f32 %v2985_v46, %v8411_v42 }
0x11e1   :  { %v2986_v53 = vadd.f32 %v2984_v49, %v8401_v35  ;;  %v3032_v35 = vld [vmem:[%s9319_s18] sm:$0xff] }
0x11e2   :  { %v2993_v54 = vsel %vm225_vm6, %v2987_v52, 0.0  ;;  %v7838_v0 = vpack.c.bf16 %v3033_v63, %v3032_v35 }
0x11e3   :  { %2994 = vadd.xlane.f32.xlu0 %v2993_v54  ;;  %v2990_v55 = vsel %vm225_vm6, %v2986_v53, 0.0 }
0x11e4   :  { %2991 = vadd.xlane.f32.xlu1 %v2990_v55  ;;  %7839 = vmatprep.subr.bf16.mxu1 %v7838_v0 }
0x11e5   :  { %7841 = vmatpush3.bf16.msra.mxu1 %v7838_v0 }
0x11e6   :  { %7843 = vmatprep.subr.bf16.mxu1 %v7842_v3 }
0x11e9   :  { %7845 = vmatpush3.bf16.msra.mxu1 %v7842_v3 }
0x1270   :  { %v2995_v56 = vpop.xlane.xlu0 %2994 }
0x1271   :  { %v2997_v57 = vmul.f32 0.03125, %v2995_v56  ;;  %v2992_v58 = vpop.xlane.xlu1 %2991 }
0x1272   :  { %v2996_v59 = vmul.f32 0.03125, %v2992_v58 }
0x1273   :  { %v2999_v60 = vsub.f32 %v2987_v52, %v2997_v57 }
0x1274   :  { %v2998_v48 = vsub.f32 %v2986_v53, %v2996_v59 }
0x1275   :  { %v3001_v61 = vmul.f32 %v2999_v60, %v2999_v60 }
0x1276   :  { %v3000_v51 = vmul.f32 %v2998_v48, %v2998_v48 }
0x1277   :  { %v3005_v62 = vsel %vm225_vm6, %v3001_v61, 0.0 }
0x1278   :  { %3006 = vadd.xlane.f32.xlu0 %v3005_v62  ;;  %v3002_v42 = vsel %vm225_vm6, %v3000_v51, 0.0 }
0x1279   :  { %3003 = vadd.xlane.f32.xlu1 %v3002_v42 }
0x1305   :  { %v3007_v4 = vpop.xlane.xlu0 %3006 }
0x1306   :  { %v3009_v5 = vmul.f32 0.03125, %v3007_v4  ;;  %v3004_v6 = vpop.xlane.xlu1 %3003 }
0x1307   :  { %v3008_v7 = vmul.f32 0.03125, %v3004_v6 }
0x1308   :  { %v3011_v8 = vadd.f32 1e-12, %v3009_v5 }
0x1309   :  { %v3010_v9 = vadd.f32 1e-12, %v3008_v7 }
0x130a   :  { %8052 = vrsqrt.f32 %v3011_v8 }
0x130b   :  { %8054 = vrsqrt.f32 %v3010_v9 }
0x1314   :  { %v8053_v10 = vpop.eup %8052 }
0x1315   :  { %v8055_v12 = vpop.eup %8054  ;;  %v3015_v13 = vmul.f32 %v8053_v10, %v2999_v60 }
0x1316   :  { %v3014_v14 = vmul.f32 %v8055_v12, %v2998_v48 }
0x1317   :  { %v3023_v16 = vmul.f32 %v6661_v11, %v3015_v13 }
0x1318   :  { %v3022_v17 = vmul.f32 %v6661_v11, %v3014_v14 }
0x1319   :  { %v8766_v19 = vadd.f32 %v6662_v15, %v3023_v16 }
0x131a   :  { %v8764_v18 = vadd.f32 %v6662_v15, %v3022_v17  ;;  %v8147_v15 = vmov -1.0  }
0x131c   :  { %7404 = vmatprep.mubr.msk.f32.mxu1 %vm225_vm6, %v8764_v18 }
0x131d   :  { %7405 = vmatmul.mubr.msk.f32.vlgmr.msra.gmra.mrb[34].mxu1 %vm225_vm6, %v8766_v19 }
0x13f0   :  { %v7406_v33 = vpop.f32.mrb[34].mxu1 }
0x13f1   :  { %v3121_v34 = vadd.f32 %v7406_v33, %v6663_v32  ;;  %v3115_v36 = vpop.f32.mrb[35].mxu1 }
0x13f2   :  { %v3116_v37 = vadd.f32 %v6663_v32, %v3115_v36 }
0x13f3   :  { %v3127_v40 = vmul.f32 0.70710677, %v3121_v34  ;;  %v3125_v26 = vmul.f32 0.5, %v3121_v34 }
0x13f4   :  { %v3126_v41 = vmul.f32 0.70710677, %v3116_v37  ;;  %v3124_v24 = vmul.f32 0.5, %v3116_v37 }
0x13f5   :  { %v3133_v43 = vand.u32 2147483647, %v3127_v40  ;;  %vm3129_vm9 = vcmp.ge.f32.partialorder %v3127_v40, 0.0 }
0x13f6   :  { %v3132_v44 = vand.u32 2147483647, %v3126_v41  ;;  %vm3128_vm10 = vcmp.ge.f32.partialorder %v3126_v41, 0.0  ;;  %v3131_v16 = vsel %vm3129_vm9, 1.0, %v8147_v15 }
0x13f7   :  { %v3135_v45 = vmul.f32 0.3275911, %v3133_v43  ;;  %v3161_v52 = vsub.f32 0.0, %v3133_v43  ;;  %v3130_v21 = vsel %vm3128_vm10, 1.0, %v8147_v15 }
0x13f8   :  { %v3134_v46 = vmul.f32 0.3275911, %v3132_v44  ;;  %v3160_v53 = vsub.f32 0.0, %v3132_v44 }
0x13f9   :  { %v3137_v47 = vadd.f32 1.0, %v3135_v45  ;;  %v3163_v55 = vmul.f32 %v3161_v52, %v3133_v43 }
0x13fa   :  { %v3136_v49 = vadd.f32 1.0, %v3134_v46  ;;  %v3162_v58 = vmul.f32 %v3160_v53, %v3132_v44 }
0x13fb   :  { %8056 = vrcp.f32 %v3137_v47  ;;  %v3166_v48 = vmul.f32 1.442695, %v3163_v55 }
0x13fc   :  { %8058 = vrcp.f32 %v3136_v49  ;;  %v3164_v62 = vmul.f32 1.442695, %v3162_v58 }
0x13fd   :  { %8060 = vpow2.f32 %v3166_v48 }
0x13fe   :  { %8062 = vpow2.f32 %v3164_v62 }
0x1405   :  { %v8057_v54 = vpop.eup %8056 }
0x1406   :  { %v8059_v56 = vpop.eup %8058  ;;  %v3143_v57 = vmul.f32 1.0614054, %v8057_v54 }
0x1407   :  { %v3142_v59 = vmul.f32 1.0614054, %v8059_v56  ;;  %v8061_v9 = vpop.eup %8060 }
0x1408   :  { %v3145_v60 = vadd.f32 -1.4531521, %v3143_v57  ;;  %v8063_v11 = vpop.eup %8062  ;;  %v6688_v57 = vld [vmem:[%s9363_s23 + $0x88] sm:$0xff] }
0x1409   :  { %v3144_v61 = vadd.f32 -1.4531521, %v3142_v59  ;;  %v6673_v59 = vld [vmem:[%s9359_s0 + $0x90] sm:$0xff] }
0x140a   :  { %v3147_v51 = vmul.f32 %v8057_v54, %v3145_v60  ;;  %v6674_v60 = vld [vmem:[%s9359_s0 + $0x98] sm:$0xff] }
0x140b   :  { %v3146_v42 = vmul.f32 %v8059_v56, %v3144_v61  ;;  %v7866_v48 = vpack.c.bf16 %v6674_v60, %v6673_v59  ;;  %v6689_v61 = vld [vmem:[%s9363_s23 + $0x90] sm:$0xff]  ;;  %v6702_v60 = vld [vmem:[%s9359_s0 + $0xa0] sm:$0xff] }
0x140c   :  { %v3149_v35 = vadd.f32 1.4214138, %v3147_v51  ;;  %v6690_v51 = vld [vmem:[%s9363_s23 + $0x98] sm:$0xff] }
0x140d   :  { %v3148_v63 = vadd.f32 1.4214138, %v3146_v42  ;;  %v7882_v62 = vpack.c.bf16 %v6690_v51, %v6689_v61  ;;  %v6679_v42 = vld [vmem:[%s9360_s5 + $0x80] sm:$0xff] }
0x140e   :  { %v3151_v0 = vmul.f32 %v8057_v54, %v3149_v35  ;;  %v6680_v35 = vld [vmem:[%s9360_s5 + $0x88] sm:$0xff]  ;;  %v6710_v51 = vld [vmem:[%s9360_s5 + $0xa0] sm:$0xff] }
0x140f   :  { %v3150_v1 = vmul.f32 %v8059_v56, %v3148_v63  ;;  %v7870_v63 = vpack.c.bf16 %v6680_v35, %v6679_v42 }
0x1410   :  { %v3153_v2 = vadd.f32 -0.28449672, %v3151_v0 }
0x1411   :  { %v3152_v3 = vadd.f32 -0.28449672, %v3150_v1 }
0x1412   :  { %v3155_v4 = vmul.f32 %v8057_v54, %v3153_v2 }
0x1413   :  { %v3154_v5 = vmul.f32 %v8059_v56, %v3152_v3 }
0x1414   :  { %v3157_v6 = vadd.f32 0.2548296, %v3155_v4 }
0x1415   :  { %v3156_v7 = vadd.f32 0.2548296, %v3154_v5 }
0x1416   :  { %v3159_v8 = vmul.f32 %v8057_v54, %v3157_v6  ;;  %v6672_v54 = vld [vmem:[%s9359_s0 + $0x88] sm:$0xff] }
0x1417   :  { %v3158_v10 = vmul.f32 %v8059_v56, %v3156_v7  ;;  %v6687_v56 = vld [vmem:[%s9363_s23 + $0x80] sm:$0xff] }
0x1418   :  { %v3169_v12 = vmul.f32 %v8061_v9, %v3159_v8  ;;  %v7878_v58 = vpack.c.bf16 %v6688_v57, %v6687_v56  ;;  %v6669_v7 = vld [vmem:[%s9323_s22] ss:$0 sm:$0xff] }
0x1419   :  { %v3168_v13 = vmul.f32 %v8063_v11, %v3158_v10  ;;  %v6670_v11 = vld [vmem:[%s9366_s6] ss:$0 sm:$0xff] }
0x141a   :  { %v3171_v14 = vsub.f32 1.0, %v3169_v12  ;;  %7879 = vmatprep.subr.bf16.mxu0 %v7878_v58 }
0x141b   :  { %v3170_v17 = vsub.f32 1.0, %v3168_v13 }
0x141c   :  { %v3173_v20 = vmul.f32 %v3171_v14, %v3131_v16  ;;  %v6681_v14 = vld [vmem:[%s9360_s5 + $0x90] sm:$0xff]  ;;  %v6682_v16 = vld [vmem:[%s9360_s5 + $0x98] sm:$0xff] }
0x141d   :  { %v3172_v22 = vmul.f32 %v3170_v17, %v3130_v21  ;;  %v7874_v21 = vpack.c.bf16 %v6682_v16, %v6681_v14  ;;  %v6721_v14 = vld [vmem:[%s9363_s23 + $0xb8] sm:$0xff] }
0x141e   :  { %v3175_v23 = vadd.f32 1.0, %v3173_v20 }
0x141f   :  { %v3174_v25 = vadd.f32 1.0, %v3172_v22  ;;  %v6692_v22 = vld [vmem:[%s9314_s13 + $0x4] ss:$0 sm:$0xff] }
0x1420   :  { %v3177_v28 = vmul.f32 %v3175_v23, %v3125_v26 }
0x1421   :  { %v3176_v27 = vmul.f32 %v3174_v25, %v3124_v24 }
0x1423   :  { %7423 = vmatprep.mubr.msk.f32.mxu0 %vm3193_vm11, %v3176_v27 }
0x1424   :  { %7424 = vmatmul.mubr.msk.f32.vlgmr.msra.gmra.mrb[26].mxu0 %vm3193_vm11, %v3177_v28  ;;  %v6684_v28 = vld [vmem:[%s9364_s7 + $0x4] ss:$0 sm:$0xff] }
0x1425   :  { %7881 = vmatpush3.bf16.msra.mxu0 %v7878_v58 }
0x1426   :  { %7883 = vmatprep.subr.bf16.mxu0 %v7882_v62 }
0x1429   :  { %7885 = vmatpush3.bf16.msra.mxu0 %v7882_v62  ;;  %v6711_v62 = vld [vmem:[%s9360_s5 + $0xa8] sm:$0xff] }
0x142a   :  { %7469 = vmatprep.subr.mxu0 %v8145_v50  ;;  %v7894_v42 = vpack.c.bf16 %v6711_v62, %v6710_v51  ;;  %v6737_v51 = vld [vmem:[%s9359_s0 + $0xc0] sm:$0xff]  ;;  %v6738_v62 = vld [vmem:[%s9359_s0 + $0xc8] sm:$0xff] }
0x14f7   :  { %v7425_v30 = vpop.f32.mrb[26].mxu0 }
0x14f8   :  { %v3272_v31 = vadd.f32 %v7425_v30, %v6666_v29  ;;  %v3266_v32 = vpop.f32.mrb[27].mxu0 }
0x14f9   :  { %v3267_v33 = vadd.f32 %v6666_v29, %v3266_v32 }
0x14fa   :  { %v3276_v36 = vadd.f32 %v3272_v31, %v8766_v19  ;;  %v6676_v31 = vld [vmem:[%s9365_s4 + $0x4] ss:$0 sm:$0xff] }
0x14fb   :  { %v3275_v37 = vadd.f32 %v3267_v33, %v8764_v18  ;;  %v6671_v18 = vld [vmem:[%s9359_s0 + $0x80] sm:$0xff] }
0x14fc   :  { %v3282_v34 = vsel %vm225_vm6, %v3276_v36, 0.0  ;;  %v7862_v55 = vpack.c.bf16 %v6672_v54, %v6671_v18 }
0x14fd   :  { %3283 = vadd.xlane.f32.xlu0 %v3282_v34  ;;  %v3279_v40 = vsel %vm225_vm6, %v3275_v37, 0.0 }
0x14fe   :  { %3280 = vadd.xlane.f32.xlu1 %v3279_v40  ;;  %7863 = vmatprep.subr.bf16.mxu1 %v7862_v55 }
0x14ff   :  { %7865 = vmatpush3.bf16.msra.mxu1 %v7862_v55 }
0x1500   :  { %7867 = vmatprep.subr.bf16.mxu1 %v7866_v48 }
0x1503   :  { %7869 = vmatpush3.bf16.msra.mxu1 %v7866_v48  ;;  %v6703_v48 = vld [vmem:[%s9359_s0 + $0xa8] sm:$0xff] }
0x1504   :  { %7871 = vmatprep.subr.bf16.mxu1 %v7870_v63  ;;  %v7886_v61 = vpack.c.bf16 %v6703_v48, %v6702_v60 }
0x158a   :  { %v3284_v41 = vpop.xlane.xlu0 %3283 }
0x158b   :  { %v3286_v43 = vmul.f32 0.03125, %v3284_v41  ;;  %v3281_v44 = vpop.xlane.xlu1 %3280 }
0x158c   :  { %v3285_v45 = vmul.f32 0.03125, %v3281_v44 }
0x158d   :  { %v3288_v46 = vsub.f32 %v3276_v36, %v3286_v43 }
0x158e   :  { %v3287_v47 = vsub.f32 %v3275_v37, %v3285_v45 }
0x158f   :  { %v3290_v49 = vmul.f32 %v3288_v46, %v3288_v46 }
0x1590   :  { %v3289_v52 = vmul.f32 %v3287_v47, %v3287_v47 }
0x1591   :  { %v3294_v53 = vsel %vm225_vm6, %v3290_v49, 0.0 }
0x1592   :  { %3295 = vadd.xlane.f32.xlu0 %v3294_v53  ;;  %v3291_v19 = vsel %vm225_vm6, %v3289_v52, 0.0 }
0x1593   :  { %3292 = vadd.xlane.f32.xlu1 %v3291_v19 }
0x161f   :  { %v3296_v0 = vpop.xlane.xlu0 %3295 }
0x1620   :  { %v3298_v1 = vmul.f32 0.03125, %v3296_v0  ;;  %v3293_v2 = vpop.xlane.xlu1 %3292  ;;  %v6704_v0 = vld [vmem:[%s9359_s0 + $0xb0] sm:$0xff] }
0x1621   :  { %v3297_v3 = vmul.f32 0.03125, %v3293_v2 }
0x1622   :  { %v3300_v4 = vadd.f32 1e-12, %v3298_v1  ;;  %v6705_v1 = vld [vmem:[%s9359_s0 + $0xb8] sm:$0xff] }
0x1623   :  { %v3299_v5 = vadd.f32 1e-12, %v3297_v3 }
0x1624   :  { %8064 = vrsqrt.f32 %v3300_v4  ;;  %v7890_v4 = vpack.c.bf16 %v6705_v1, %v6704_v0 }
0x1625   :  { %8066 = vrsqrt.f32 %v3299_v5  ;;  %v6712_v5 = vld [vmem:[%s9360_s5 + $0xb0] sm:$0xff] }
0x162e   :  { %v8065_v6 = vpop.eup %8064 }
0x162f   :  { %v8067_v8 = vpop.eup %8066  ;;  %v3304_v9 = vmul.f32 %v8065_v6, %v3288_v46  ;;  %v6713_v6 = vld [vmem:[%s9360_s5 + $0xb8] sm:$0xff] }
0x1630   :  { %v3303_v10 = vmul.f32 %v8067_v8, %v3287_v47  ;;  %v6719_v8 = vld [vmem:[%s9363_s23 + $0xa8] sm:$0xff] }
0x1631   :  { %v3312_v12 = vmul.f32 %v6669_v7, %v3304_v9 }
0x1632   :  { %v3311_v13 = vmul.f32 %v6669_v7, %v3303_v10  ;;  %v6718_v7 = vld [vmem:[%s9363_s23 + $0xa0] sm:$0xff] }
0x1633   :  { %v8857_v20 = vadd.f32 %v6670_v11, %v3312_v12  ;;  %v7902_v12 = vpack.c.bf16 %v6719_v8, %v6718_v7  ;;  %v6753_v7 = vld [vmem:[%s9363_s23 + $0xc0] sm:$0xff]  ;;  %v6754_v8 = vld [vmem:[%s9363_s23 + $0xc8] sm:$0xff] }
0x1634   :  { %v8855_v17 = vadd.f32 %v6670_v11, %v3311_v13  ;;  %v7898_v11 = vpack.c.bf16 %v6713_v6, %v6712_v5  ;;  %v6720_v13 = vld [vmem:[%s9363_s23 + $0xb0] sm:$0xff] }
0x1635   :  { %v7906_v16 = vpack.c.bf16 %v6721_v14, %v6720_v13  ;;  %v6732_v13 = vld [vmem:[%s9315_s14 + $0x28] sm:$0xff]  ;;  %v6701_v14 = vld [vmem:[%s9315_s14 + $0x20] sm:$0xff] }
0x1636   :  { %7434 = vmatprep.mubr.msk.f32.mxu1 %vm225_vm6, %v8855_v17  ;;  %7456 = vmatprep.mubr.msk.f32.mxu0 %vm225_vm6, %v8855_v17 }
0x1637   :  { %7435 = vmatmul.mubr.msk.f32.vlgmr.msra.gmra.mrb[36].mxu1 %vm225_vm6, %v8857_v20  ;;  %7457 = vmatmul.mubr.msk.f32.vlgmr.msra.gmra.mrb[28].mxu0 %vm225_vm6, %v8857_v20 }
0x1638   :  { %7873 = vmatpush3.bf16.msra.mxu1 %v7870_v63  ;;  %7445 = vmatprep.mubr.msk.f32.mxu1 %vm225_vm6, %v8855_v17 }
0x1639   :  { %7875 = vmatprep.subr.bf16.mxu1 %v7874_v21  ;;  %7471 = vmatprep.mubr.msk.f32.mxu0 %vm8146_vm7, %v8145_v50 }
0x163c   :  { %7877 = vmatpush3.bf16.msra.mxu1 %v7874_v21 }
0x163d   :  { %7459 = vmatprep.subr.mxu1 %v8145_v50 }
0x163f   :  { %7446 = vmatmul.mubr.msk.f32.vlgmr.msra.gmra.mrb[38].mxu1 %vm225_vm6, %v8857_v20 }
0x1640   :  { %7461 = vmatprep.mubr.msk.f32.mxu1 %vm8146_vm7, %v8145_v50 }
0x170a   :  { %v7436_v23 = vpop.f32.mrb[36].mxu1  ;;  %v7458_v24 = vpop.f32.mrb[28].mxu0 }
0x170b   :  { %v3406_v25 = vpop.f32.mrb[37].mxu1  ;;  %v3582_v26 = vpop.f32.mrb[29].mxu0  ;;  %v3412_v37 = vadd.f32 %v7436_v23, %v6676_v31  ;;  %v3588_v34 = vadd.f32 %v7458_v24, %v6692_v22 }
0x170c   :  { %v3583_v27 = vadd.f32 %v6692_v22, %v3582_v26  ;;  %v3407_v33 = vadd.f32 %v6676_v31, %v3406_v25 }
0x170e   :  { %7470 = vmatpush3.msra.mxu0 %v3583_v27  ;;  %v6715_v27 = vld [vmem:[%s9364_s7 + $0x5] ss:$0 sm:$0xff] }
0x170f   :  { %7887 = vmatprep.subr.bf16.mxu0 %v7886_v61 }
0x1712   :  { %v7447_v29 = vpop.f32.mrb[38].mxu1 }
0x1713   :  { %v3494_v30 = vpop.f32.mrb[39].mxu1  ;;  %v3500_v36 = vadd.f32 %v7447_v29, %v6684_v28 }
0x1714   :  { %v3495_v32 = vadd.f32 %v6684_v28, %v3494_v30  ;;  %v6707_v30 = vld [vmem:[%s9365_s4 + $0x5] ss:$0 sm:$0xff] }
0x1716   :  { %7460 = vmatpush3.xpose.msk.msra.mxu1 %vm569_vm8, %v3495_v32  ;;  %v6723_v32 = vld [vmem:[%s9314_s13 + $0x5] ss:$0 sm:$0xff] }
0x1717   :  { %7464 = vmatprep.subr.mxu1 %v8145_v50 }
0x1719   :  { %7462 = vmatmul.mubr.msk.f32.vlgmr.msra.gmra.mrb[40].mxu1 %vm569_vm8, %v3407_v33 }
0x171a   :  { %7465 = vmatpush3.xpose.msk.msra.mxu1 %vm569_vm8, %v3500_v36  ;;  %7466 = vmatprep.mubr.msk.f32.mxu1 %vm8146_vm7, %v8145_v50 }
0x171b   :  { %7474 = vmatprep.subr.mxu1 %v8145_v50 }
0x171d   :  { %7467 = vmatmul.mubr.msk.f32.vlgmr.msra.gmra.mrb[42].mxu1 %vm569_vm8, %v3412_v37 }
0x171e   :  { %7475 = vmatpush3.msra.mxu1 %v3588_v34  ;;  %7476 = vmatprep.mubr.msk.f32.mxu1 %vm8146_vm7, %v8145_v50 }
0x171f   :  { %7895 = vmatprep.subr.bf16.mxu1 %v7894_v42 }
0x17ec   :  { %v3663_v40 = vpop.f32.mrb[40].mxu1 }
0x17ed   :  { %v3664_v41 = vadd.f32 %v3663_v40, %v8350_v38  ;;  %v7463_v43 = vpop.f32.mrb[41].mxu1 }
0x17ef   :  { %v3743_v44 = vsel %vm569_vm8, %v3664_v41, -inf }
0x17f0   :  { %3744 = vmax.xlane.f32.xlu0 %v3743_v44  ;;  %v3739_v45 = vpop.f32.mrb[42].mxu1 }
0x17f1   :  { %v3740_v46 = vadd.f32 %v3739_v45, %v8352_v39  ;;  %v7468_v47 = vpop.f32.mrb[43].mxu1 }
0x17f3   :  { %v3746_v49 = vsel %vm569_vm8, %v3740_v46, -inf }
0x17f4   :  { %3747 = vmax.xlane.f32.xlu1 %v3746_v49 }
0x187d   :  { %v3745_v52 = vpop.xlane.xlu0 %3744 }
0x187e   :  { %v3749_v53 = vsub.f32 %v3664_v41, %v3745_v52 }
0x1880   :  { %v3751_v19 = vmul.f32 1.442695, %v3749_v53 }
0x1881   :  { %v3748_v18 = vpop.xlane.xlu1 %3747 }
0x1882   :  { %8068 = vpow2.f32 %v3751_v19  ;;  %v3750_v54 = vsub.f32 %v3740_v46, %v3748_v18 }
0x1884   :  { %v3753_v55 = vmul.f32 1.442695, %v3750_v54 }
0x1886   :  { %8070 = vpow2.f32 %v3753_v55 }
0x188c   :  { %v8069_v56 = vpop.eup %8068 }
0x188d   :  { %v3755_v57 = vsel %vm569_vm8, %v8069_v56, 0.0 }
0x188e   :  { %3756 = vadd.xlane.f32.xlu0 %v3755_v57 }
0x1890   :  { %v8071_v58 = vpop.eup %8070 }
0x1891   :  { %v3758_v59 = vsel %vm569_vm8, %v8071_v58, 0.0 }
0x1892   :  { %3759 = vadd.xlane.f32.xlu1 %v3758_v59 }
0x191b   :  { %v3757_v35 = vpop.xlane.xlu0 %3756 }
0x191c   :  { %8072 = vrcp.f32 %v3757_v35 }
0x191f   :  { %v3760_v63 = vpop.xlane.xlu1 %3759 }
0x1920   :  { %8074 = vrcp.f32 %v3760_v63 }
0x1926   :  { %v8073_v2 = vpop.eup %8072 }
0x1927   :  { %v3763_v3 = vmul.f32 %v8073_v2, %v8069_v56  ;;  %v6739_v2 = vld [vmem:[%s9359_s0 + $0xd0] sm:$0xff] }
0x1929   :  { %7472 = vmatmul.mubr.msk.f32.vlgmr.msra.gmra.mrb[30].mxu0 %vm569_vm8, %v3763_v3  ;;  %v6740_v3 = vld [vmem:[%s9359_s0 + $0xd8] sm:$0xff] }
0x192a   :  { %v8075_v9 = vpop.eup %8074  ;;  %7889 = vmatpush3.bf16.msra.mxu0 %v7886_v61  ;;  %7487 = vmatprep.mubr.msk.f32.mxu0 %vm225_vm6, %v8855_v17  ;;  %v7914_v6 = vpack.c.bf16 %v6740_v3, %v6739_v2  ;;  %v6767_v3 = vld [vmem:[%s9315_s14 + $0x30] sm:$0xff] }
0x192b   :  { %v3764_v10 = vmul.f32 %v8075_v9, %v8071_v58  ;;  %7891 = vmatprep.subr.bf16.mxu0 %v7890_v4  ;;  %v7926_v9 = vpack.c.bf16 %v6754_v8, %v6753_v7  ;;  %v6773_v7 = vld [vmem:[%s9359_s0 + $0xf8] sm:$0xff] }
0x192d   :  { %7477 = vmatmul.mubr.msk.f32.vlgmr.msra.gmra.mrb[44].mxu1 %vm569_vm8, %v3764_v10  ;;  %v6755_v10 = vld [vmem:[%s9363_s23 + $0xd0] sm:$0xff] }
0x192e   :  { %7893 = vmatpush3.bf16.msra.mxu0 %v7890_v4  ;;  %7897 = vmatpush3.bf16.msra.mxu1 %v7894_v42  ;;  %v7910_v42 = vpack.c.bf16 %v6738_v62, %v6737_v51 }
0x192f   :  { %7498 = vmatprep.mubr.msk.f32.mxu1 %vm225_vm6, %v8855_v17  ;;  %7899 = vmatprep.subr.bf16.mxu1 %v7898_v11 }
0x1930   :  { %7903 = vmatprep.subr.bf16.mxu0 %v7902_v12 }
0x1931   :  { %7488 = vmatmul.mubr.msk.f32.vlgmr.msra.gmra.mrb[32].mxu0 %vm225_vm6, %v8857_v20 }
0x1932   :  { %7901 = vmatpush3.bf16.msra.mxu1 %v7898_v11  ;;  %7905 = vmatpush3.bf16.msra.mxu0 %v7902_v12  ;;  %v6756_v11 = vld [vmem:[%s9363_s23 + $0xd8] sm:$0xff] }
0x1933   :  { %7509 = vmatprep.mubr.msk.f32.mxu0 %vm225_vm6, %v8855_v17  ;;  %7907 = vmatprep.subr.bf16.mxu0 %v7906_v16  ;;  %v7930_v12 = vpack.c.bf16 %v6756_v11, %v6755_v10 }
0x1934   :  { %7512 = vmatprep.subr.mxu1 %v8145_v50 }
0x1935   :  { %7499 = vmatmul.mubr.msk.f32.vlgmr.msra.gmra.mrb[46].mxu1 %vm225_vm6, %v8857_v20 }
0x1936   :  { %7909 = vmatpush3.bf16.msra.mxu0 %v7906_v16  ;;  %7514 = vmatprep.mubr.msk.f32.mxu1 %vm8146_vm7, %v8145_v50 }
0x1937   :  { %7522 = vmatprep.subr.mxu0 %v8145_v50 }
0x1939   :  { %7510 = vmatmul.mubr.msk.f32.vlgmr.msra.gmra.mrb[34].mxu0 %vm225_vm6, %v8857_v20 }
0x193a   :  { %7524 = vmatprep.mubr.msk.f32.mxu0 %vm8146_vm7, %v8145_v50 }
0x19fc   :  { %v8957_v21 = vpop.f32.mrb[30].mxu0 }
0x19fd   :  { %v7473_v22 = vpop.f32.mrb[31].mxu0 }
0x19fe   :  { %v6745_v22 = vld [vmem:[%s9360_s5 + $0xc0] sm:$0xff] }
0x1a00   :  { %v8959_v23 = vpop.f32.mrb[44].mxu1 }
0x1a01   :  { %v7478_v24 = vpop.f32.mrb[45].mxu1 }
0x1a02   :  { %v6746_v24 = vld [vmem:[%s9360_s5 + $0xc8] sm:$0xff] }
0x1a04   :  { %v7489_v25 = vpop.f32.mrb[32].mxu0 }
0x1a05   :  { %v3992_v26 = vpop.f32.mrb[33].mxu0  ;;  %v3998_v41 = vadd.f32 %v7489_v25, %v6707_v30 }
0x1a06   :  { %v3993_v36 = vadd.f32 %v6707_v30, %v3992_v26  ;;  %v7918_v26 = vpack.c.bf16 %v6746_v24, %v6745_v22  ;;  %v6748_v30 = vld [vmem:[%s9360_s5 + $0xd8] sm:$0xff]  ;;  %v6788_v22 = vld [vmem:[%s9363_s23 + $0xf0] sm:$0xff] }
0x1a07   :  { %v6789_v24 = vld [vmem:[%s9363_s23 + $0xf8] sm:$0xff] }
0x1a08   :  { %v7500_v28 = vpop.f32.mrb[46].mxu1 }
0x1a09   :  { %v4080_v29 = vpop.f32.mrb[47].mxu1  ;;  %v4086_v34 = vadd.f32 %v7500_v28, %v6715_v27 }
0x1a0a   :  { %v4081_v31 = vadd.f32 %v6715_v27, %v4080_v29  ;;  %v6747_v29 = vld [vmem:[%s9360_s5 + $0xd0] sm:$0xff] }
0x1a0c   :  { %v7511_v33 = vpop.f32.mrb[34].mxu0  ;;  %7513 = vmatpush3.xpose.msk.msra.mxu1 %vm569_vm8, %v4081_v31  ;;  %v7922_v31 = vpack.c.bf16 %v6748_v30, %v6747_v29  ;;  %v6780_v29 = vld [vmem:[%s9360_s5 + $0xf0] sm:$0xff]  ;;  %v6781_v30 = vld [vmem:[%s9360_s5 + $0xf8] sm:$0xff] }
0x1a0d   :  { %v4168_v37 = vpop.f32.mrb[35].mxu0  ;;  %7517 = vmatprep.subr.mxu1 %v8145_v50  ;;  %v4174_v43 = vadd.f32 %v7511_v33, %v6723_v32 }
0x1a0e   :  { %v4169_v40 = vadd.f32 %v6723_v32, %v4168_v37 }
0x1a0f   :  { %7515 = vmatmul.mubr.msk.f32.vlgmr.msra.gmra.mrb[48].mxu1 %vm569_vm8, %v3993_v36 }
0x1a10   :  { %7518 = vmatpush3.xpose.msk.msra.mxu1 %vm569_vm8, %v4086_v34  ;;  %7523 = vmatpush3.msra.mxu0 %v4169_v40  ;;  %v6742_v34 = vld [vmem:[%s9365_s4 + $0x6] ss:$0 sm:$0xff] }
0x1a11   :  { %7519 = vmatprep.mubr.msk.f32.mxu1 %vm8146_vm7, %v8145_v50  ;;  %7527 = vmatprep.subr.mxu1 %v8145_v50 }
0x1a12   :  { %7532 = vmatprep.subr.mxu0 %v6732_v13 }
0x1a13   :  { %7520 = vmatmul.mubr.msk.f32.vlgmr.msra.gmra.mrb[50].mxu1 %vm569_vm8, %v3998_v41 }
0x1a14   :  { %7528 = vmatpush3.msra.mxu1 %v4174_v43  ;;  %7529 = vmatprep.mubr.msk.f32.mxu1 %vm8146_vm7, %v8145_v50  ;;  %v6758_v43 = vld [vmem:[%s9314_s13 + $0x6] ss:$0 sm:$0xff] }
0x1a15   :  { %7911 = vmatprep.subr.bf16.mxu1 %v7910_v42 }
0x1ae2   :  { %v4249_v44 = vpop.f32.mrb[48].mxu1 }
0x1ae3   :  { %v4250_v45 = vadd.f32 %v4249_v44, %v8350_v38  ;;  %v7516_v46 = vpop.f32.mrb[49].mxu1 }
0x1ae5   :  { %v4329_v47 = vsel %vm569_vm8, %v4250_v45, -inf }
0x1ae6   :  { %4330 = vmax.xlane.f32.xlu1 %v4329_v47  ;;  %v4325_v49 = vpop.f32.mrb[50].mxu1 }
0x1ae7   :  { %v4326_v52 = vadd.f32 %v4325_v49, %v8352_v39  ;;  %v7521_v53 = vpop.f32.mrb[51].mxu1 }
0x1ae9   :  { %v4332_v19 = vsel %vm569_vm8, %v4326_v52, -inf }
0x1aea   :  { %4333 = vmax.xlane.f32.xlu0 %v4332_v19 }
0x1b73   :  { %v4331_v18 = vpop.xlane.xlu1 %4330 }
0x1b74   :  { %v4335_v54 = vsub.f32 %v4250_v45, %v4331_v18 }
0x1b76   :  { %v4337_v55 = vmul.f32 1.442695, %v4335_v54 }
0x1b77   :  { %v4334_v56 = vpop.xlane.xlu0 %4333 }
0x1b78   :  { %8076 = vpow2.f32 %v4337_v55  ;;  %v4336_v57 = vsub.f32 %v4326_v52, %v4334_v56 }
0x1b7a   :  { %v4339_v58 = vmul.f32 1.442695, %v4336_v57 }
0x1b7c   :  { %8078 = vpow2.f32 %v4339_v58 }
0x1b82   :  { %v8077_v59 = vpop.eup %8076 }
0x1b83   :  { %v4341_v60 = vsel %vm569_vm8, %v8077_v59, 0.0 }
0x1b84   :  { %4342 = vadd.xlane.f32.xlu1 %v4341_v60 }
0x1b86   :  { %v8079_v48 = vpop.eup %8078 }
0x1b87   :  { %v4344_v61 = vsel %vm569_vm8, %v8079_v48, 0.0 }
0x1b88   :  { %4345 = vadd.xlane.f32.xlu0 %v4344_v61 }
0x1c11   :  { %v4343_v35 = vpop.xlane.xlu1 %4342 }
0x1c12   :  { %8080 = vrcp.f32 %v4343_v35 }
0x1c15   :  { %v4346_v63 = vpop.xlane.xlu0 %4345 }
0x1c16   :  { %8082 = vrcp.f32 %v4346_v63 }
0x1c1c   :  { %v8081_v0 = vpop.eup %8080 }
0x1c1d   :  { %v4349_v1 = vmul.f32 %v8081_v0, %v8077_v59  ;;  %v6770_v0 = vld [vmem:[%s9359_s0 + $0xe0] sm:$0xff] }
0x1c1f   :  { %7525 = vmatmul.mubr.msk.f32.vlgmr.msra.gmra.mrb[36].mxu0 %vm569_vm8, %v4349_v1  ;;  %v6771_v1 = vld [vmem:[%s9359_s0 + $0xe8] sm:$0xff] }
0x1c20   :  { %v8083_v4 = vpop.eup %8082  ;;  %7533 = vmatpush3.msra.mxu0 %v6732_v13  ;;  %v7934_v2 = vpack.c.bf16 %v6771_v1, %v6770_v0  ;;  %v6786_v13 = vld [vmem:[%s9363_s23 + $0xe0] sm:$0xff] }
0x1c21   :  { %v4350_v5 = vmul.f32 %v8083_v4, %v8079_v48  ;;  %7537 = vmatprep.subr.mxu0 %v6701_v14 }
0x1c23   :  { %7530 = vmatmul.mubr.msk.f32.vlgmr.msra.gmra.mrb[52].mxu1 %vm569_vm8, %v4350_v5 }
0x1c24   :  { %7913 = vmatpush3.bf16.msra.mxu1 %v7910_v42  ;;  %7550 = vmatprep.mubr.msk.f32.mxu1 %vm225_vm6, %v8855_v17 }
0x1c25   :  { %7915 = vmatprep.subr.bf16.mxu1 %v7914_v6 }
0x1c28   :  { %7917 = vmatpush3.bf16.msra.mxu1 %v7914_v6  ;;  %v6772_v6 = vld [vmem:[%s9359_s0 + $0xf0] sm:$0xff] }
0x1c29   :  { %7927 = vmatprep.subr.bf16.mxu1 %v7926_v9  ;;  %v7938_v11 = vpack.c.bf16 %v6773_v7, %v6772_v6 }
0x1c2b   :  { %7551 = vmatmul.mubr.msk.f32.vlgmr.msra.gmra.mrb[54].mxu1 %vm225_vm6, %v8857_v20 }
0x1c2c   :  { %7929 = vmatpush3.bf16.msra.mxu1 %v7926_v9  ;;  %7572 = vmatprep.mubr.msk.f32.mxu1 %vm225_vm6, %v8855_v17 }
0x1c2d   :  { %7931 = vmatprep.subr.bf16.mxu1 %v7930_v12 }
0x1c30   :  { %7933 = vmatpush3.bf16.msra.mxu1 %v7930_v12 }
0x1c31   :  { %7580 = vmatprep.subr.mxu1 %v8145_v50 }
0x1c33   :  { %7573 = vmatmul.mubr.msk.f32.vlgmr.msra.gmra.mrb[56].mxu1 %vm225_vm6, %v8857_v20 }
0x1c34   :  { %7582 = vmatprep.mubr.msk.f32.mxu1 %vm8146_vm7, %v8145_v50 }
0x1cf2   :  { %v4420_v16 = vpop.f32.mrb[36].mxu0 }
0x1cf3   :  { %v7526_v25 = vpop.f32.mrb[37].mxu0  ;;  %7534 = vmatprep.mubr.msk.f32.mxu0 %vm569_vm8, %v4420_v16 }
0x1cf4   :  { %v7954_v25 = vpack.c.bf16 %v6789_v24, %v6788_v22 }
0x1cf6   :  { %v4493_v27 = vpop.f32.mrb[52].mxu1 }
0x1cf7   :  { %v7531_v28 = vpop.f32.mrb[53].mxu1  ;;  %7535 = vmatmul.mubr.msk.f32.vlgmr.msra.gmra.mrb[38].mxu0 %vm569_vm8, %v4493_v27  ;;  %v6779_v27 = vld [vmem:[%s9360_s5 + $0xe8] sm:$0xff] }
0x1cf8   :  { %7538 = vmatpush3.msra.mxu0 %v6701_v14  ;;  %7539 = vmatprep.mubr.msk.f32.mxu0 %vm569_vm8, %v8957_v21  ;;  %v6787_v14 = vld [vmem:[%s9363_s23 + $0xe8] sm:$0xff] }
0x1cf9   :  { %7919 = vmatprep.subr.bf16.mxu0 %v7918_v26  ;;  %v7950_v16 = vpack.c.bf16 %v6787_v14, %v6786_v13  ;;  %v6804_v13 = vld [vmem:[%s9316_s15 + $0x1] ss:$0 sm:$0xff] }
0x1cfe   :  { %v7552_v32 = vpop.f32.mrb[54].mxu1 }
0x1cff   :  { %v4740_v33 = vpop.f32.mrb[55].mxu1  ;;  %7540 = vmatmul.mubr.msk.f32.vlgmr.msra.gmra.mrb[38].mxu0 %vm569_vm8, %v8959_v23  ;;  %v6750_v23 = vld [vmem:[%s9364_s7 + $0x6] ss:$0 sm:$0xff]  ;;  %v4746_v45 = vadd.f32 %v7552_v32, %v6742_v34 }
0x1d00   :  { %7921 = vmatpush3.bf16.msra.mxu0 %v7918_v26  ;;  %7561 = vmatprep.mubr.msk.f32.mxu0 %vm225_vm6, %v8855_v17  ;;  %v4741_v46 = vadd.f32 %v6742_v34, %v4740_v33  ;;  %v6778_v26 = vld [vmem:[%s9360_s5 + $0xe0] sm:$0xff] }
0x1d01   :  { %7923 = vmatprep.subr.bf16.mxu0 %v7922_v31  ;;  %v7942_v28 = vpack.c.bf16 %v6779_v27, %v6778_v26  ;;  %v6791_v34 = vld [vmem:[%s9314_s13 + $0x7] ss:$0 sm:$0xff] }
0x1d04   :  { %7925 = vmatpush3.bf16.msra.mxu0 %v7922_v31 }
0x1d05   :  { %7575 = vmatprep.subr.mxu0 %v8145_v50 }
0x1d06   :  { %v7574_v21 = vpop.f32.mrb[56].mxu1 }
0x1d07   :  { %7562 = vmatmul.mubr.msk.f32.vlgmr.msra.gmra.mrb[40].mxu0 %vm225_vm6, %v8857_v20  ;;  %v4916_v36 = vpop.f32.mrb[57].mxu1  ;;  %v4922_v47 = vadd.f32 %v7574_v21, %v6758_v43  ;;  %v7946_v21 = vpack.c.bf16 %v6781_v30, %v6780_v29 }
0x1d08   :  { %7577 = vmatprep.mubr.msk.f32.mxu0 %vm8146_vm7, %v8145_v50  ;;  %v4917_v49 = vadd.f32 %v6758_v43, %v4916_v36 }
0x1dda   :  { %v7563_v37 = vpop.f32.mrb[40].mxu0 }
0x1ddb   :  { %v4834_v40 = vadd.f32 %v7563_v37, %v6750_v23  ;;  %v4828_v41 = vpop.f32.mrb[41].mxu0 }
0x1ddc   :  { %v4829_v44 = vadd.f32 %v6750_v23, %v4828_v41 }
0x1ddd   :  { %7581 = vmatpush3.xpose.msk.msra.mxu1 %vm569_vm8, %v4834_v40 }
0x1dde   :  { %7576 = vmatpush3.xpose.msk.msra.mxu0 %vm569_vm8, %v4829_v44  ;;  %7590 = vmatprep.subr.mxu1 %v8145_v50 }
0x1ddf   :  { %7585 = vmatprep.subr.mxu0 %v8145_v50 }
0x1de0   :  { %7583 = vmatmul.mubr.msk.f32.vlgmr.msra.gmra.mrb[58].mxu1 %vm569_vm8, %v4746_v45  ;;  %v6783_v45 = vld [vmem:[%s9364_s7 + $0x7] ss:$0 sm:$0xff] }
0x1de1   :  { %7578 = vmatmul.mubr.msk.f32.vlgmr.msra.gmra.mrb[42].mxu0 %vm569_vm8, %v4741_v46  ;;  %7591 = vmatpush3.msra.mxu1 %v4922_v47 }
0x1de2   :  { %7586 = vmatpush3.msra.mxu0 %v4917_v49  ;;  %7592 = vmatprep.mubr.msk.f32.mxu1 %vm8146_vm7, %v8145_v50  ;;  %v6775_v49 = vld [vmem:[%s9365_s4 + $0x7] ss:$0 sm:$0xff] }
0x1de3   :  { %7587 = vmatprep.mubr.msk.f32.mxu0 %vm8146_vm7, %v8145_v50  ;;  %7935 = vmatprep.subr.bf16.mxu1 %v7934_v2 }
0x1de4   :  { %7595 = vmatprep.subr.mxu0 %v6767_v3 }
0x1eb3   :  { %v5073_v52 = vpop.f32.mrb[58].mxu1 }
0x1eb4   :  { %v5074_v53 = vadd.f32 %v5073_v52, %v8352_v39  ;;  %v4997_v19 = vpop.f32.mrb[42].mxu0  ;;  %v7584_v18 = vpop.f32.mrb[59].mxu1 }
0x1eb5   :  { %v4998_v54 = vadd.f32 %v4997_v19, %v8350_v38  ;;  %v7579_v55 = vpop.f32.mrb[43].mxu0 }
0x1eb6   :  { %v5080_v56 = vsel %vm569_vm8, %v5074_v53, -inf }
0x1eb7   :  { %5081 = vmax.xlane.f32.xlu0 %v5080_v56  ;;  %v5077_v57 = vsel %vm569_vm8, %v4998_v54, -inf }
0x1eb8   :  { %5078 = vmax.xlane.f32.xlu1 %v5077_v57 }
0x1f44   :  { %v5082_v58 = vpop.xlane.xlu0 %5081 }
0x1f45   :  { %v5084_v59 = vsub.f32 %v5074_v53, %v5082_v58  ;;  %v5079_v60 = vpop.xlane.xlu1 %5078 }
0x1f46   :  { %v5083_v48 = vsub.f32 %v4998_v54, %v5079_v60 }
0x1f47   :  { %v5087_v61 = vmul.f32 1.442695, %v5084_v59 }
0x1f48   :  { %v5085_v51 = vmul.f32 1.442695, %v5083_v48 }
0x1f49   :  { %8084 = vpow2.f32 %v5087_v61 }
0x1f4a   :  { %8086 = vpow2.f32 %v5085_v51 }
0x1f53   :  { %v8085_v62 = vpop.eup %8084 }
0x1f54   :  { %v8087_v42 = vpop.eup %8086  ;;  %v5092_v35 = vsel %vm569_vm8, %v8085_v62, 0.0 }
0x1f55   :  { %5093 = vadd.xlane.f32.xlu0 %v5092_v35  ;;  %v5089_v63 = vsel %vm569_vm8, %v8087_v42, 0.0 }
0x1f56   :  { %5090 = vadd.xlane.f32.xlu1 %v5089_v63 }
0x1fe2   :  { %v5094_v4 = vpop.xlane.xlu0 %5093 }
0x1fe3   :  { %8088 = vrcp.f32 %v5094_v4  ;;  %v5091_v5 = vpop.xlane.xlu1 %5090 }
0x1fe4   :  { %8090 = vrcp.f32 %v5091_v5 }
0x1fed   :  { %v8089_v8 = vpop.eup %8088 }
0x1fee   :  { %v8091_v9 = vpop.eup %8090  ;;  %v5098_v10 = vmul.f32 %v8089_v8, %v8085_v62  ;;  %v6800_v8 = vld [vmem:[%s9315_s14 + $0x38] sm:$0xff] }
0x1fef   :  { %v5097_v12 = vmul.f32 %v8091_v9, %v8087_v42 }
0x1ff0   :  { %7593 = vmatmul.mubr.msk.f32.vlgmr.msra.gmra.mrb[60].mxu1 %vm569_vm8, %v5098_v10 }
0x1ff1   :  { %7937 = vmatpush3.bf16.msra.mxu1 %v7934_v2  ;;  %7588 = vmatmul.mubr.msk.f32.vlgmr.msra.gmra.mrb[44].mxu0 %vm569_vm8, %v5097_v12 }
0x1ff2   :  { %7608 = vmatprep.mubr.msk.f32.mxu1 %vm225_vm6, %v8855_v17  ;;  %7939 = vmatprep.subr.bf16.mxu1 %v7938_v11 }
0x1ff3   :  { %7596 = vmatpush3.msra.mxu0 %v6767_v3 }
0x1ff4   :  { %7943 = vmatprep.subr.bf16.mxu0 %v7942_v28 }
0x1ff5   :  { %7941 = vmatpush3.bf16.msra.mxu1 %v7938_v11 }
0x1ff6   :  { %7951 = vmatprep.subr.bf16.mxu1 %v7950_v16 }
0x1ff8   :  { %7609 = vmatmul.mubr.msk.f32.vlgmr.msra.gmra.mrb[62].mxu1 %vm225_vm6, %v8857_v20 }
0x1ff9   :  { %7953 = vmatpush3.bf16.msra.mxu1 %v7950_v16  ;;  %7630 = vmatprep.mubr.msk.f32.mxu1 %vm225_vm6, %v8855_v17 }
0x1ffa   :  { %7955 = vmatprep.subr.bf16.mxu1 %v7954_v25 }
0x1ffd   :  { %7957 = vmatpush3.bf16.msra.mxu1 %v7954_v25 }
0x1ffe   :  { %7643 = vmatprep.subr.mxu1 %v8145_v50 }
0x2000   :  { %7631 = vmatmul.mubr.msk.f32.vlgmr.msra.gmra.mrb[64].mxu1 %vm225_vm6, %v8857_v20 }
0x2001   :  { %7645 = vmatprep.mubr.msk.f32.mxu1 %vm8146_vm7, %v8145_v50 }
0x20c3   :  { %v5241_v31 = vpop.f32.mrb[60].mxu1 }
0x20c4   :  { %v5168_v32 = vpop.f32.mrb[44].mxu0  ;;  %v7594_v33 = vpop.f32.mrb[61].mxu1 }
0x20c5   :  { %v7589_v36 = vpop.f32.mrb[45].mxu0  ;;  %7597 = vmatprep.mubr.msk.f32.mxu0 %vm569_vm8, %v5168_v32 }
0x20c6   :  { %7598 = vmatmul.mubr.msk.f32.vlgmr.msra.gmra.mrb[38].mxu0 %vm569_vm8, %v5241_v31 }
0x20c7   :  { %7945 = vmatpush3.bf16.msra.mxu0 %v7942_v28  ;;  %7619 = vmatprep.mubr.msk.f32.mxu0 %vm225_vm6, %v8855_v17 }
0x20c8   :  { %7947 = vmatprep.subr.bf16.mxu0 %v7946_v21 }
0x20cb   :  { %v7610_v23 = vpop.f32.mrb[62].mxu1  ;;  %7949 = vmatpush3.bf16.msra.mxu0 %v7946_v21 }
0x20cc   :  { %v5409_v37 = vpop.f32.mrb[63].mxu1  ;;  %7633 = vmatprep.subr.mxu0 %v8145_v50  ;;  %v5415_v18 = vadd.f32 %v7610_v23, %v6775_v49 }
0x20cd   :  { %v5410_v53 = vadd.f32 %v6775_v49, %v5409_v37 }
0x20ce   :  { %7620 = vmatmul.mubr.msk.f32.vlgmr.msra.gmra.mrb[46].mxu0 %vm225_vm6, %v8857_v20 }
0x20cf   :  { %7635 = vmatprep.mubr.msk.f32.mxu0 %vm8146_vm7, %v8145_v50 }
0x20d3   :  { %v7632_v40 = vpop.f32.mrb[64].mxu1 }
0x20d4   :  { %v5591_v41 = vadd.f32 %v7632_v40, %v6791_v34  ;;  %v5585_v43 = vpop.f32.mrb[65].mxu1 }
0x20d5   :  { %v5586_v44 = vadd.f32 %v6791_v34, %v5585_v43  ;;  %v6810_v34 = vld [vmem:[%s9319_s18 + $0x28] sm:$0xff]  ;;  %v6812_v43 = vld [vmem:[%s9319_s18 + $0x38] sm:$0xff] }
0x20d7   :  { %7644 = vmatpush3.msra.mxu1 %v5586_v44 }
0x21a1   :  { %v7621_v46 = vpop.f32.mrb[46].mxu0 }
0x21a2   :  { %v5497_v47 = vpop.f32.mrb[47].mxu0  ;;  %v5503_v19 = vadd.f32 %v7621_v46, %v6783_v45 }
0x21a3   :  { %v5498_v52 = vadd.f32 %v6783_v45, %v5497_v47 }
0x21a5   :  { %7634 = vmatpush3.xpose.msk.msra.mxu0 %vm569_vm8, %v5498_v52 }
0x21a6   :  { %7638 = vmatprep.subr.mxu0 %v8145_v50 }
0x21a8   :  { %7636 = vmatmul.mubr.msk.f32.vlgmr.msra.gmra.mrb[48].mxu0 %vm569_vm8, %v5410_v53 }
0x21a9   :  { %7639 = vmatpush3.xpose.msk.msra.mxu0 %vm569_vm8, %v5503_v19  ;;  %7640 = vmatprep.mubr.msk.f32.mxu0 %vm8146_vm7, %v8145_v50 }
0x21aa   :  { %7648 = vmatprep.subr.mxu0 %v8145_v50 }
0x21ac   :  { %7641 = vmatmul.mubr.msk.f32.vlgmr.msra.gmra.mrb[50].mxu0 %vm569_vm8, %v5415_v18  ;;  %v6807_v18 = vld [vmem:[%s9317_s16 + $0x1] ss:$0 sm:$0xff] }
0x21ad   :  { %7649 = vmatpush3.msra.mxu0 %v5591_v41  ;;  %7650 = vmatprep.mubr.msk.f32.mxu0 %vm8146_vm7, %v8145_v50  ;;  %v6811_v41 = vld [vmem:[%s9319_s18 + $0x30] sm:$0xff] }
0x21ae   :  { %7653 = vmatprep.subr.mxu0 %v6800_v8  ;;  %v7962_v44 = vpack.c.bf16 %v6812_v43, %v6811_v41 }
0x227b   :  { %v5666_v54 = vpop.f32.mrb[48].mxu0 }
0x227c   :  { %v5667_v55 = vadd.f32 %v5666_v54, %v8350_v38  ;;  %v7637_v56 = vpop.f32.mrb[49].mxu0 }
0x227e   :  { %v5746_v57 = vsel %vm569_vm8, %v5667_v55, -inf }
0x227f   :  { %5747 = vmax.xlane.f32.xlu1 %v5746_v57  ;;  %v5742_v58 = vpop.f32.mrb[50].mxu0  ;;  %v6808_v57 = vld [vmem:[%s9318_s17 + $0x1] ss:$0 sm:$0xff] }
0x2280   :  { %v5743_v59 = vadd.f32 %v5742_v58, %v8352_v39  ;;  %v7642_v60 = vpop.f32.mrb[51].mxu0 }
0x2282   :  { %v5749_v48 = vsel %vm569_vm8, %v5743_v59, -inf }
0x2283   :  { %5750 = vmax.xlane.f32.xlu0 %v5749_v48 }
0x230c   :  { %v5748_v61 = vpop.xlane.xlu1 %5747 }
0x230d   :  { %v5752_v51 = vsub.f32 %v5667_v55, %v5748_v61  ;;  %v6817_v61 = vld [vmem:[%s9321_s20 + $0x40] sm:$0xff] }
0x230f   :  { %v5754_v62 = vmul.f32 1.442695, %v5752_v51  ;;  %v6818_v51 = vld [vmem:[%s9321_s20 + $0x48] sm:$0xff] }
0x2310   :  { %v5751_v42 = vpop.xlane.xlu0 %5750 }
0x2311   :  { %8092 = vpow2.f32 %v5754_v62  ;;  %v5753_v35 = vsub.f32 %v5743_v59, %v5751_v42  ;;  %v7966_v62 = vpack.c.bf16 %v6818_v51, %v6817_v61  ;;  %v6819_v42 = vld [vmem:[%s9321_s20 + $0x50] sm:$0xff] }
0x2313   :  { %v5756_v63 = vmul.f32 1.442695, %v5753_v35  ;;  %v6820_v35 = vld [vmem:[%s9321_s20 + $0x58] sm:$0xff] }
0x2315   :  { %8094 = vpow2.f32 %v5756_v63  ;;  %v7970_v63 = vpack.c.bf16 %v6820_v35, %v6819_v42 }
0x231b   :  { %v8093_v38 = vpop.eup %8092 }
0x231c   :  { %v5758_v0 = vsel %vm569_vm8, %v8093_v38, 0.0 }
0x231d   :  { %5759 = vadd.xlane.f32.xlu1 %v5758_v0  ;;  %v6822_v0 = vld [vmem:[%s9321_s20 + $0x68] sm:$0xff] }
0x231f   :  { %v8095_v1 = vpop.eup %8094 }
0x2320   :  { %v5761_v2 = vsel %vm569_vm8, %v8095_v1, 0.0 }
0x2321   :  { %5762 = vadd.xlane.f32.xlu0 %v5761_v2  ;;  %v6823_v2 = vld [vmem:[%s9321_s20 + $0x70] sm:$0xff] }
0x23aa   :  { %v5760_v39 = vpop.xlane.xlu1 %5759 }
0x23ab   :  { %8096 = vrcp.f32 %v5760_v39  ;;  %v6824_v39 = vld [vmem:[%s9321_s20 + $0x78] sm:$0xff] }
0x23ae   :  { %v5763_v3 = vpop.xlane.xlu0 %5762 }
0x23af   :  { %8098 = vrcp.f32 %v5763_v3  ;;  %v7978_v3 = vpack.c.bf16 %v6824_v39, %v6823_v2 }
0x23b5   :  { %v8097_v4 = vpop.eup %8096 }
0x23b6   :  { %v5766_v5 = vmul.f32 %v8097_v4, %v8093_v38  ;;  %v6821_v38 = vld [vmem:[%s9321_s20 + $0x60] sm:$0xff] }
0x23b7   :  { %v6814_v4 = vld [vmem:[%s9320_s19 + $0x1] ss:$0 sm:$0xff] }
0x23b8   :  { %7646 = vmatmul.mubr.msk.f32.vlgmr.msra.gmra.mrb[66].mxu1 %vm569_vm8, %v5766_v5 }
0x23b9   :  { %v8099_v6 = vpop.eup %8098 }
0x23ba   :  { %v5767_v7 = vmul.f32 %v8099_v6, %v8095_v1  ;;  %v7974_v1 = vpack.c.bf16 %v6822_v0, %v6821_v38  ;;  %v6826_v0 = vld [vmem:[%s9322_s21 + $0x1] ss:$0 sm:$0xff] }
0x23bc   :  { %7651 = vmatmul.mubr.msk.f32.vlgmr.msra.gmra.mrb[52].mxu0 %vm569_vm8, %v5767_v7 }
0x23bd   :  { %7654 = vmatpush3.msra.mxu0 %v6800_v8 }
0x23be   :  { %7967 = vmatprep.subr.bf16.mxu0 %v7966_v62 }
0x248b   :  { %v5837_v9 = vpop.f32.mrb[66].mxu1 }
0x248c   :  { %v7647_v10 = vpop.f32.mrb[67].mxu1  ;;  %7655 = vmatprep.mubr.msk.f32.mxu0 %vm569_vm8, %v5837_v9 }
0x248f   :  { %v5910_v11 = vpop.f32.mrb[52].mxu0 }
0x2490   :  { %v7652_v12 = vpop.f32.mrb[53].mxu0  ;;  %7656 = vmatmul.mubr.msk.f32.vlgmr.msra.gmra.mrb[38].mxu0 %vm569_vm8, %v5910_v11 }
0x2491   :  { %7969 = vmatpush3.bf16.msra.mxu0 %v7966_v62 }
0x2492   :  { %7971 = vmatprep.subr.bf16.mxu0 %v7970_v63 }
0x2495   :  { %7973 = vmatpush3.bf16.msra.mxu0 %v7970_v63 }
0x2496   :  { %7975 = vmatprep.subr.bf16.mxu0 %v7974_v1 }
0x2499   :  { %7977 = vmatpush3.bf16.msra.mxu0 %v7974_v1 }
0x249a   :  { %7979 = vmatprep.subr.bf16.mxu0 %v7978_v3 }
0x249d   :  { %7981 = vmatpush3.bf16.msra.mxu0 %v7978_v3 }
0x2563   :  { %v7657_v14 = vpop.f32.mrb[38].mxu0 }
0x2564   :  { %v6008_v16 = vadd.f32 %v7657_v14, %v6804_v13  ;;  %v5988_v22 = vpop.f32.mrb[39].mxu0 }
0x2565   :  { %v6007_v24 = vadd.f32 %v6804_v13, %v5988_v22 }
0x2566   :  { %v6010_v25 = vadd.f32 %v6008_v16, %v8857_v20 }
0x2567   :  { %v6009_v26 = vadd.f32 %v6007_v24, %v8855_v17  ;;  %v6809_v17 = vld [vmem:[%s9319_s18 + $0x20] sm:$0xff] }
0x2568   :  { %v6018_v27 = vsel %vm225_vm6, %v6010_v25, 0.0  ;;  %v7958_v40 = vpack.c.bf16 %v6810_v34, %v6809_v17 }
0x2569   :  { %6019 = vadd.xlane.f32.xlu0 %v6018_v27  ;;  %v6015_v28 = vsel %vm225_vm6, %v6009_v26, 0.0 }
0x256a   :  { %6016 = vadd.xlane.f32.xlu1 %v6015_v28  ;;  %7959 = vmatprep.subr.bf16.mxu1 %v7958_v40 }
0x256b   :  { %7961 = vmatpush3.bf16.msra.mxu1 %v7958_v40 }
0x256c   :  { %7963 = vmatprep.subr.bf16.mxu1 %v7962_v44 }
0x256f   :  { %7965 = vmatpush3.bf16.msra.mxu1 %v7962_v44 }
0x25f6   :  { %v6020_v29 = vpop.xlane.xlu0 %6019 }
0x25f7   :  { %v6022_v30 = vmul.f32 0.03125, %v6020_v29  ;;  %v6017_v31 = vpop.xlane.xlu1 %6016 }
0x25f8   :  { %v6021_v32 = vmul.f32 0.03125, %v6017_v31 }
0x25f9   :  { %v6024_v33 = vsub.f32 %v6010_v25, %v6022_v30 }
0x25fa   :  { %v6023_v21 = vsub.f32 %v6009_v26, %v6021_v32 }
0x25fb   :  { %v6026_v36 = vmul.f32 %v6024_v33, %v6024_v33 }
0x25fc   :  { %v6025_v23 = vmul.f32 %v6023_v21, %v6023_v21 }
0x25fd   :  { %v6030_v37 = vsel %vm225_vm6, %v6026_v36, 0.0 }
0x25fe   :  { %6031 = vadd.xlane.f32.xlu0 %v6030_v37  ;;  %v6027_v20 = vsel %vm225_vm6, %v6025_v23, 0.0 }
0x25ff   :  { %6028 = vadd.xlane.f32.xlu1 %v6027_v20 }
0x268b   :  { %v6032_v45 = vpop.xlane.xlu0 %6031 }
0x268c   :  { %v6034_v46 = vmul.f32 0.03125, %v6032_v45  ;;  %v6029_v47 = vpop.xlane.xlu1 %6028 }
0x268d   :  { %v6033_v49 = vmul.f32 0.03125, %v6029_v47 }
0x268e   :  { %v6036_v52 = vadd.f32 1e-12, %v6034_v46 }
0x268f   :  { %v6035_v53 = vadd.f32 1e-12, %v6033_v49 }
0x2690   :  { %8100 = vrsqrt.f32 %v6036_v52 }
0x2691   :  { %8102 = vrsqrt.f32 %v6035_v53 }
0x269a   :  { %v8101_v19 = vpop.eup %8100 }
0x269b   :  { %v8103_v54 = vpop.eup %8102  ;;  %v6040_v55 = vmul.f32 %v8101_v19, %v6024_v33 }
0x269c   :  { %v6039_v56 = vmul.f32 %v8103_v54, %v6023_v21 }
0x269d   :  { %v6048_v58 = vmul.f32 %v6807_v18, %v6040_v55 }
0x269e   :  { %v6047_v59 = vmul.f32 %v6807_v18, %v6039_v56 }
0x269f   :  { %v9201_v48 = vadd.f32 %v6808_v57, %v6048_v58 }
0x26a0   :  { %v9199_v60 = vadd.f32 %v6808_v57, %v6047_v59 }
0x26a2   :  { %7666 = vmatprep.mubr.msk.f32.mxu1 %vm225_vm6, %v9199_v60 }
0x26a3   :  { %7667 = vmatmul.mubr.msk.f32.vlgmr.msra.gmra.mrb[68].mxu1 %vm225_vm6, %v9201_v48 }
0x26a4   :  { %7696 = vmatprep.mubr.msk.f32.mxu1 %vm8146_vm7, %v8145_v50 }
0x2776   :  { %v7668_v5 = vpop.f32.mrb[68].mxu1 }
0x2777   :  { %v6148_v6 = vadd.f32 %v7668_v5, %v6814_v4  ;;  %v6142_v7 = vpop.f32.mrb[69].mxu1 }
0x2778   :  { %v6143_v8 = vadd.f32 %v6814_v4, %v6142_v7 }
0x2779   :  { %v6154_v9 = vmul.f32 0.70710677, %v6148_v6  ;;  %v6152_v35 = vmul.f32 0.5, %v6148_v6 }
0x277a   :  { %v6153_v10 = vmul.f32 0.70710677, %v6143_v8  ;;  %v6151_v62 = vmul.f32 0.5, %v6143_v8 }
0x277b   :  { %v6160_v11 = vand.u32 2147483647, %v6154_v9  ;;  %vm6156_vm12 = vcmp.ge.f32.partialorder %v6154_v9, 0.0 }
0x277c   :  { %v6159_v12 = vand.u32 2147483647, %v6153_v10  ;;  %vm6155_vm13 = vcmp.ge.f32.partialorder %v6153_v10, 0.0  ;;  %v6158_v56 = vsel %vm6156_vm12, 1.0, %v8147_v15 }
0x277d   :  { %v6162_v13 = vmul.f32 0.3275911, %v6160_v11  ;;  %v6188_v24 = vsub.f32 0.0, %v6160_v11  ;;  %v6157_v59 = vsel %vm6155_vm13, 1.0, %v8147_v15 }
0x277e   :  { %v6161_v14 = vmul.f32 0.3275911, %v6159_v12  ;;  %v6187_v25 = vsub.f32 0.0, %v6159_v12 }
0x277f   :  { %v6164_v16 = vadd.f32 1.0, %v6162_v13  ;;  %v6190_v27 = vmul.f32 %v6188_v24, %v6160_v11 }
0x2780   :  { %v6163_v22 = vadd.f32 1.0, %v6161_v14  ;;  %v6189_v30 = vmul.f32 %v6187_v25, %v6159_v12  ;;  %v8148_v25 = vmov 0.0|0.0  }
0x2781   :  { %8104 = vrcp.f32 %v6164_v16  ;;  %v6193_v33 = vmul.f32 1.442695, %v6190_v27  ;;  %7982 = vmatprep.subr.bf16.mxu1 %v8148_v25  ;;  %v6354_v27 = vld [vmem:[%s9325_s24 + $0x18] sm:$0xff] }
0x2782   :  { %8106 = vrcp.f32 %v6163_v22  ;;  %v6191_v23 = vmul.f32 1.442695, %v6189_v30  ;;  %v6352_v22 = vld [vmem:[%s9325_s24 + $0x8] sm:$0xff] }
0x2783   :  { %8108 = vpow2.f32 %v6193_v33 }
0x2784   :  { %8110 = vpow2.f32 %v6191_v23  ;;  %v6831_v23 = vld [vmem:[%s9323_s22 + $0x1] ss:$0 sm:$0xff] }
0x278b   :  { %v8105_v26 = vpop.eup %8104 }
0x278c   :  { %v8107_v28 = vpop.eup %8106  ;;  %v6170_v29 = vmul.f32 1.0614054, %v8105_v26 }
0x278d   :  { %v6169_v31 = vmul.f32 1.0614054, %v8107_v28  ;;  %v8109_v52 = vpop.eup %8108 }
0x278e   :  { %v6172_v32 = vadd.f32 -1.4531521, %v6170_v29  ;;  %v8111_v19 = vpop.eup %8110 }
0x278f   :  { %v6171_v21 = vadd.f32 -1.4531521, %v6169_v31 }
0x2790   :  { %v6174_v36 = vmul.f32 %v8105_v26, %v6172_v32 }
0x2791   :  { %v6173_v37 = vmul.f32 %v8107_v28, %v6171_v21 }
0x2792   :  { %v6176_v20 = vadd.f32 1.4214138, %v6174_v36 }
0x2793   :  { %v6175_v17 = vadd.f32 1.4214138, %v6173_v37 }
0x2794   :  { %v6178_v34 = vmul.f32 %v8105_v26, %v6176_v20 }
0x2795   :  { %v6177_v40 = vmul.f32 %v8107_v28, %v6175_v17 }
0x2796   :  { %v6180_v41 = vadd.f32 -0.28449672, %v6178_v34  ;;  %v6832_v34 = vld [vmem:[%s9366_s6 + $0x1] ss:$0 sm:$0xff] }
0x2797   :  { %v6179_v43 = vadd.f32 -0.28449672, %v6177_v40 }
0x2798   :  { %v6182_v44 = vmul.f32 %v8105_v26, %v6180_v41 }
0x2799   :  { %v6181_v45 = vmul.f32 %v8107_v28, %v6179_v43 }
0x279a   :  { %v6184_v46 = vadd.f32 0.2548296, %v6182_v44 }
0x279b   :  { %v6183_v47 = vadd.f32 0.2548296, %v6181_v45 }
0x279c   :  { %v6186_v49 = vmul.f32 %v8105_v26, %v6184_v46  ;;  %v6353_v26 = vld [vmem:[%s9325_s24 + $0x10] sm:$0xff] }
0x279d   :  { %v6185_v53 = vmul.f32 %v8107_v28, %v6183_v47  ;;  %v7986_v28 = vpack.c.bf16 %v6354_v27, %v6353_v26  ;;  %v6440_v47 = vld [vmem:[%s9327_s26] sm:$0xff] }
0x279e   :  { %v6196_v18 = vmul.f32 %v8109_v52, %v6186_v49  ;;  %v6441_v49 = vld [vmem:[%s9327_s26 + $0x8] sm:$0xff]  ;;  %v6442_v52 = vld [vmem:[%s9327_s26 + $0x10] sm:$0xff] }
0x279f   :  { %v6195_v54 = vmul.f32 %v8111_v19, %v6185_v53  ;;  %v7989_v53 = vpack.c.bf16 %v6441_v49, %v6440_v47  ;;  %v6443_v19 = vld [vmem:[%s9327_s26 + $0x18] sm:$0xff]  ;;  %s8149_s26 = smov [#allocation2]  }
0x27a0   :  { %v6198_v55 = vsub.f32 1.0, %v6196_v18  ;;  %v7992_v18 = vpack.c.bf16 %v6443_v19, %v6442_v52  ;;  %s6532_s5 = sshll.u32 %s8149_s26, 4  ;;  %s6533_s5 = int_to_ptr.vmem [resolvable:$true] %s6532_s5 }
0x27a1   :  { %v6197_v57 = vsub.f32 1.0, %v6195_v54  ;;  %p8123_p1 = scmp.lt.s32.totalorder %s6533_s5, %s6533_s5 }
0x27a2   :  { %v6200_v58 = vmul.f32 %v6198_v55, %v6158_v56 }
0x27a3   :  { %v6199_v61 = vmul.f32 %v6197_v57, %v6157_v59 }
0x27a4   :  { %v6202_v51 = vadd.f32 1.0, %v6200_v58  ;;  %v6835_v58 = vld [vmem:[%s9328_s27] ss:$0 sm:$0xff] }
0x27a5   :  { %v6201_v42 = vadd.f32 1.0, %v6199_v61 }
0x27a6   :  { %v6204_v38 = vmul.f32 %v6202_v51, %v6152_v35 }
0x27a7   :  { %v6203_v63 = vmul.f32 %v6201_v42, %v6151_v62 }
0x27a9   :  { %7685 = vmatprep.mubr.msk.f32.mxu0 %vm3193_vm11, %v6203_v63 }
0x27aa   :  { %7686 = vmatmul.mubr.msk.f32.vlgmr.msra.gmra.mrb[54].mxu0 %vm3193_vm11, %v6204_v38 }
0x287d   :  { %v7687_v1 = vpop.f32.mrb[54].mxu0 }
0x287e   :  { %v6300_v2 = vadd.f32 %v7687_v1, %v6826_v0  ;;  %v6294_v39 = vpop.f32.mrb[55].mxu0 }
0x287f   :  { %v6295_v3 = vadd.f32 %v6826_v0, %v6294_v39 }
0x2880   :  { %v6304_v15 = vadd.f32 %v6300_v2, %v9201_v48 }
0x2881   :  { %v6303_v4 = vadd.f32 %v6295_v3, %v9199_v60  ;;  %v6351_v60 = vld [vmem:[%s9325_s24] sm:$0xff] }
0x2882   :  { %v6312_v5 = vsel %vm225_vm6, %v6304_v15, 0.0  ;;  %v7983_v24 = vpack.c.bf16 %v6352_v22, %v6351_v60 }
0x2883   :  { %6313 = vadd.xlane.f32.xlu1 %v6312_v5  ;;  %v6309_v6 = vsel %vm225_vm6, %v6303_v4, 0.0 }
0x2884   :  { %6310 = vadd.xlane.f32.xlu0 %v6309_v6  ;;  %7984 = vmatpush3.bf16.msra.mxu1 %v7983_v24 }
0x2885   :  { %7985 = vmatprep.subr.bf16.mxu1 %v8148_v25 }
0x2888   :  { %7987 = vmatpush3.bf16.msra.mxu1 %v7986_v28 }
0x2889   :  { %7988 = vmatprep.subr.bf16.mxu1 %v8148_v25 }
0x2910   :  { %v6314_v7 = vpop.xlane.xlu1 %6313 }
0x2911   :  { %v6316_v8 = vmul.f32 0.03125, %v6314_v7  ;;  %v6311_v9 = vpop.xlane.xlu0 %6310 }
0x2912   :  { %v6315_v10 = vmul.f32 0.03125, %v6311_v9 }
0x2913   :  { %v6318_v11 = vsub.f32 %v6304_v15, %v6316_v8 }
0x2914   :  { %v6317_v12 = vsub.f32 %v6303_v4, %v6315_v10 }
0x2915   :  { %v6320_v13 = vmul.f32 %v6318_v11, %v6318_v11 }
0x2916   :  { %v6319_v14 = vmul.f32 %v6317_v12, %v6317_v12 }
0x2917   :  { %v6324_v16 = vsel %vm225_vm6, %v6320_v13, 0.0 }
0x2918   :  { %6325 = vadd.xlane.f32.xlu1 %v6324_v16  ;;  %v6321_v48 = vsel %vm225_vm6, %v6319_v14, 0.0 }
0x2919   :  { %6322 = vadd.xlane.f32.xlu0 %v6321_v48 }
0x29a5   :  { %v6326_v29 = vpop.xlane.xlu1 %6325 }
0x29a6   :  { %v6328_v30 = vmul.f32 0.03125, %v6326_v29  ;;  %v6323_v31 = vpop.xlane.xlu0 %6322 }
0x29a7   :  { %v6327_v32 = vmul.f32 0.03125, %v6323_v31 }
0x29a8   :  { %v6330_v33 = vadd.f32 1e-12, %v6328_v30 }
0x29a9   :  { %v6329_v21 = vadd.f32 1e-12, %v6327_v32 }
0x29aa   :  { %8112 = vrsqrt.f32 %v6330_v33 }
0x29ab   :  { %8114 = vrsqrt.f32 %v6329_v21 }
0x29b4   :  { %v8113_v36 = vpop.eup %8112 }
0x29b5   :  { %v8115_v37 = vpop.eup %8114  ;;  %v6334_v20 = vmul.f32 %v8113_v36, %v6318_v11 }
0x29b6   :  { %v6333_v17 = vmul.f32 %v8115_v37, %v6317_v12 }
0x29b7   :  { %v6342_v40 = vmul.f32 %v6831_v23, %v6334_v20 }
0x29b8   :  { %v6341_v41 = vmul.f32 %v6831_v23, %v6333_v17 }
0x29b9   :  { %v6350_v43 = vadd.f32 %v6832_v34, %v6342_v40 }
0x29ba   :  { %v6349_v44 = vadd.f32 %v6832_v34, %v6341_v41 }
0x29bb   :  { %v6364_v45 = vrot.slane %v6350_v43, 7 }
0x29bd   :  { %v6366_v46 = vsel %vm6365_vm14, %v6364_v45, %v6349_v44 }
0x29be   :  { %7697 = vmatmul.mubr.msk.f32.vlgmr.msra.gmra.mrb[70].mxu1 %vm225_vm6, %v6366_v46 }
0x29bf   :  { %7707 = vmatprep.mubr.msk.f32.mxu1 %vm8146_vm7, %v8145_v50  ;;  %7990 = vmatpush3.bf16.msra.mxu1 %v7989_v53  ;;  %v6833_v50 = vld [vmem:[%s9326_s25] ss:$0 sm:$0xff]  ;;  %s8118_s25 = scalar_lea.vmem %s6533_s5, 32 }
0x29c0   :  { %7991 = vmatprep.subr.bf16.mxu1 %v8148_v25  ;;  %p8119_p0 = scmp.ne.s32.totalorder %s6533_s5, %s8118_s25  ;;  %p8124_p2 = scmp.lt.s32.totalorder %s8118_s25, %s8118_s25 }
0x29c2   :  { %p8125_p3 = por %p8124_p2, %p8123_p1 }
0x29c3   :  { %7993 = vmatpush3.bf16.msra.mxu1 %v7992_v18 }
0x29c4   :  { %p8126_p4 = pnand %p8125_p3, %p8119_p0 }
0x2a91   :  { %v6435_v54 = vpop.f32.mrb[70].mxu1 }
0x2a92   :  { %v6436_v55 = vadd.f32 %v6833_v50, %v6435_v54  ;;  %v7698_v56 = vpop.f32.mrb[71].mxu1 }
0x2a94   :  { %8116 = vtanh.f32 %v6436_v55 }
0x2a9e   :  { %v8117_v57 = vpop.eup %8116 }
0x2a9f   :  { %7708 = vmatmul.mubr.msk.f32.vlgmr.msra.gmra.mrb[72].mxu1 %vm225_vm6, %v8117_v57 }
0x2b72   :  { %v6520_v59 = vpop.f32.mrb[72].mxu1 }
0x2b73   :  { %v6521_v61 = vadd.f32 %v6835_v58, %v6520_v59  ;;  %v7709_v51 = vpop.f32.mrb[73].mxu1 }
0x2b75   :  { %6525 = vst.msk [vmem:[#allocation2] sm:$0x3] %vm6524_vm15, %v6521_v61 }
0x2b76   :  { %8129 = shalt.err (!%p8126_p4)
}
0x2b77   :  { %s8130_s21 = scalar_lea.hbm %s9329_s28, 32 }
0x2b78   :  { %p8131_p5 = scmp.ne.s32.totalorder %s9329_s28, %s8130_s21  ;;  %p8134_p6 = scmp.lt.u32.totalorder %s8130_s21, %s9329_s28 }
0x2b7a   :  { %p8136_p7 = pnand %p8134_p6, %p8131_p5 }
0x2b7c   :  { %8139 = shalt.err (!%p8136_p7)
}
0x2b7d   :  { %6535 = dma.vmem_to_hbm [thread:$0]  %s6533_s5, 32, %s9329_s28, [#allocation3]  }
0x2b7e   :  { %8140 = dma.done.wait [#allocation3], 32  }
0x2b7f   :  { %8141 = vsyncadd [#allocation3], 4294967264 }
0x2b80   :  { %6539 = vsyncpa [#allocation3], 1 }

</bundles_post_ra>
